<compile_context>
chip_gen: v7x
topology: tpu7x:2x2x1
jax: 0.10.0
libtpu: 0.0.40
codegen_flags: <defaults>
</compile_context>

<pallas_src>
import math
import numpy as np
import jax
import jax.numpy as jnp
from jax import lax
from jax.experimental import pallas as pl
from jax.experimental.pallas import tpu as pltpu


def _round_up(x, m):
    return (x + m - 1) // m * m


def _vmem_limit_bytes():
    # Per-generation VMEM budget: ~100 MiB on v5e/v6e (128 MiB physical),
    # ~56 MiB on v7x (64 MiB physical, leave headroom for Mosaic internal scratch).
    cap = 128 * 1024 * 1024
    try:
        info = pltpu.get_tpu_info()
        cap = int(getattr(info, "vmem_capacity_bytes", cap))
    except Exception:
        pass
    return int(min(max(cap - 8 * 1024 * 1024, 32 * 1024 * 1024), 100 * 1024 * 1024))


def make_gru_kernel(num_layers, hidden, batch_tile, time_tile, n_weights, use_abs):
    H, TB, TT, L = hidden, batch_tile, time_tile, num_layers

    # Weight-array index ranges per layer (layer 0's input projection is hoisted
    # to the wrapper, so it only carries whh0 / bhn0).
    layer_w_idx = []
    idx = 0
    for l in range(L):
        n = 2 if l == 0 else 4
        layer_w_idx.append(list(range(idx, idx + n)))
        idx += n
    assert idx == n_weights

    def kernel(lens_ref, gi0_ref, *refs):
        w_hbm = refs[:n_weights]                         # raw HBM refs (pl.ANY)
        out_ref = refs[n_weights]                        # (TB, H) f32; doubles as the
                                                         # "last valid step" accumulator
        w_vmem = refs[n_weights + 1: 2 * n_weights + 1]  # single-buffered VMEM weight copies
        h_ref = refs[2 * n_weights + 1]                  # (L, TB, H) f32 per-layer carried states
        seq_ref = refs[2 * n_weights + 2]                # (TT*TB, H) f32 chunk outputs (next layer's input)
        w_sem = refs[2 * n_weights + 3]                  # (n_weights,) DMA semaphores

        c = pl.program_id(1)              # time-chunk index ("arbitrary" == sequential)
        nc = pl.num_programs(1)

        @pl.when(c == 0)
        def _init():
            h_ref[...] = jnp.zeros_like(h_ref)
            out_ref[...] = jnp.zeros_like(out_ref)
            # Weights are grid-constant per batch tile: kick off ALL HBM->VMEM
            # copies now (single-buffered, no default 2x buffering of constants);
            # they are waited lazily per layer so layer-0 compute overlaps the
            # fetch of the deeper layers' weights.
            for i in range(n_weights):
                pltpu.make_async_copy(w_hbm[i], w_vmem[i], w_sem.at[i]).start()

        lens = lens_ref[...]              # (TB, 1) int32

        for l in range(L):
            @pl.when(c == 0)
            def _wait_layer_weights(l=l):
                for i in layer_w_idx[l]:
                    pltpu.make_async_copy(w_hbm[i], w_vmem[i], w_sem.at[i]).wait()

            wi = layer_w_idx[l]
            if l == 0:
                whh = w_vmem[wi[0]][...]          # (H, 3H) bf16
                bhn = w_vmem[wi[1]][...]          # (1, H)  f32
                # Layer-0 input projection was hoisted to the wrapper (bf16 stream).
                get_gi = lambda tt: gi0_ref[tt]   # (TB, 3H) bf16
            else:
                wih = w_vmem[wi[0]][...]          # (H, 3H) bf16
                bgi = w_vmem[wi[1]][...]          # (1, 3H) f32 (b_ih + b_hh for r,z)
                whh = w_vmem[wi[2]][...]          # (H, 3H) bf16
                bhn = w_vmem[wi[3]][...]          # (1, H)  f32
                # Batched input projection for this layer: ONE (TT*TB, H)x(H, 3H)
                # matmul per chunk over all TT timesteps of the previous layer.
                prev = seq_ref[...].astype(jnp.bfloat16)           # (TT*TB, H)
                gi_all = jnp.dot(prev, wih,
                                 preferred_element_type=jnp.float32) + bgi
                get_gi = (lambda tt, g=gi_all:
                          g[tt * TB:(tt + 1) * TB, :])             # (TB, 3H) f32

            h = h_ref[l]                          # (TB, H) f32 carried state
            for tt in range(TT):                  # sequential recurrence (unrolled)
                gi = get_gi(tt)                                    # (TB, 3H)
                gh = jnp.dot(h.astype(jnp.bfloat16), whh,
                             preferred_element_type=jnp.float32)   # (TB, 3H) f32
                r = jax.nn.sigmoid(gi[:, 0:H] + gh[:, 0:H])
                z = jax.nn.sigmoid(gi[:, H:2 * H] + gh[:, H:2 * H])
                n = jnp.tanh(gi[:, 2 * H:3 * H] + r * (gh[:, 2 * H:3 * H] + bhn))
                h = (1.0 - z) * n + z * h
                if l < L - 1:
                    # stash for the next layer's batched input projection
                    seq_ref[tt * TB:(tt + 1) * TB, :] = h
                else:
                    # torch.gather(padded_out, 1, lengths-1): select h at the last
                    # valid step, written straight into the resident out block.
                    t_glob = c * TT + tt
                    mask = lens == (t_glob + 1)                    # (TB, 1)
                    out_ref[...] = jnp.where(mask, h, out_ref[...])
            h_ref[l] = h

        @pl.when(c == nc - 1)
        def _finalize():
            s = out_ref[...]
            ssq = jnp.sum(s * s, axis=1, keepdims=True)
            inv = lax.rsqrt(jnp.maximum(ssq, 1e-30))   # EUP rsqrt; eps guards 0-norm pads
            o = s * inv
            if use_abs:
                o = jnp.abs(o)
            out_ref[...] = o

    return kernel


class EncoderTextPallas:
    """JAX/Pallas equivalent of EncoderText.forward."""

    TT = 8        # timesteps per grid step (amortizes ~0.35us/step pipeline overhead)
    TB_MAX = 128  # MXU-native M (v5e); fits v6e/v7x VMEM budgets with bf16 gi0

    def __init__(self, vocab_size, word_dim, embed_size, num_layers, use_abs=False,
                 key=jax.random.PRNGKey(0)):
        self.word_dim = word_dim
        self.embed_size = embed_size
        self.num_layers = num_layers
        self.use_abs = use_abs
        H = embed_size

        keys = jax.random.split(key, 1 + 4 * num_layers)
        # nn.Embedding weight, uniform_(-0.1, 0.1) as in init_weights()
        self.embed_w = jax.random.uniform(
            keys[0], (vocab_size, word_dim), jnp.float32, -0.1, 0.1)

        # PyTorch GRU default init: U(-1/sqrt(H), 1/sqrt(H)); gate order [r, z, n].
        stdv = 1.0 / math.sqrt(H)
        self.gru_params = []  # f32 reference params: (w_ih_T, w_hh_T, b_ih, b_hh)
        for l in range(num_layers):
            in_dim = word_dim if l == 0 else H
            k = keys[1 + 4 * l: 1 + 4 * (l + 1)]
            w_ih = jax.random.uniform(k[0], (3 * H, in_dim), jnp.float32, -stdv, stdv)
            w_hh = jax.random.uniform(k[1], (3 * H, H), jnp.float32, -stdv, stdv)
            b_ih = jax.random.uniform(k[2], (3 * H,), jnp.float32, -stdv, stdv)
            b_hh = jax.random.uniform(k[3], (3 * H,), jnp.float32, -stdv, stdv)
            self.gru_params.append(
                (w_ih.T, w_hh.T, b_ih.reshape(1, -1), b_hh.reshape(1, -1)))

        # Kernel-side params: bf16 matmul operands, pre-folded biases.
        #   bias_gi = b_ih + [b_hh_r, b_hh_z, 0]   (added once to the input projection)
        #   bias_hn = b_hh_n                        (added inside r * (gh_n + b_hh_n))
        self.k_wih, self.k_whh, self.k_bgi, self.k_bhn = [], [], [], []
        for (wihT, whhT, bih, bhh) in self.gru_params:
            self.k_wih.append(wihT.astype(jnp.bfloat16))
            self.k_whh.append(whhT.astype(jnp.bfloat16))
            folded = bih + jnp.concatenate(
                [bhh[:, :2 * H], jnp.zeros((1, H), jnp.float32)], axis=1)
            self.k_bgi.append(folded)
            self.k_bhn.append(bhh[:, 2 * H:])

    @classmethod
    def _choose_tb(cls, batch):
        # Fat batch tiles so the recurrent (TB,H)x(H,3H) matmul uses the MXU's M
        # dimension; small batches are split into >=2 tiles so the "parallel"
        # batch axis can feed both v7x TensorCores. Always an f32-sublane multiple.
        tb = max(8, _round_up((batch + 1) // 2, 8))
        return min(cls.TB_MAX, tb)

    def __call__(self, x_tokens, lengths):
        H, L, TT = self.embed_size, self.num_layers, self.TT
        x_tokens = jnp.asarray(x_tokens, jnp.int32)

        # --- XLA glue: embedding gather (data-dependent) + layout + hoisted matmul ---
        x_emb = jnp.take(self.embed_w, x_tokens, axis=0)        # (B, T, D) f32
        B, T, D = x_emb.shape
        TB = self._choose_tb(B)
        B_pad = _round_up(B, TB)
        T_pad = _round_up(T, TT)

        x_tbd = jnp.swapaxes(x_emb, 0, 1)                        # (T, B, D) time-major
        x_tbd = jnp.pad(x_tbd, ((0, T_pad - T), (0, B_pad - B), (0, 0)))

        # Hoisted layer-0 input projection: one big MXU-friendly bf16 matmul.
        # Shipped to the kernel as bf16 (halves its HBM stream + VMEM footprint);
        # gate math inside the kernel stays f32.
        gi0 = jnp.dot(x_tbd.reshape(T_pad * B_pad, D).astype(jnp.bfloat16),
                      self.k_wih[0], preferred_element_type=jnp.float32)
        gi0 = (gi0 + self.k_bgi[0]).astype(jnp.bfloat16)
        gi0 = gi0.reshape(T_pad, B_pad, 3 * H)

        lens = jnp.asarray(lengths, jnp.int32).reshape(B, 1)
        lens = jnp.pad(lens, ((0, B_pad - B), (0, 0)), constant_values=1)

        weight_arrays = []
        for l in range(L):
            if l == 0:
                weight_arrays += [self.k_whh[0], self.k_bhn[0]]
            else:
                weight_arrays += [self.k_wih[l], self.k_bgi[l],
                                  self.k_whh[l], self.k_bhn[l]]
        n_w = len(weight_arrays)

        kernel = make_gru_kernel(L, H, TB, TT, n_w, self.use_abs)

        grid = (B_pad // TB, T_pad // TT)                        # (batch tiles, time chunks)

        in_specs = [
            pl.BlockSpec((TB, 1), lambda b, c: (b, 0)),                 # lengths
            pl.BlockSpec((TT, TB, 3 * H), lambda b, c: (c, b, 0)),      # precomputed gi0 (bf16)
        ]
        # Weights: raw HBM refs, copied once per batch tile into single-buffered
        # VMEM scratch via overlapped async DMAs.
        in_specs += [pl.BlockSpec(memory_space=pl.ANY) for _ in weight_arrays]

        scratch = [pltpu.VMEM(tuple(w.shape), w.dtype) for w in weight_arrays]
        scratch += [
            pltpu.VMEM((L, TB, H), jnp.float32),        # per-layer hidden state
            pltpu.VMEM((TT * TB, H), jnp.float32),      # chunk outputs (next layer input)
            pltpu.SemaphoreType.DMA((n_w,)),            # weight-copy semaphores
        ]

        out = pl.pallas_call(
            kernel,
            out_shape=jax.ShapeDtypeStruct((B_pad, H), jnp.float32),
            grid=grid,
            in_specs=in_specs,
            out_specs=pl.BlockSpec((TB, H), lambda b, c: (b, 0)),
            scratch_shapes=scratch,
            compiler_params=pltpu.CompilerParams(
                dimension_semantics=("parallel", "arbitrary"),
                vmem_limit_bytes=_vmem_limit_bytes()),
        )(lens, gi0, *weight_arrays)
        return out[:B]

    # pure-JAX f32 reference (same math as PyTorch GRU + gather + l2norm)
    def reference(self, x_tokens, lengths):
        x = jnp.take(self.embed_w, jnp.asarray(x_tokens, jnp.int32), axis=0)
        B, T, D = x.shape
        H = self.embed_size
        inp = x
        for (wihT, whhT, bih, bhh) in self.gru_params:
            def step(h, x_t, wihT=wihT, whhT=whhT, bih=bih, bhh=bhh):
                gi = x_t @ wihT + bih
                gh = h @ whhT + bhh
                r = jax.nn.sigmoid(gi[:, :H] + gh[:, :H])
                z = jax.nn.sigmoid(gi[:, H:2 * H] + gh[:, H:2 * H])
                n = jnp.tanh(gi[:, 2 * H:] + r * gh[:, 2 * H:])
                h_new = (1.0 - z) * n + z * h
                return h_new, h_new
            h0 = jnp.zeros((B, H), jnp.float32)
            _, outs = jax.lax.scan(step, h0, jnp.swapaxes(inp, 0, 1))
            inp = jnp.swapaxes(outs, 0, 1)
        idx = jnp.asarray(lengths) - 1
        out = inp[jnp.arange(B), idx]
        out = out / jnp.sqrt(jnp.sum(out ** 2, axis=1, keepdims=True))
        if self.use_abs:
            out = jnp.abs(out)
        return out


if __name__ == "__main__":
    vocab_size, word_dim, embed_size, num_layers = 50, 32, 32, 2
    B, T = 16, 16

    key = jax.random.PRNGKey(0)
    k_tok, k_params = jax.random.split(key)
    x_tokens = jax.random.randint(k_tok, (B, T), 0, vocab_size, dtype=jnp.int32)
    # sorted descending, as pack_padded_sequence requires; all in [1, T]
    lengths = [16, 15, 14, 13, 12, 11, 10, 9, 8, 7, 6, 5, 4, 3, 2, 2]

    enc = EncoderTextPallas(vocab_size, word_dim, embed_size, num_layers,
                            use_abs=False, key=k_params)

    out = jax.block_until_ready(enc(x_tokens, lengths))
    ref = jax.block_until_ready(enc.reference(x_tokens, lengths))

    # kernel uses bf16 matmul operands / bf16 gi0 stream (f32 accumulation);
    # reference is full f32
    np.testing.assert_allclose(np.asarray(out), np.asarray(ref), rtol=3e-2, atol=3e-2)

    print("KERNEL_OK")
</pallas_src>

<mosaic_0001>
module attributes {stable_mosaic.version = 11 : i64} {
  func.func @kernel(%arg0: i32, %arg1: i32, %arg2: memref<8x1xi32, #tpu.memory_space<vmem>>, %arg3: memref<8x8x96xbf16, #tpu.memory_space<vmem>>, %arg4: memref<32x96xbf16, #tpu.memory_space<any>>, %arg5: memref<1x32xf32, #tpu.memory_space<any>>, %arg6: memref<32x96xbf16, #tpu.memory_space<any>>, %arg7: memref<1x96xf32, #tpu.memory_space<any>>, %arg8: memref<32x96xbf16, #tpu.memory_space<any>>, %arg9: memref<1x32xf32, #tpu.memory_space<any>>, %arg10: memref<8x32xf32, #tpu.memory_space<vmem>>, %arg11: memref<32x96xbf16, #tpu.memory_space<vmem>>, %arg12: memref<1x32xf32, #tpu.memory_space<vmem>>, %arg13: memref<32x96xbf16, #tpu.memory_space<vmem>>, %arg14: memref<1x96xf32, #tpu.memory_space<vmem>>, %arg15: memref<32x96xbf16, #tpu.memory_space<vmem>>, %arg16: memref<1x32xf32, #tpu.memory_space<vmem>>, %arg17: memref<2x8x32xf32, #tpu.memory_space<vmem>>, %arg18: memref<64x32xf32, #tpu.memory_space<vmem>>, %arg19: memref<6x!tpu.dma_semaphore, #tpu.memory_space<semaphore_mem>>) attributes {dimension_semantics = [#tpu.dimension_semantics<parallel>, #tpu.dimension_semantics<arbitrary>], iteration_bounds = array<i64: 2, 2>, scalar_prefetch = 0 : i64, scratch_operands = 9 : i64, tpu.core_type = #tpu.core_type<tc>, window_params = [{transform_indices = @transform_0, window_bounds = array<i64: 8, 1>}, {transform_indices = @transform_1, window_bounds = array<i64: 8, 8, 96>}, {}, {}, {}, {}, {}, {}, {transform_indices = @transform_8, window_bounds = array<i64: 8, 32>}]} {
    %c0_i32 = arith.constant 0 : i32
    %0 = arith.cmpi eq, %arg1, %c0_i32 : i32
    %1 = arith.extui %0 : i1 to i32
    %c0_i32_0 = arith.constant 0 : i32
    %2 = arith.cmpi ne, %1, %c0_i32_0 : i32
    scf.if %2 {
      %cst_172 = arith.constant 0.000000e+00 : f32
      %650 = vector.broadcast %cst_172 : f32 to vector<2x8x32xf32>
      %c0_173 = arith.constant 0 : index
      %c0_174 = arith.constant 0 : index
      %c0_175 = arith.constant 0 : index
      %651 = vector.load %arg17[%c0_173, %c0_174, %c0_175] : memref<2x8x32xf32, #tpu.memory_space<vmem>>, vector<2x8x32xf32>
      tpu.vector_store %arg17[%c0_173, %c0_174, %c0_175], %650 {strides = array<i32>} : memref<2x8x32xf32, #tpu.memory_space<vmem>>, vector<2x8x32xf32>,
      %cst_176 = arith.constant 0.000000e+00 : f32
      %652 = vector.broadcast %cst_176 : f32 to vector<8x32xf32>
      %c0_177 = arith.constant 0 : index
      %c0_178 = arith.constant 0 : index
      %653 = vector.load %arg10[%c0_177, %c0_178] : memref<8x32xf32, #tpu.memory_space<vmem>>, vector<8x32xf32>
      tpu.vector_store %arg10[%c0_177, %c0_178], %652 {strides = array<i32>} : memref<8x32xf32, #tpu.memory_space<vmem>>, vector<8x32xf32>,
      %c0_i32_179 = arith.constant 0 : i32
      %654 = tpu.memref_slice %arg19[%c0_i32_179] : memref<6x!tpu.dma_semaphore, #tpu.memory_space<semaphore_mem>> -> memref<1x!tpu.dma_semaphore, #tpu.memory_space<semaphore_mem>>
      %655 = tpu.memref_squeeze %654 : memref<1x!tpu.dma_semaphore, #tpu.memory_space<semaphore_mem>> -> memref<!tpu.dma_semaphore, #tpu.memory_space<semaphore_mem>>
      tpu.enqueue_dma source(%arg4 : memref<32x96xbf16, #tpu.memory_space<any>>) target(%arg11 : memref<32x96xbf16, #tpu.memory_space<vmem>>) target_semaphore(%655 : memref<!tpu.dma_semaphore, #tpu.memory_space<semaphore_mem>>)
      %c1_i32_180 = arith.constant 1 : i32
      %656 = tpu.memref_slice %arg19[%c1_i32_180] : memref<6x!tpu.dma_semaphore, #tpu.memory_space<semaphore_mem>> -> memref<1x!tpu.dma_semaphore, #tpu.memory_space<semaphore_mem>>
      %657 = tpu.memref_squeeze %656 : memref<1x!tpu.dma_semaphore, #tpu.memory_space<semaphore_mem>> -> memref<!tpu.dma_semaphore, #tpu.memory_space<semaphore_mem>>
      tpu.enqueue_dma source(%arg5 : memref<1x32xf32, #tpu.memory_space<any>>) target(%arg12 : memref<1x32xf32, #tpu.memory_space<vmem>>) target_semaphore(%657 : memref<!tpu.dma_semaphore, #tpu.memory_space<semaphore_mem>>)
      %c2_i32_181 = arith.constant 2 : i32
      %658 = tpu.memref_slice %arg19[%c2_i32_181] : memref<6x!tpu.dma_semaphore, #tpu.memory_space<semaphore_mem>> -> memref<1x!tpu.dma_semaphore, #tpu.memory_space<semaphore_mem>>
      %659 = tpu.memref_squeeze %658 : memref<1x!tpu.dma_semaphore, #tpu.memory_space<semaphore_mem>> -> memref<!tpu.dma_semaphore, #tpu.memory_space<semaphore_mem>>
      tpu.enqueue_dma source(%arg6 : memref<32x96xbf16, #tpu.memory_space<any>>) target(%arg13 : memref<32x96xbf16, #tpu.memory_space<vmem>>) target_semaphore(%659 : memref<!tpu.dma_semaphore, #tpu.memory_space<semaphore_mem>>)
      %c3_i32_182 = arith.constant 3 : i32
      %660 = tpu.memref_slice %arg19[%c3_i32_182] : memref<6x!tpu.dma_semaphore, #tpu.memory_space<semaphore_mem>> -> memref<1x!tpu.dma_semaphore, #tpu.memory_space<semaphore_mem>>
      %661 = tpu.memref_squeeze %660 : memref<1x!tpu.dma_semaphore, #tpu.memory_space<semaphore_mem>> -> memref<!tpu.dma_semaphore, #tpu.memory_space<semaphore_mem>>
      tpu.enqueue_dma source(%arg7 : memref<1x96xf32, #tpu.memory_space<any>>) target(%arg14 : memref<1x96xf32, #tpu.memory_space<vmem>>) target_semaphore(%661 : memref<!tpu.dma_semaphore, #tpu.memory_space<semaphore_mem>>)
      %c4_i32_183 = arith.constant 4 : i32
      %662 = tpu.memref_slice %arg19[%c4_i32_183] : memref<6x!tpu.dma_semaphore, #tpu.memory_space<semaphore_mem>> -> memref<1x!tpu.dma_semaphore, #tpu.memory_space<semaphore_mem>>
      %663 = tpu.memref_squeeze %662 : memref<1x!tpu.dma_semaphore, #tpu.memory_space<semaphore_mem>> -> memref<!tpu.dma_semaphore, #tpu.memory_space<semaphore_mem>>
      tpu.enqueue_dma source(%arg8 : memref<32x96xbf16, #tpu.memory_space<any>>) target(%arg15 : memref<32x96xbf16, #tpu.memory_space<vmem>>) target_semaphore(%663 : memref<!tpu.dma_semaphore, #tpu.memory_space<semaphore_mem>>)
      %c5_i32_184 = arith.constant 5 : i32
      %664 = tpu.memref_slice %arg19[%c5_i32_184] : memref<6x!tpu.dma_semaphore, #tpu.memory_space<semaphore_mem>> -> memref<1x!tpu.dma_semaphore, #tpu.memory_space<semaphore_mem>>
      %665 = tpu.memref_squeeze %664 : memref<1x!tpu.dma_semaphore, #tpu.memory_space<semaphore_mem>> -> memref<!tpu.dma_semaphore, #tpu.memory_space<semaphore_mem>>
      tpu.enqueue_dma source(%arg9 : memref<1x32xf32, #tpu.memory_space<any>>) target(%arg16 : memref<1x32xf32, #tpu.memory_space<vmem>>) target_semaphore(%665 : memref<!tpu.dma_semaphore, #tpu.memory_space<semaphore_mem>>)
    } else {
    }
    %c0 = arith.constant 0 : index
    %c0_1 = arith.constant 0 : index
    %3 = vector.load %arg2[%c0, %c0_1] : memref<8x1xi32, #tpu.memory_space<vmem>>, vector<8x1xi32>
    %c0_i32_2 = arith.constant 0 : i32
    %4 = arith.cmpi eq, %arg1, %c0_i32_2 : i32
    %5 = arith.extui %4 : i1 to i32
    %c0_i32_3 = arith.constant 0 : i32
    %6 = arith.cmpi ne, %5, %c0_i32_3 : i32
    scf.if %6 {
      %c0_i32_172 = arith.constant 0 : i32
      %650 = tpu.memref_slice %arg19[%c0_i32_172] : memref<6x!tpu.dma_semaphore, #tpu.memory_space<semaphore_mem>> -> memref<1x!tpu.dma_semaphore, #tpu.memory_space<semaphore_mem>>
      %651 = tpu.memref_squeeze %650 : memref<1x!tpu.dma_semaphore, #tpu.memory_space<semaphore_mem>> -> memref<!tpu.dma_semaphore, #tpu.memory_space<semaphore_mem>>
      tpu.wait_dma2 semaphore(%651 : memref<!tpu.dma_semaphore, #tpu.memory_space<semaphore_mem>>) src(%arg4 : memref<32x96xbf16, #tpu.memory_space<any>>) dst(%arg11 : memref<32x96xbf16, #tpu.memory_space<vmem>>)
      %c1_i32_173 = arith.constant 1 : i32
      %652 = tpu.memref_slice %arg19[%c1_i32_173] : memref<6x!tpu.dma_semaphore, #tpu.memory_space<semaphore_mem>> -> memref<1x!tpu.dma_semaphore, #tpu.memory_space<semaphore_mem>>
      %653 = tpu.memref_squeeze %652 : memref<1x!tpu.dma_semaphore, #tpu.memory_space<semaphore_mem>> -> memref<!tpu.dma_semaphore, #tpu.memory_space<semaphore_mem>>
      tpu.wait_dma2 semaphore(%653 : memref<!tpu.dma_semaphore, #tpu.memory_space<semaphore_mem>>) src(%arg5 : memref<1x32xf32, #tpu.memory_space<any>>) dst(%arg12 : memref<1x32xf32, #tpu.memory_space<vmem>>)
    } else {
    }
    %c0_4 = arith.constant 0 : index
    %c0_5 = arith.constant 0 : index
    %7 = vector.load %arg11[%c0_4, %c0_5] : memref<32x96xbf16, #tpu.memory_space<vmem>>, vector<32x96xbf16>
    %c0_6 = arith.constant 0 : index
    %c0_7 = arith.constant 0 : index
    %8 = vector.load %arg12[%c0_6, %c0_7] : memref<1x32xf32, #tpu.memory_space<vmem>>, vector<1x32xf32>
    %c0_8 = arith.constant 0 : index
    %c0_9 = arith.constant 0 : index
    %c0_10 = arith.constant 0 : index
    %9 = vector.load %arg17[%c0_8, %c0_9, %c0_10] : memref<2x8x32xf32, #tpu.memory_space<vmem>>, vector<1x8x32xf32>
    %10 = vector.shape_cast %9 : vector<1x8x32xf32> to vector<8x32xf32>
    %c0_11 = arith.constant 0 : index
    %c0_12 = arith.constant 0 : index
    %c0_13 = arith.constant 0 : index
    %11 = vector.load %arg3[%c0_11, %c0_12, %c0_13] : memref<8x8x96xbf16, #tpu.memory_space<vmem>>, vector<1x8x96xbf16>
    %12 = vector.shape_cast %11 : vector<1x8x96xbf16> to vector<8x96xbf16>
    %13 = arith.truncf %10 : vector<8x32xf32> to vector<8x32xbf16>
    %cst = arith.constant dense<0.000000e+00> : vector<8x96xf32>
    %14 = tpu.matmul %13, %7, %cst {dimension_numbers = #tpu.dot_dimension_numbers<[1], [0], [0], [1], [0, 0, 1, 1], [], []>} : vector<8x32xbf16>, vector<32x96xbf16>, vector<8x96xf32> -> vector<8x96xf32>
    %15 = vector.extract_strided_slice %12 {offsets = [0, 0], sizes = [8, 32], strides = [1, 1]} : vector<8x96xbf16> to vector<8x32xbf16>
    %16 = vector.extract_strided_slice %14 {offsets = [0, 0], sizes = [8, 32], strides = [1, 1]} : vector<8x96xf32> to vector<8x32xf32>
    %17 = arith.extf %15 : vector<8x32xbf16> to vector<8x32xf32>
    %18 = arith.addf %17, %16 : vector<8x32xf32>
    %19 = arith.negf %18 : vector<8x32xf32>
    %20 = math.exp %19 : vector<8x32xf32>
    %cst_14 = arith.constant 1.000000e+00 : f32
    %21 = vector.broadcast %cst_14 : f32 to vector<8x32xf32>
    %22 = arith.addf %21, %20 : vector<8x32xf32>
    %23 = arith.divf %21, %22 : vector<8x32xf32>
    %24 = vector.extract_strided_slice %12 {offsets = [0, 32], sizes = [8, 32], strides = [1, 1]} : vector<8x96xbf16> to vector<8x32xbf16>
    %25 = vector.extract_strided_slice %14 {offsets = [0, 32], sizes = [8, 32], strides = [1, 1]} : vector<8x96xf32> to vector<8x32xf32>
    %26 = arith.extf %24 : vector<8x32xbf16> to vector<8x32xf32>
    %27 = arith.addf %26, %25 : vector<8x32xf32>
    %28 = arith.negf %27 : vector<8x32xf32>
    %29 = math.exp %28 : vector<8x32xf32>
    %cst_15 = arith.constant 1.000000e+00 : f32
    %30 = vector.broadcast %cst_15 : f32 to vector<8x32xf32>
    %31 = arith.addf %30, %29 : vector<8x32xf32>
    %32 = arith.divf %30, %31 : vector<8x32xf32>
    %33 = vector.extract_strided_slice %12 {offsets = [0, 64], sizes = [8, 32], strides = [1, 1]} : vector<8x96xbf16> to vector<8x32xbf16>
    %34 = vector.extract_strided_slice %14 {offsets = [0, 64], sizes = [8, 32], strides = [1, 1]} : vector<8x96xf32> to vector<8x32xf32>
    %35 = vector.broadcast %8 : vector<1x32xf32> to vector<8x32xf32>
    %36 = arith.addf %34, %35 : vector<8x32xf32>
    %37 = arith.mulf %23, %36 : vector<8x32xf32>
    %38 = arith.extf %33 : vector<8x32xbf16> to vector<8x32xf32>
    %39 = arith.addf %38, %37 : vector<8x32xf32>
    %40 = math.tanh %39 : vector<8x32xf32>
    %cst_16 = arith.constant 1.000000e+00 : f32
    %41 = vector.broadcast %cst_16 : f32 to vector<8x32xf32>
    %42 = arith.subf %41, %32 : vector<8x32xf32>
    %43 = arith.mulf %42, %40 : vector<8x32xf32>
    %44 = arith.mulf %32, %10 : vector<8x32xf32>
    %45 = arith.addf %43, %44 : vector<8x32xf32>
    %c0_17 = arith.constant 0 : index
    %c0_18 = arith.constant 0 : index
    %46 = vector.load %arg18[%c0_17, %c0_18] : memref<64x32xf32, #tpu.memory_space<vmem>>, vector<8x32xf32>
    tpu.vector_store %arg18[%c0_17, %c0_18], %45 {strides = array<i32>} : memref<64x32xf32, #tpu.memory_space<vmem>>, vector<8x32xf32>,
    %c1 = arith.constant 1 : index
    %c0_19 = arith.constant 0 : index
    %c0_20 = arith.constant 0 : index
    %47 = vector.load %arg3[%c1, %c0_19, %c0_20] : memref<8x8x96xbf16, #tpu.memory_space<vmem>>, vector<1x8x96xbf16>
    %48 = vector.shape_cast %47 : vector<1x8x96xbf16> to vector<8x96xbf16>
    %49 = arith.truncf %45 : vector<8x32xf32> to vector<8x32xbf16>
    %cst_21 = arith.constant dense<0.000000e+00> : vector<8x96xf32>
    %50 = tpu.matmul %49, %7, %cst_21 {dimension_numbers = #tpu.dot_dimension_numbers<[1], [0], [0], [1], [0, 0, 1, 1], [], []>} : vector<8x32xbf16>, vector<32x96xbf16>, vector<8x96xf32> -> vector<8x96xf32>
    %51 = vector.extract_strided_slice %48 {offsets = [0, 0], sizes = [8, 32], strides = [1, 1]} : vector<8x96xbf16> to vector<8x32xbf16>
    %52 = vector.extract_strided_slice %50 {offsets = [0, 0], sizes = [8, 32], strides = [1, 1]} : vector<8x96xf32> to vector<8x32xf32>
    %53 = arith.extf %51 : vector<8x32xbf16> to vector<8x32xf32>
    %54 = arith.addf %53, %52 : vector<8x32xf32>
    %55 = arith.negf %54 : vector<8x32xf32>
    %56 = math.exp %55 : vector<8x32xf32>
    %cst_22 = arith.constant 1.000000e+00 : f32
    %57 = vector.broadcast %cst_22 : f32 to vector<8x32xf32>
    %58 = arith.addf %57, %56 : vector<8x32xf32>
    %59 = arith.divf %57, %58 : vector<8x32xf32>
    %60 = vector.extract_strided_slice %48 {offsets = [0, 32], sizes = [8, 32], strides = [1, 1]} : vector<8x96xbf16> to vector<8x32xbf16>
    %61 = vector.extract_strided_slice %50 {offsets = [0, 32], sizes = [8, 32], strides = [1, 1]} : vector<8x96xf32> to vector<8x32xf32>
    %62 = arith.extf %60 : vector<8x32xbf16> to vector<8x32xf32>
    %63 = arith.addf %62, %61 : vector<8x32xf32>
    %64 = arith.negf %63 : vector<8x32xf32>
    %65 = math.exp %64 : vector<8x32xf32>
    %cst_23 = arith.constant 1.000000e+00 : f32
    %66 = vector.broadcast %cst_23 : f32 to vector<8x32xf32>
    %67 = arith.addf %66, %65 : vector<8x32xf32>
    %68 = arith.divf %66, %67 : vector<8x32xf32>
    %69 = vector.extract_strided_slice %48 {offsets = [0, 64], sizes = [8, 32], strides = [1, 1]} : vector<8x96xbf16> to vector<8x32xbf16>
    %70 = vector.extract_strided_slice %50 {offsets = [0, 64], sizes = [8, 32], strides = [1, 1]} : vector<8x96xf32> to vector<8x32xf32>
    %71 = vector.broadcast %8 : vector<1x32xf32> to vector<8x32xf32>
    %72 = arith.addf %70, %71 : vector<8x32xf32>
    %73 = arith.mulf %59, %72 : vector<8x32xf32>
    %74 = arith.extf %69 : vector<8x32xbf16> to vector<8x32xf32>
    %75 = arith.addf %74, %73 : vector<8x32xf32>
    %76 = math.tanh %75 : vector<8x32xf32>
    %cst_24 = arith.constant 1.000000e+00 : f32
    %77 = vector.broadcast %cst_24 : f32 to vector<8x32xf32>
    %78 = arith.subf %77, %68 : vector<8x32xf32>
    %79 = arith.mulf %78, %76 : vector<8x32xf32>
    %80 = arith.mulf %68, %45 : vector<8x32xf32>
    %81 = arith.addf %79, %80 : vector<8x32xf32>
    %c8 = arith.constant 8 : index
    %c0_25 = arith.constant 0 : index
    %82 = vector.load %arg18[%c8, %c0_25] : memref<64x32xf32, #tpu.memory_space<vmem>>, vector<8x32xf32>
    tpu.vector_store %arg18[%c8, %c0_25], %81 {strides = array<i32>} : memref<64x32xf32, #tpu.memory_space<vmem>>, vector<8x32xf32>,
    %c2 = arith.constant 2 : index
    %c0_26 = arith.constant 0 : index
    %c0_27 = arith.constant 0 : index
    %83 = vector.load %arg3[%c2, %c0_26, %c0_27] : memref<8x8x96xbf16, #tpu.memory_space<vmem>>, vector<1x8x96xbf16>
    %84 = vector.shape_cast %83 : vector<1x8x96xbf16> to vector<8x96xbf16>
    %85 = arith.truncf %81 : vector<8x32xf32> to vector<8x32xbf16>
    %cst_28 = arith.constant dense<0.000000e+00> : vector<8x96xf32>
    %86 = tpu.matmul %85, %7, %cst_28 {dimension_numbers = #tpu.dot_dimension_numbers<[1], [0], [0], [1], [0, 0, 1, 1], [], []>} : vector<8x32xbf16>, vector<32x96xbf16>, vector<8x96xf32> -> vector<8x96xf32>
    %87 = vector.extract_strided_slice %84 {offsets = [0, 0], sizes = [8, 32], strides = [1, 1]} : vector<8x96xbf16> to vector<8x32xbf16>
    %88 = vector.extract_strided_slice %86 {offsets = [0, 0], sizes = [8, 32], strides = [1, 1]} : vector<8x96xf32> to vector<8x32xf32>
    %89 = arith.extf %87 : vector<8x32xbf16> to vector<8x32xf32>
    %90 = arith.addf %89, %88 : vector<8x32xf32>
    %91 = arith.negf %90 : vector<8x32xf32>
    %92 = math.exp %91 : vector<8x32xf32>
    %cst_29 = arith.constant 1.000000e+00 : f32
    %93 = vector.broadcast %cst_29 : f32 to vector<8x32xf32>
    %94 = arith.addf %93, %92 : vector<8x32xf32>
    %95 = arith.divf %93, %94 : vector<8x32xf32>
    %96 = vector.extract_strided_slice %84 {offsets = [0, 32], sizes = [8, 32], strides = [1, 1]} : vector<8x96xbf16> to vector<8x32xbf16>
    %97 = vector.extract_strided_slice %86 {offsets = [0, 32], sizes = [8, 32], strides = [1, 1]} : vector<8x96xf32> to vector<8x32xf32>
    %98 = arith.extf %96 : vector<8x32xbf16> to vector<8x32xf32>
    %99 = arith.addf %98, %97 : vector<8x32xf32>
    %100 = arith.negf %99 : vector<8x32xf32>
    %101 = math.exp %100 : vector<8x32xf32>
    %cst_30 = arith.constant 1.000000e+00 : f32
    %102 = vector.broadcast %cst_30 : f32 to vector<8x32xf32>
    %103 = arith.addf %102, %101 : vector<8x32xf32>
    %104 = arith.divf %102, %103 : vector<8x32xf32>
    %105 = vector.extract_strided_slice %84 {offsets = [0, 64], sizes = [8, 32], strides = [1, 1]} : vector<8x96xbf16> to vector<8x32xbf16>
    %106 = vector.extract_strided_slice %86 {offsets = [0, 64], sizes = [8, 32], strides = [1, 1]} : vector<8x96xf32> to vector<8x32xf32>
    %107 = vector.broadcast %8 : vector<1x32xf32> to vector<8x32xf32>
    %108 = arith.addf %106, %107 : vector<8x32xf32>
    %109 = arith.mulf %95, %108 : vector<8x32xf32>
    %110 = arith.extf %105 : vector<8x32xbf16> to vector<8x32xf32>
    %111 = arith.addf %110, %109 : vector<8x32xf32>
    %112 = math.tanh %111 : vector<8x32xf32>
    %cst_31 = arith.constant 1.000000e+00 : f32
    %113 = vector.broadcast %cst_31 : f32 to vector<8x32xf32>
    %114 = arith.subf %113, %104 : vector<8x32xf32>
    %115 = arith.mulf %114, %112 : vector<8x32xf32>
    %116 = arith.mulf %104, %81 : vector<8x32xf32>
    %117 = arith.addf %115, %116 : vector<8x32xf32>
    %c16 = arith.constant 16 : index
    %c0_32 = arith.constant 0 : index
    %118 = vector.load %arg18[%c16, %c0_32] : memref<64x32xf32, #tpu.memory_space<vmem>>, vector<8x32xf32>
    tpu.vector_store %arg18[%c16, %c0_32], %117 {strides = array<i32>} : memref<64x32xf32, #tpu.memory_space<vmem>>, vector<8x32xf32>,
    %c3 = arith.constant 3 : index
    %c0_33 = arith.constant 0 : index
    %c0_34 = arith.constant 0 : index
    %119 = vector.load %arg3[%c3, %c0_33, %c0_34] : memref<8x8x96xbf16, #tpu.memory_space<vmem>>, vector<1x8x96xbf16>
    %120 = vector.shape_cast %119 : vector<1x8x96xbf16> to vector<8x96xbf16>
    %121 = arith.truncf %117 : vector<8x32xf32> to vector<8x32xbf16>
    %cst_35 = arith.constant dense<0.000000e+00> : vector<8x96xf32>
    %122 = tpu.matmul %121, %7, %cst_35 {dimension_numbers = #tpu.dot_dimension_numbers<[1], [0], [0], [1], [0, 0, 1, 1], [], []>} : vector<8x32xbf16>, vector<32x96xbf16>, vector<8x96xf32> -> vector<8x96xf32>
    %123 = vector.extract_strided_slice %120 {offsets = [0, 0], sizes = [8, 32], strides = [1, 1]} : vector<8x96xbf16> to vector<8x32xbf16>
    %124 = vector.extract_strided_slice %122 {offsets = [0, 0], sizes = [8, 32], strides = [1, 1]} : vector<8x96xf32> to vector<8x32xf32>
    %125 = arith.extf %123 : vector<8x32xbf16> to vector<8x32xf32>
    %126 = arith.addf %125, %124 : vector<8x32xf32>
    %127 = arith.negf %126 : vector<8x32xf32>
    %128 = math.exp %127 : vector<8x32xf32>
    %cst_36 = arith.constant 1.000000e+00 : f32
    %129 = vector.broadcast %cst_36 : f32 to vector<8x32xf32>
    %130 = arith.addf %129, %128 : vector<8x32xf32>
    %131 = arith.divf %129, %130 : vector<8x32xf32>
    %132 = vector.extract_strided_slice %120 {offsets = [0, 32], sizes = [8, 32], strides = [1, 1]} : vector<8x96xbf16> to vector<8x32xbf16>
    %133 = vector.extract_strided_slice %122 {offsets = [0, 32], sizes = [8, 32], strides = [1, 1]} : vector<8x96xf32> to vector<8x32xf32>
    %134 = arith.extf %132 : vector<8x32xbf16> to vector<8x32xf32>
    %135 = arith.addf %134, %133 : vector<8x32xf32>
    %136 = arith.negf %135 : vector<8x32xf32>
    %137 = math.exp %136 : vector<8x32xf32>
    %cst_37 = arith.constant 1.000000e+00 : f32
    %138 = vector.broadcast %cst_37 : f32 to vector<8x32xf32>
    %139 = arith.addf %138, %137 : vector<8x32xf32>
    %140 = arith.divf %138, %139 : vector<8x32xf32>
    %141 = vector.extract_strided_slice %120 {offsets = [0, 64], sizes = [8, 32], strides = [1, 1]} : vector<8x96xbf16> to vector<8x32xbf16>
    %142 = vector.extract_strided_slice %122 {offsets = [0, 64], sizes = [8, 32], strides = [1, 1]} : vector<8x96xf32> to vector<8x32xf32>
    %143 = vector.broadcast %8 : vector<1x32xf32> to vector<8x32xf32>
    %144 = arith.addf %142, %143 : vector<8x32xf32>
    %145 = arith.mulf %131, %144 : vector<8x32xf32>
    %146 = arith.extf %141 : vector<8x32xbf16> to vector<8x32xf32>
    %147 = arith.addf %146, %145 : vector<8x32xf32>
    %148 = math.tanh %147 : vector<8x32xf32>
    %cst_38 = arith.constant 1.000000e+00 : f32
    %149 = vector.broadcast %cst_38 : f32 to vector<8x32xf32>
    %150 = arith.subf %149, %140 : vector<8x32xf32>
    %151 = arith.mulf %150, %148 : vector<8x32xf32>
    %152 = arith.mulf %140, %117 : vector<8x32xf32>
    %153 = arith.addf %151, %152 : vector<8x32xf32>
    %c24 = arith.constant 24 : index
    %c0_39 = arith.constant 0 : index
    %154 = vector.load %arg18[%c24, %c0_39] : memref<64x32xf32, #tpu.memory_space<vmem>>, vector<8x32xf32>
    tpu.vector_store %arg18[%c24, %c0_39], %153 {strides = array<i32>} : memref<64x32xf32, #tpu.memory_space<vmem>>, vector<8x32xf32>,
    %c4 = arith.constant 4 : index
    %c0_40 = arith.constant 0 : index
    %c0_41 = arith.constant 0 : index
    %155 = vector.load %arg3[%c4, %c0_40, %c0_41] : memref<8x8x96xbf16, #tpu.memory_space<vmem>>, vector<1x8x96xbf16>
    %156 = vector.shape_cast %155 : vector<1x8x96xbf16> to vector<8x96xbf16>
    %157 = arith.truncf %153 : vector<8x32xf32> to vector<8x32xbf16>
    %cst_42 = arith.constant dense<0.000000e+00> : vector<8x96xf32>
    %158 = tpu.matmul %157, %7, %cst_42 {dimension_numbers = #tpu.dot_dimension_numbers<[1], [0], [0], [1], [0, 0, 1, 1], [], []>} : vector<8x32xbf16>, vector<32x96xbf16>, vector<8x96xf32> -> vector<8x96xf32>
    %159 = vector.extract_strided_slice %156 {offsets = [0, 0], sizes = [8, 32], strides = [1, 1]} : vector<8x96xbf16> to vector<8x32xbf16>
    %160 = vector.extract_strided_slice %158 {offsets = [0, 0], sizes = [8, 32], strides = [1, 1]} : vector<8x96xf32> to vector<8x32xf32>
    %161 = arith.extf %159 : vector<8x32xbf16> to vector<8x32xf32>
    %162 = arith.addf %161, %160 : vector<8x32xf32>
    %163 = arith.negf %162 : vector<8x32xf32>
    %164 = math.exp %163 : vector<8x32xf32>
    %cst_43 = arith.constant 1.000000e+00 : f32
    %165 = vector.broadcast %cst_43 : f32 to vector<8x32xf32>
    %166 = arith.addf %165, %164 : vector<8x32xf32>
    %167 = arith.divf %165, %166 : vector<8x32xf32>
    %168 = vector.extract_strided_slice %156 {offsets = [0, 32], sizes = [8, 32], strides = [1, 1]} : vector<8x96xbf16> to vector<8x32xbf16>
    %169 = vector.extract_strided_slice %158 {offsets = [0, 32], sizes = [8, 32], strides = [1, 1]} : vector<8x96xf32> to vector<8x32xf32>
    %170 = arith.extf %168 : vector<8x32xbf16> to vector<8x32xf32>
    %171 = arith.addf %170, %169 : vector<8x32xf32>
    %172 = arith.negf %171 : vector<8x32xf32>
    %173 = math.exp %172 : vector<8x32xf32>
    %cst_44 = arith.constant 1.000000e+00 : f32
    %174 = vector.broadcast %cst_44 : f32 to vector<8x32xf32>
    %175 = arith.addf %174, %173 : vector<8x32xf32>
    %176 = arith.divf %174, %175 : vector<8x32xf32>
    %177 = vector.extract_strided_slice %156 {offsets = [0, 64], sizes = [8, 32], strides = [1, 1]} : vector<8x96xbf16> to vector<8x32xbf16>
    %178 = vector.extract_strided_slice %158 {offsets = [0, 64], sizes = [8, 32], strides = [1, 1]} : vector<8x96xf32> to vector<8x32xf32>
    %179 = vector.broadcast %8 : vector<1x32xf32> to vector<8x32xf32>
    %180 = arith.addf %178, %179 : vector<8x32xf32>
    %181 = arith.mulf %167, %180 : vector<8x32xf32>
    %182 = arith.extf %177 : vector<8x32xbf16> to vector<8x32xf32>
    %183 = arith.addf %182, %181 : vector<8x32xf32>
    %184 = math.tanh %183 : vector<8x32xf32>
    %cst_45 = arith.constant 1.000000e+00 : f32
    %185 = vector.broadcast %cst_45 : f32 to vector<8x32xf32>
    %186 = arith.subf %185, %176 : vector<8x32xf32>
    %187 = arith.mulf %186, %184 : vector<8x32xf32>
    %188 = arith.mulf %176, %153 : vector<8x32xf32>
    %189 = arith.addf %187, %188 : vector<8x32xf32>
    %c32 = arith.constant 32 : index
    %c0_46 = arith.constant 0 : index
    %190 = vector.load %arg18[%c32, %c0_46] : memref<64x32xf32, #tpu.memory_space<vmem>>, vector<8x32xf32>
    tpu.vector_store %arg18[%c32, %c0_46], %189 {strides = array<i32>} : memref<64x32xf32, #tpu.memory_space<vmem>>, vector<8x32xf32>,
    %c5 = arith.constant 5 : index
    %c0_47 = arith.constant 0 : index
    %c0_48 = arith.constant 0 : index
    %191 = vector.load %arg3[%c5, %c0_47, %c0_48] : memref<8x8x96xbf16, #tpu.memory_space<vmem>>, vector<1x8x96xbf16>
    %192 = vector.shape_cast %191 : vector<1x8x96xbf16> to vector<8x96xbf16>
    %193 = arith.truncf %189 : vector<8x32xf32> to vector<8x32xbf16>
    %cst_49 = arith.constant dense<0.000000e+00> : vector<8x96xf32>
    %194 = tpu.matmul %193, %7, %cst_49 {dimension_numbers = #tpu.dot_dimension_numbers<[1], [0], [0], [1], [0, 0, 1, 1], [], []>} : vector<8x32xbf16>, vector<32x96xbf16>, vector<8x96xf32> -> vector<8x96xf32>
    %195 = vector.extract_strided_slice %192 {offsets = [0, 0], sizes = [8, 32], strides = [1, 1]} : vector<8x96xbf16> to vector<8x32xbf16>
    %196 = vector.extract_strided_slice %194 {offsets = [0, 0], sizes = [8, 32], strides = [1, 1]} : vector<8x96xf32> to vector<8x32xf32>
    %197 = arith.extf %195 : vector<8x32xbf16> to vector<8x32xf32>
    %198 = arith.addf %197, %196 : vector<8x32xf32>
    %199 = arith.negf %198 : vector<8x32xf32>
    %200 = math.exp %199 : vector<8x32xf32>
    %cst_50 = arith.constant 1.000000e+00 : f32
    %201 = vector.broadcast %cst_50 : f32 to vector<8x32xf32>
    %202 = arith.addf %201, %200 : vector<8x32xf32>
    %203 = arith.divf %201, %202 : vector<8x32xf32>
    %204 = vector.extract_strided_slice %192 {offsets = [0, 32], sizes = [8, 32], strides = [1, 1]} : vector<8x96xbf16> to vector<8x32xbf16>
    %205 = vector.extract_strided_slice %194 {offsets = [0, 32], sizes = [8, 32], strides = [1, 1]} : vector<8x96xf32> to vector<8x32xf32>
    %206 = arith.extf %204 : vector<8x32xbf16> to vector<8x32xf32>
    %207 = arith.addf %206, %205 : vector<8x32xf32>
    %208 = arith.negf %207 : vector<8x32xf32>
    %209 = math.exp %208 : vector<8x32xf32>
    %cst_51 = arith.constant 1.000000e+00 : f32
    %210 = vector.broadcast %cst_51 : f32 to vector<8x32xf32>
    %211 = arith.addf %210, %209 : vector<8x32xf32>
    %212 = arith.divf %210, %211 : vector<8x32xf32>
    %213 = vector.extract_strided_slice %192 {offsets = [0, 64], sizes = [8, 32], strides = [1, 1]} : vector<8x96xbf16> to vector<8x32xbf16>
    %214 = vector.extract_strided_slice %194 {offsets = [0, 64], sizes = [8, 32], strides = [1, 1]} : vector<8x96xf32> to vector<8x32xf32>
    %215 = vector.broadcast %8 : vector<1x32xf32> to vector<8x32xf32>
    %216 = arith.addf %214, %215 : vector<8x32xf32>
    %217 = arith.mulf %203, %216 : vector<8x32xf32>
    %218 = arith.extf %213 : vector<8x32xbf16> to vector<8x32xf32>
    %219 = arith.addf %218, %217 : vector<8x32xf32>
    %220 = math.tanh %219 : vector<8x32xf32>
    %cst_52 = arith.constant 1.000000e+00 : f32
    %221 = vector.broadcast %cst_52 : f32 to vector<8x32xf32>
    %222 = arith.subf %221, %212 : vector<8x32xf32>
    %223 = arith.mulf %222, %220 : vector<8x32xf32>
    %224 = arith.mulf %212, %189 : vector<8x32xf32>
    %225 = arith.addf %223, %224 : vector<8x32xf32>
    %c40 = arith.constant 40 : index
    %c0_53 = arith.constant 0 : index
    %226 = vector.load %arg18[%c40, %c0_53] : memref<64x32xf32, #tpu.memory_space<vmem>>, vector<8x32xf32>
    tpu.vector_store %arg18[%c40, %c0_53], %225 {strides = array<i32>} : memref<64x32xf32, #tpu.memory_space<vmem>>, vector<8x32xf32>,
    %c6 = arith.constant 6 : index
    %c0_54 = arith.constant 0 : index
    %c0_55 = arith.constant 0 : index
    %227 = vector.load %arg3[%c6, %c0_54, %c0_55] : memref<8x8x96xbf16, #tpu.memory_space<vmem>>, vector<1x8x96xbf16>
    %228 = vector.shape_cast %227 : vector<1x8x96xbf16> to vector<8x96xbf16>
    %229 = arith.truncf %225 : vector<8x32xf32> to vector<8x32xbf16>
    %cst_56 = arith.constant dense<0.000000e+00> : vector<8x96xf32>
    %230 = tpu.matmul %229, %7, %cst_56 {dimension_numbers = #tpu.dot_dimension_numbers<[1], [0], [0], [1], [0, 0, 1, 1], [], []>} : vector<8x32xbf16>, vector<32x96xbf16>, vector<8x96xf32> -> vector<8x96xf32>
    %231 = vector.extract_strided_slice %228 {offsets = [0, 0], sizes = [8, 32], strides = [1, 1]} : vector<8x96xbf16> to vector<8x32xbf16>
    %232 = vector.extract_strided_slice %230 {offsets = [0, 0], sizes = [8, 32], strides = [1, 1]} : vector<8x96xf32> to vector<8x32xf32>
    %233 = arith.extf %231 : vector<8x32xbf16> to vector<8x32xf32>
    %234 = arith.addf %233, %232 : vector<8x32xf32>
    %235 = arith.negf %234 : vector<8x32xf32>
    %236 = math.exp %235 : vector<8x32xf32>
    %cst_57 = arith.constant 1.000000e+00 : f32
    %237 = vector.broadcast %cst_57 : f32 to vector<8x32xf32>
    %238 = arith.addf %237, %236 : vector<8x32xf32>
    %239 = arith.divf %237, %238 : vector<8x32xf32>
    %240 = vector.extract_strided_slice %228 {offsets = [0, 32], sizes = [8, 32], strides = [1, 1]} : vector<8x96xbf16> to vector<8x32xbf16>
    %241 = vector.extract_strided_slice %230 {offsets = [0, 32], sizes = [8, 32], strides = [1, 1]} : vector<8x96xf32> to vector<8x32xf32>
    %242 = arith.extf %240 : vector<8x32xbf16> to vector<8x32xf32>
    %243 = arith.addf %242, %241 : vector<8x32xf32>
    %244 = arith.negf %243 : vector<8x32xf32>
    %245 = math.exp %244 : vector<8x32xf32>
    %cst_58 = arith.constant 1.000000e+00 : f32
    %246 = vector.broadcast %cst_58 : f32 to vector<8x32xf32>
    %247 = arith.addf %246, %245 : vector<8x32xf32>
    %248 = arith.divf %246, %247 : vector<8x32xf32>
    %249 = vector.extract_strided_slice %228 {offsets = [0, 64], sizes = [8, 32], strides = [1, 1]} : vector<8x96xbf16> to vector<8x32xbf16>
    %250 = vector.extract_strided_slice %230 {offsets = [0, 64], sizes = [8, 32], strides = [1, 1]} : vector<8x96xf32> to vector<8x32xf32>
    %251 = vector.broadcast %8 : vector<1x32xf32> to vector<8x32xf32>
    %252 = arith.addf %250, %251 : vector<8x32xf32>
    %253 = arith.mulf %239, %252 : vector<8x32xf32>
    %254 = arith.extf %249 : vector<8x32xbf16> to vector<8x32xf32>
    %255 = arith.addf %254, %253 : vector<8x32xf32>
    %256 = math.tanh %255 : vector<8x32xf32>
    %cst_59 = arith.constant 1.000000e+00 : f32
    %257 = vector.broadcast %cst_59 : f32 to vector<8x32xf32>
    %258 = arith.subf %257, %248 : vector<8x32xf32>
    %259 = arith.mulf %258, %256 : vector<8x32xf32>
    %260 = arith.mulf %248, %225 : vector<8x32xf32>
    %261 = arith.addf %259, %260 : vector<8x32xf32>
    %c48 = arith.constant 48 : index
    %c0_60 = arith.constant 0 : index
    %262 = vector.load %arg18[%c48, %c0_60] : memref<64x32xf32, #tpu.memory_space<vmem>>, vector<8x32xf32>
    tpu.vector_store %arg18[%c48, %c0_60], %261 {strides = array<i32>} : memref<64x32xf32, #tpu.memory_space<vmem>>, vector<8x32xf32>,
    %c7 = arith.constant 7 : index
    %c0_61 = arith.constant 0 : index
    %c0_62 = arith.constant 0 : index
    %263 = vector.load %arg3[%c7, %c0_61, %c0_62] : memref<8x8x96xbf16, #tpu.memory_space<vmem>>, vector<1x8x96xbf16>
    %264 = vector.shape_cast %263 : vector<1x8x96xbf16> to vector<8x96xbf16>
    %265 = arith.truncf %261 : vector<8x32xf32> to vector<8x32xbf16>
    %cst_63 = arith.constant dense<0.000000e+00> : vector<8x96xf32>
    %266 = tpu.matmul %265, %7, %cst_63 {dimension_numbers = #tpu.dot_dimension_numbers<[1], [0], [0], [1], [0, 0, 1, 1], [], []>} : vector<8x32xbf16>, vector<32x96xbf16>, vector<8x96xf32> -> vector<8x96xf32>
    %267 = vector.extract_strided_slice %264 {offsets = [0, 0], sizes = [8, 32], strides = [1, 1]} : vector<8x96xbf16> to vector<8x32xbf16>
    %268 = vector.extract_strided_slice %266 {offsets = [0, 0], sizes = [8, 32], strides = [1, 1]} : vector<8x96xf32> to vector<8x32xf32>
    %269 = arith.extf %267 : vector<8x32xbf16> to vector<8x32xf32>
    %270 = arith.addf %269, %268 : vector<8x32xf32>
    %271 = arith.negf %270 : vector<8x32xf32>
    %272 = math.exp %271 : vector<8x32xf32>
    %cst_64 = arith.constant 1.000000e+00 : f32
    %273 = vector.broadcast %cst_64 : f32 to vector<8x32xf32>
    %274 = arith.addf %273, %272 : vector<8x32xf32>
    %275 = arith.divf %273, %274 : vector<8x32xf32>
    %276 = vector.extract_strided_slice %264 {offsets = [0, 32], sizes = [8, 32], strides = [1, 1]} : vector<8x96xbf16> to vector<8x32xbf16>
    %277 = vector.extract_strided_slice %266 {offsets = [0, 32], sizes = [8, 32], strides = [1, 1]} : vector<8x96xf32> to vector<8x32xf32>
    %278 = arith.extf %276 : vector<8x32xbf16> to vector<8x32xf32>
    %279 = arith.addf %278, %277 : vector<8x32xf32>
    %280 = arith.negf %279 : vector<8x32xf32>
    %281 = math.exp %280 : vector<8x32xf32>
    %cst_65 = arith.constant 1.000000e+00 : f32
    %282 = vector.broadcast %cst_65 : f32 to vector<8x32xf32>
    %283 = arith.addf %282, %281 : vector<8x32xf32>
    %284 = arith.divf %282, %283 : vector<8x32xf32>
    %285 = vector.extract_strided_slice %264 {offsets = [0, 64], sizes = [8, 32], strides = [1, 1]} : vector<8x96xbf16> to vector<8x32xbf16>
    %286 = vector.extract_strided_slice %266 {offsets = [0, 64], sizes = [8, 32], strides = [1, 1]} : vector<8x96xf32> to vector<8x32xf32>
    %287 = vector.broadcast %8 : vector<1x32xf32> to vector<8x32xf32>
    %288 = arith.addf %286, %287 : vector<8x32xf32>
    %289 = arith.mulf %275, %288 : vector<8x32xf32>
    %290 = arith.extf %285 : vector<8x32xbf16> to vector<8x32xf32>
    %291 = arith.addf %290, %289 : vector<8x32xf32>
    %292 = math.tanh %291 : vector<8x32xf32>
    %cst_66 = arith.constant 1.000000e+00 : f32
    %293 = vector.broadcast %cst_66 : f32 to vector<8x32xf32>
    %294 = arith.subf %293, %284 : vector<8x32xf32>
    %295 = arith.mulf %294, %292 : vector<8x32xf32>
    %296 = arith.mulf %284, %261 : vector<8x32xf32>
    %297 = arith.addf %295, %296 : vector<8x32xf32>
    %c56 = arith.constant 56 : index
    %c0_67 = arith.constant 0 : index
    %298 = vector.load %arg18[%c56, %c0_67] : memref<64x32xf32, #tpu.memory_space<vmem>>, vector<8x32xf32>
    tpu.vector_store %arg18[%c56, %c0_67], %297 {strides = array<i32>} : memref<64x32xf32, #tpu.memory_space<vmem>>, vector<8x32xf32>,
    %c0_68 = arith.constant 0 : index
    %c0_69 = arith.constant 0 : index
    %c0_70 = arith.constant 0 : index
    %299 = vector.load %arg17[%c0_68, %c0_69, %c0_70] : memref<2x8x32xf32, #tpu.memory_space<vmem>>, vector<1x8x32xf32>
    %300 = vector.shape_cast %299 : vector<1x8x32xf32> to vector<8x32xf32>
    %301 = vector.shape_cast %297 : vector<8x32xf32> to vector<1x8x32xf32>
    tpu.vector_store %arg17[%c0_68, %c0_69, %c0_70], %301 {strides = array<i32>} : memref<2x8x32xf32, #tpu.memory_space<vmem>>, vector<1x8x32xf32>,
    %c0_i32_71 = arith.constant 0 : i32
    %302 = arith.cmpi eq, %arg1, %c0_i32_71 : i32
    %303 = arith.extui %302 : i1 to i32
    %c0_i32_72 = arith.constant 0 : i32
    %304 = arith.cmpi ne, %303, %c0_i32_72 : i32
    scf.if %304 {
      %c2_i32_172 = arith.constant 2 : i32
      %650 = tpu.memref_slice %arg19[%c2_i32_172] : memref<6x!tpu.dma_semaphore, #tpu.memory_space<semaphore_mem>> -> memref<1x!tpu.dma_semaphore, #tpu.memory_space<semaphore_mem>>
      %651 = tpu.memref_squeeze %650 : memref<1x!tpu.dma_semaphore, #tpu.memory_space<semaphore_mem>> -> memref<!tpu.dma_semaphore, #tpu.memory_space<semaphore_mem>>
      tpu.wait_dma2 semaphore(%651 : memref<!tpu.dma_semaphore, #tpu.memory_space<semaphore_mem>>) src(%arg6 : memref<32x96xbf16, #tpu.memory_space<any>>) dst(%arg13 : memref<32x96xbf16, #tpu.memory_space<vmem>>)
      %c3_i32_173 = arith.constant 3 : i32
      %652 = tpu.memref_slice %arg19[%c3_i32_173] : memref<6x!tpu.dma_semaphore, #tpu.memory_space<semaphore_mem>> -> memref<1x!tpu.dma_semaphore, #tpu.memory_space<semaphore_mem>>
      %653 = tpu.memref_squeeze %652 : memref<1x!tpu.dma_semaphore, #tpu.memory_space<semaphore_mem>> -> memref<!tpu.dma_semaphore, #tpu.memory_space<semaphore_mem>>
      tpu.wait_dma2 semaphore(%653 : memref<!tpu.dma_semaphore, #tpu.memory_space<semaphore_mem>>) src(%arg7 : memref<1x96xf32, #tpu.memory_space<any>>) dst(%arg14 : memref<1x96xf32, #tpu.memory_space<vmem>>)
      %c4_i32_174 = arith.constant 4 : i32
      %654 = tpu.memref_slice %arg19[%c4_i32_174] : memref<6x!tpu.dma_semaphore, #tpu.memory_space<semaphore_mem>> -> memref<1x!tpu.dma_semaphore, #tpu.memory_space<semaphore_mem>>
      %655 = tpu.memref_squeeze %654 : memref<1x!tpu.dma_semaphore, #tpu.memory_space<semaphore_mem>> -> memref<!tpu.dma_semaphore, #tpu.memory_space<semaphore_mem>>
      tpu.wait_dma2 semaphore(%655 : memref<!tpu.dma_semaphore, #tpu.memory_space<semaphore_mem>>) src(%arg8 : memref<32x96xbf16, #tpu.memory_space<any>>) dst(%arg15 : memref<32x96xbf16, #tpu.memory_space<vmem>>)
      %c5_i32_175 = arith.constant 5 : i32
      %656 = tpu.memref_slice %arg19[%c5_i32_175] : memref<6x!tpu.dma_semaphore, #tpu.memory_space<semaphore_mem>> -> memref<1x!tpu.dma_semaphore, #tpu.memory_space<semaphore_mem>>
      %657 = tpu.memref_squeeze %656 : memref<1x!tpu.dma_semaphore, #tpu.memory_space<semaphore_mem>> -> memref<!tpu.dma_semaphore, #tpu.memory_space<semaphore_mem>>
      tpu.wait_dma2 semaphore(%657 : memref<!tpu.dma_semaphore, #tpu.memory_space<semaphore_mem>>) src(%arg9 : memref<1x32xf32, #tpu.memory_space<any>>) dst(%arg16 : memref<1x32xf32, #tpu.memory_space<vmem>>)
    } else {
    }
    %c0_73 = arith.constant 0 : index
    %c0_74 = arith.constant 0 : index
    %305 = vector.load %arg13[%c0_73, %c0_74] : memref<32x96xbf16, #tpu.memory_space<vmem>>, vector<32x96xbf16>
    %c0_75 = arith.constant 0 : index
    %c0_76 = arith.constant 0 : index
    %306 = vector.load %arg14[%c0_75, %c0_76] : memref<1x96xf32, #tpu.memory_space<vmem>>, vector<1x96xf32>
    %c0_77 = arith.constant 0 : index
    %c0_78 = arith.constant 0 : index
    %307 = vector.load %arg15[%c0_77, %c0_78] : memref<32x96xbf16, #tpu.memory_space<vmem>>, vector<32x96xbf16>
    %c0_79 = arith.constant 0 : index
    %c0_80 = arith.constant 0 : index
    %308 = vector.load %arg16[%c0_79, %c0_80] : memref<1x32xf32, #tpu.memory_space<vmem>>, vector<1x32xf32>
    %c0_81 = arith.constant 0 : index
    %c0_82 = arith.constant 0 : index
    %309 = vector.load %arg18[%c0_81, %c0_82] : memref<64x32xf32, #tpu.memory_space<vmem>>, vector<64x32xf32>
    %310 = arith.truncf %309 : vector<64x32xf32> to vector<64x32xbf16>
    %cst_83 = arith.constant dense<0.000000e+00> : vector<64x96xf32>
    %311 = tpu.matmul %310, %305, %cst_83 {dimension_numbers = #tpu.dot_dimension_numbers<[1], [0], [0], [1], [0, 0, 1, 1], [], []>} : vector<64x32xbf16>, vector<32x96xbf16>, vector<64x96xf32> -> vector<64x96xf32>
    %312 = vector.broadcast %306 : vector<1x96xf32> to vector<64x96xf32>
    %313 = arith.addf %311, %312 : vector<64x96xf32>
    %c1_84 = arith.constant 1 : index
    %c0_85 = arith.constant 0 : index
    %c0_86 = arith.constant 0 : index
    %314 = vector.load %arg17[%c1_84, %c0_85, %c0_86] : memref<2x8x32xf32, #tpu.memory_space<vmem>>, vector<1x8x32xf32>
    %315 = vector.shape_cast %314 : vector<1x8x32xf32> to vector<8x32xf32>
    %316 = vector.extract_strided_slice %313 {offsets = [0, 0], sizes = [8, 96], strides = [1, 1]} : vector<64x96xf32> to vector<8x96xf32>
    %317 = arith.truncf %315 : vector<8x32xf32> to vector<8x32xbf16>
    %cst_87 = arith.constant dense<0.000000e+00> : vector<8x96xf32>
    %318 = tpu.matmul %317, %307, %cst_87 {dimension_numbers = #tpu.dot_dimension_numbers<[1], [0], [0], [1], [0, 0, 1, 1], [], []>} : vector<8x32xbf16>, vector<32x96xbf16>, vector<8x96xf32> -> vector<8x96xf32>
    %319 = vector.extract_strided_slice %316 {offsets = [0, 0], sizes = [8, 32], strides = [1, 1]} : vector<8x96xf32> to vector<8x32xf32>
    %320 = vector.extract_strided_slice %318 {offsets = [0, 0], sizes = [8, 32], strides = [1, 1]} : vector<8x96xf32> to vector<8x32xf32>
    %321 = arith.addf %319, %320 : vector<8x32xf32>
    %322 = arith.negf %321 : vector<8x32xf32>
    %323 = math.exp %322 : vector<8x32xf32>
    %cst_88 = arith.constant 1.000000e+00 : f32
    %324 = vector.broadcast %cst_88 : f32 to vector<8x32xf32>
    %325 = arith.addf %324, %323 : vector<8x32xf32>
    %326 = arith.divf %324, %325 : vector<8x32xf32>
    %327 = vector.extract_strided_slice %316 {offsets = [0, 32], sizes = [8, 32], strides = [1, 1]} : vector<8x96xf32> to vector<8x32xf32>
    %328 = vector.extract_strided_slice %318 {offsets = [0, 32], sizes = [8, 32], strides = [1, 1]} : vector<8x96xf32> to vector<8x32xf32>
    %329 = arith.addf %327, %328 : vector<8x32xf32>
    %330 = arith.negf %329 : vector<8x32xf32>
    %331 = math.exp %330 : vector<8x32xf32>
    %cst_89 = arith.constant 1.000000e+00 : f32
    %332 = vector.broadcast %cst_89 : f32 to vector<8x32xf32>
    %333 = arith.addf %332, %331 : vector<8x32xf32>
    %334 = arith.divf %332, %333 : vector<8x32xf32>
    %335 = vector.extract_strided_slice %316 {offsets = [0, 64], sizes = [8, 32], strides = [1, 1]} : vector<8x96xf32> to vector<8x32xf32>
    %336 = vector.extract_strided_slice %318 {offsets = [0, 64], sizes = [8, 32], strides = [1, 1]} : vector<8x96xf32> to vector<8x32xf32>
    %337 = vector.broadcast %308 : vector<1x32xf32> to vector<8x32xf32>
    %338 = arith.addf %336, %337 : vector<8x32xf32>
    %339 = arith.mulf %326, %338 : vector<8x32xf32>
    %340 = arith.addf %335, %339 : vector<8x32xf32>
    %341 = math.tanh %340 : vector<8x32xf32>
    %cst_90 = arith.constant 1.000000e+00 : f32
    %342 = vector.broadcast %cst_90 : f32 to vector<8x32xf32>
    %343 = arith.subf %342, %334 : vector<8x32xf32>
    %344 = arith.mulf %343, %341 : vector<8x32xf32>
    %345 = arith.mulf %334, %315 : vector<8x32xf32>
    %346 = arith.addf %344, %345 : vector<8x32xf32>
    %c8_i32 = arith.constant 8 : i32
    %347 = arith.muli %arg1, %c8_i32 : i32
    %c0_i32_91 = arith.constant 0 : i32
    %348 = arith.addi %347, %c0_i32_91 : i32
    %c1_i32 = arith.constant 1 : i32
    %349 = arith.addi %348, %c1_i32 : i32
    %350 = vector.broadcast %349 : i32 to vector<8x1xi32>
    %351 = arith.cmpi eq, %3, %350 : vector<8x1xi32>
    %c0_92 = arith.constant 0 : index
    %c0_93 = arith.constant 0 : index
    %352 = vector.load %arg10[%c0_92, %c0_93] : memref<8x32xf32, #tpu.memory_space<vmem>>, vector<8x32xf32>
    %353 = vector.shape_cast %351 : vector<8x1xi1> to vector<8x1xi1>
    %354 = vector.broadcast %353 : vector<8x1xi1> to vector<8x32xi1>
    %355 = arith.select %354, %346, %352 : vector<8x32xi1>, vector<8x32xf32>
    %c0_94 = arith.constant 0 : index
    %c0_95 = arith.constant 0 : index
    %356 = vector.load %arg10[%c0_94, %c0_95] : memref<8x32xf32, #tpu.memory_space<vmem>>, vector<8x32xf32>
    tpu.vector_store %arg10[%c0_94, %c0_95], %355 {strides = array<i32>} : memref<8x32xf32, #tpu.memory_space<vmem>>, vector<8x32xf32>,
    %357 = vector.extract_strided_slice %313 {offsets = [8, 0], sizes = [8, 96], strides = [1, 1]} : vector<64x96xf32> to vector<8x96xf32>
    %358 = arith.truncf %346 : vector<8x32xf32> to vector<8x32xbf16>
    %cst_96 = arith.constant dense<0.000000e+00> : vector<8x96xf32>
    %359 = tpu.matmul %358, %307, %cst_96 {dimension_numbers = #tpu.dot_dimension_numbers<[1], [0], [0], [1], [0, 0, 1, 1], [], []>} : vector<8x32xbf16>, vector<32x96xbf16>, vector<8x96xf32> -> vector<8x96xf32>
    %360 = vector.extract_strided_slice %357 {offsets = [0, 0], sizes = [8, 32], strides = [1, 1]} : vector<8x96xf32> to vector<8x32xf32>
    %361 = vector.extract_strided_slice %359 {offsets = [0, 0], sizes = [8, 32], strides = [1, 1]} : vector<8x96xf32> to vector<8x32xf32>
    %362 = arith.addf %360, %361 : vector<8x32xf32>
    %363 = arith.negf %362 : vector<8x32xf32>
    %364 = math.exp %363 : vector<8x32xf32>
    %cst_97 = arith.constant 1.000000e+00 : f32
    %365 = vector.broadcast %cst_97 : f32 to vector<8x32xf32>
    %366 = arith.addf %365, %364 : vector<8x32xf32>
    %367 = arith.divf %365, %366 : vector<8x32xf32>
    %368 = vector.extract_strided_slice %357 {offsets = [0, 32], sizes = [8, 32], strides = [1, 1]} : vector<8x96xf32> to vector<8x32xf32>
    %369 = vector.extract_strided_slice %359 {offsets = [0, 32], sizes = [8, 32], strides = [1, 1]} : vector<8x96xf32> to vector<8x32xf32>
    %370 = arith.addf %368, %369 : vector<8x32xf32>
    %371 = arith.negf %370 : vector<8x32xf32>
    %372 = math.exp %371 : vector<8x32xf32>
    %cst_98 = arith.constant 1.000000e+00 : f32
    %373 = vector.broadcast %cst_98 : f32 to vector<8x32xf32>
    %374 = arith.addf %373, %372 : vector<8x32xf32>
    %375 = arith.divf %373, %374 : vector<8x32xf32>
    %376 = vector.extract_strided_slice %357 {offsets = [0, 64], sizes = [8, 32], strides = [1, 1]} : vector<8x96xf32> to vector<8x32xf32>
    %377 = vector.extract_strided_slice %359 {offsets = [0, 64], sizes = [8, 32], strides = [1, 1]} : vector<8x96xf32> to vector<8x32xf32>
    %378 = vector.broadcast %308 : vector<1x32xf32> to vector<8x32xf32>
    %379 = arith.addf %377, %378 : vector<8x32xf32>
    %380 = arith.mulf %367, %379 : vector<8x32xf32>
    %381 = arith.addf %376, %380 : vector<8x32xf32>
    %382 = math.tanh %381 : vector<8x32xf32>
    %cst_99 = arith.constant 1.000000e+00 : f32
    %383 = vector.broadcast %cst_99 : f32 to vector<8x32xf32>
    %384 = arith.subf %383, %375 : vector<8x32xf32>
    %385 = arith.mulf %384, %382 : vector<8x32xf32>
    %386 = arith.mulf %375, %346 : vector<8x32xf32>
    %387 = arith.addf %385, %386 : vector<8x32xf32>
    %c8_i32_100 = arith.constant 8 : i32
    %388 = arith.muli %arg1, %c8_i32_100 : i32
    %c1_i32_101 = arith.constant 1 : i32
    %389 = arith.addi %388, %c1_i32_101 : i32
    %c1_i32_102 = arith.constant 1 : i32
    %390 = arith.addi %389, %c1_i32_102 : i32
    %391 = vector.broadcast %390 : i32 to vector<8x1xi32>
    %392 = arith.cmpi eq, %3, %391 : vector<8x1xi32>
    %c0_103 = arith.constant 0 : index
    %c0_104 = arith.constant 0 : index
    %393 = vector.load %arg10[%c0_103, %c0_104] : memref<8x32xf32, #tpu.memory_space<vmem>>, vector<8x32xf32>
    %394 = vector.shape_cast %392 : vector<8x1xi1> to vector<8x1xi1>
    %395 = vector.broadcast %394 : vector<8x1xi1> to vector<8x32xi1>
    %396 = arith.select %395, %387, %393 : vector<8x32xi1>, vector<8x32xf32>
    %c0_105 = arith.constant 0 : index
    %c0_106 = arith.constant 0 : index
    %397 = vector.load %arg10[%c0_105, %c0_106] : memref<8x32xf32, #tpu.memory_space<vmem>>, vector<8x32xf32>
    tpu.vector_store %arg10[%c0_105, %c0_106], %396 {strides = array<i32>} : memref<8x32xf32, #tpu.memory_space<vmem>>, vector<8x32xf32>,
    %398 = vector.extract_strided_slice %313 {offsets = [16, 0], sizes = [8, 96], strides = [1, 1]} : vector<64x96xf32> to vector<8x96xf32>
    %399 = arith.truncf %387 : vector<8x32xf32> to vector<8x32xbf16>
    %cst_107 = arith.constant dense<0.000000e+00> : vector<8x96xf32>
    %400 = tpu.matmul %399, %307, %cst_107 {dimension_numbers = #tpu.dot_dimension_numbers<[1], [0], [0], [1], [0, 0, 1, 1], [], []>} : vector<8x32xbf16>, vector<32x96xbf16>, vector<8x96xf32> -> vector<8x96xf32>
    %401 = vector.extract_strided_slice %398 {offsets = [0, 0], sizes = [8, 32], strides = [1, 1]} : vector<8x96xf32> to vector<8x32xf32>
    %402 = vector.extract_strided_slice %400 {offsets = [0, 0], sizes = [8, 32], strides = [1, 1]} : vector<8x96xf32> to vector<8x32xf32>
    %403 = arith.addf %401, %402 : vector<8x32xf32>
    %404 = arith.negf %403 : vector<8x32xf32>
    %405 = math.exp %404 : vector<8x32xf32>
    %cst_108 = arith.constant 1.000000e+00 : f32
    %406 = vector.broadcast %cst_108 : f32 to vector<8x32xf32>
    %407 = arith.addf %406, %405 : vector<8x32xf32>
    %408 = arith.divf %406, %407 : vector<8x32xf32>
    %409 = vector.extract_strided_slice %398 {offsets = [0, 32], sizes = [8, 32], strides = [1, 1]} : vector<8x96xf32> to vector<8x32xf32>
    %410 = vector.extract_strided_slice %400 {offsets = [0, 32], sizes = [8, 32], strides = [1, 1]} : vector<8x96xf32> to vector<8x32xf32>
    %411 = arith.addf %409, %410 : vector<8x32xf32>
    %412 = arith.negf %411 : vector<8x32xf32>
    %413 = math.exp %412 : vector<8x32xf32>
    %cst_109 = arith.constant 1.000000e+00 : f32
    %414 = vector.broadcast %cst_109 : f32 to vector<8x32xf32>
    %415 = arith.addf %414, %413 : vector<8x32xf32>
    %416 = arith.divf %414, %415 : vector<8x32xf32>
    %417 = vector.extract_strided_slice %398 {offsets = [0, 64], sizes = [8, 32], strides = [1, 1]} : vector<8x96xf32> to vector<8x32xf32>
    %418 = vector.extract_strided_slice %400 {offsets = [0, 64], sizes = [8, 32], strides = [1, 1]} : vector<8x96xf32> to vector<8x32xf32>
    %419 = vector.broadcast %308 : vector<1x32xf32> to vector<8x32xf32>
    %420 = arith.addf %418, %419 : vector<8x32xf32>
    %421 = arith.mulf %408, %420 : vector<8x32xf32>
    %422 = arith.addf %417, %421 : vector<8x32xf32>
    %423 = math.tanh %422 : vector<8x32xf32>
    %cst_110 = arith.constant 1.000000e+00 : f32
    %424 = vector.broadcast %cst_110 : f32 to vector<8x32xf32>
    %425 = arith.subf %424, %416 : vector<8x32xf32>
    %426 = arith.mulf %425, %423 : vector<8x32xf32>
    %427 = arith.mulf %416, %387 : vector<8x32xf32>
    %428 = arith.addf %426, %427 : vector<8x32xf32>
    %c8_i32_111 = arith.constant 8 : i32
    %429 = arith.muli %arg1, %c8_i32_111 : i32
    %c2_i32 = arith.constant 2 : i32
    %430 = arith.addi %429, %c2_i32 : i32
    %c1_i32_112 = arith.constant 1 : i32
    %431 = arith.addi %430, %c1_i32_112 : i32
    %432 = vector.broadcast %431 : i32 to vector<8x1xi32>
    %433 = arith.cmpi eq, %3, %432 : vector<8x1xi32>
    %c0_113 = arith.constant 0 : index
    %c0_114 = arith.constant 0 : index
    %434 = vector.load %arg10[%c0_113, %c0_114] : memref<8x32xf32, #tpu.memory_space<vmem>>, vector<8x32xf32>
    %435 = vector.shape_cast %433 : vector<8x1xi1> to vector<8x1xi1>
    %436 = vector.broadcast %435 : vector<8x1xi1> to vector<8x32xi1>
    %437 = arith.select %436, %428, %434 : vector<8x32xi1>, vector<8x32xf32>
    %c0_115 = arith.constant 0 : index
    %c0_116 = arith.constant 0 : index
    %438 = vector.load %arg10[%c0_115, %c0_116] : memref<8x32xf32, #tpu.memory_space<vmem>>, vector<8x32xf32>
    tpu.vector_store %arg10[%c0_115, %c0_116], %437 {strides = array<i32>} : memref<8x32xf32, #tpu.memory_space<vmem>>, vector<8x32xf32>,
    %439 = vector.extract_strided_slice %313 {offsets = [24, 0], sizes = [8, 96], strides = [1, 1]} : vector<64x96xf32> to vector<8x96xf32>
    %440 = arith.truncf %428 : vector<8x32xf32> to vector<8x32xbf16>
    %cst_117 = arith.constant dense<0.000000e+00> : vector<8x96xf32>
    %441 = tpu.matmul %440, %307, %cst_117 {dimension_numbers = #tpu.dot_dimension_numbers<[1], [0], [0], [1], [0, 0, 1, 1], [], []>} : vector<8x32xbf16>, vector<32x96xbf16>, vector<8x96xf32> -> vector<8x96xf32>
    %442 = vector.extract_strided_slice %439 {offsets = [0, 0], sizes = [8, 32], strides = [1, 1]} : vector<8x96xf32> to vector<8x32xf32>
    %443 = vector.extract_strided_slice %441 {offsets = [0, 0], sizes = [8, 32], strides = [1, 1]} : vector<8x96xf32> to vector<8x32xf32>
    %444 = arith.addf %442, %443 : vector<8x32xf32>
    %445 = arith.negf %444 : vector<8x32xf32>
    %446 = math.exp %445 : vector<8x32xf32>
    %cst_118 = arith.constant 1.000000e+00 : f32
    %447 = vector.broadcast %cst_118 : f32 to vector<8x32xf32>
    %448 = arith.addf %447, %446 : vector<8x32xf32>
    %449 = arith.divf %447, %448 : vector<8x32xf32>
    %450 = vector.extract_strided_slice %439 {offsets = [0, 32], sizes = [8, 32], strides = [1, 1]} : vector<8x96xf32> to vector<8x32xf32>
    %451 = vector.extract_strided_slice %441 {offsets = [0, 32], sizes = [8, 32], strides = [1, 1]} : vector<8x96xf32> to vector<8x32xf32>
    %452 = arith.addf %450, %451 : vector<8x32xf32>
    %453 = arith.negf %452 : vector<8x32xf32>
    %454 = math.exp %453 : vector<8x32xf32>
    %cst_119 = arith.constant 1.000000e+00 : f32
    %455 = vector.broadcast %cst_119 : f32 to vector<8x32xf32>
    %456 = arith.addf %455, %454 : vector<8x32xf32>
    %457 = arith.divf %455, %456 : vector<8x32xf32>
    %458 = vector.extract_strided_slice %439 {offsets = [0, 64], sizes = [8, 32], strides = [1, 1]} : vector<8x96xf32> to vector<8x32xf32>
    %459 = vector.extract_strided_slice %441 {offsets = [0, 64], sizes = [8, 32], strides = [1, 1]} : vector<8x96xf32> to vector<8x32xf32>
    %460 = vector.broadcast %308 : vector<1x32xf32> to vector<8x32xf32>
    %461 = arith.addf %459, %460 : vector<8x32xf32>
    %462 = arith.mulf %449, %461 : vector<8x32xf32>
    %463 = arith.addf %458, %462 : vector<8x32xf32>
    %464 = math.tanh %463 : vector<8x32xf32>
    %cst_120 = arith.constant 1.000000e+00 : f32
    %465 = vector.broadcast %cst_120 : f32 to vector<8x32xf32>
    %466 = arith.subf %465, %457 : vector<8x32xf32>
    %467 = arith.mulf %466, %464 : vector<8x32xf32>
    %468 = arith.mulf %457, %428 : vector<8x32xf32>
    %469 = arith.addf %467, %468 : vector<8x32xf32>
    %c8_i32_121 = arith.constant 8 : i32
    %470 = arith.muli %arg1, %c8_i32_121 : i32
    %c3_i32 = arith.constant 3 : i32
    %471 = arith.addi %470, %c3_i32 : i32
    %c1_i32_122 = arith.constant 1 : i32
    %472 = arith.addi %471, %c1_i32_122 : i32
    %473 = vector.broadcast %472 : i32 to vector<8x1xi32>
    %474 = arith.cmpi eq, %3, %473 : vector<8x1xi32>
    %c0_123 = arith.constant 0 : index
    %c0_124 = arith.constant 0 : index
    %475 = vector.load %arg10[%c0_123, %c0_124] : memref<8x32xf32, #tpu.memory_space<vmem>>, vector<8x32xf32>
    %476 = vector.shape_cast %474 : vector<8x1xi1> to vector<8x1xi1>
    %477 = vector.broadcast %476 : vector<8x1xi1> to vector<8x32xi1>
    %478 = arith.select %477, %469, %475 : vector<8x32xi1>, vector<8x32xf32>
    %c0_125 = arith.constant 0 : index
    %c0_126 = arith.constant 0 : index
    %479 = vector.load %arg10[%c0_125, %c0_126] : memref<8x32xf32, #tpu.memory_space<vmem>>, vector<8x32xf32>
    tpu.vector_store %arg10[%c0_125, %c0_126], %478 {strides = array<i32>} : memref<8x32xf32, #tpu.memory_space<vmem>>, vector<8x32xf32>,
    %480 = vector.extract_strided_slice %313 {offsets = [32, 0], sizes = [8, 96], strides = [1, 1]} : vector<64x96xf32> to vector<8x96xf32>
    %481 = arith.truncf %469 : vector<8x32xf32> to vector<8x32xbf16>
    %cst_127 = arith.constant dense<0.000000e+00> : vector<8x96xf32>
    %482 = tpu.matmul %481, %307, %cst_127 {dimension_numbers = #tpu.dot_dimension_numbers<[1], [0], [0], [1], [0, 0, 1, 1], [], []>} : vector<8x32xbf16>, vector<32x96xbf16>, vector<8x96xf32> -> vector<8x96xf32>
    %483 = vector.extract_strided_slice %480 {offsets = [0, 0], sizes = [8, 32], strides = [1, 1]} : vector<8x96xf32> to vector<8x32xf32>
    %484 = vector.extract_strided_slice %482 {offsets = [0, 0], sizes = [8, 32], strides = [1, 1]} : vector<8x96xf32> to vector<8x32xf32>
    %485 = arith.addf %483, %484 : vector<8x32xf32>
    %486 = arith.negf %485 : vector<8x32xf32>
    %487 = math.exp %486 : vector<8x32xf32>
    %cst_128 = arith.constant 1.000000e+00 : f32
    %488 = vector.broadcast %cst_128 : f32 to vector<8x32xf32>
    %489 = arith.addf %488, %487 : vector<8x32xf32>
    %490 = arith.divf %488, %489 : vector<8x32xf32>
    %491 = vector.extract_strided_slice %480 {offsets = [0, 32], sizes = [8, 32], strides = [1, 1]} : vector<8x96xf32> to vector<8x32xf32>
    %492 = vector.extract_strided_slice %482 {offsets = [0, 32], sizes = [8, 32], strides = [1, 1]} : vector<8x96xf32> to vector<8x32xf32>
    %493 = arith.addf %491, %492 : vector<8x32xf32>
    %494 = arith.negf %493 : vector<8x32xf32>
    %495 = math.exp %494 : vector<8x32xf32>
    %cst_129 = arith.constant 1.000000e+00 : f32
    %496 = vector.broadcast %cst_129 : f32 to vector<8x32xf32>
    %497 = arith.addf %496, %495 : vector<8x32xf32>
    %498 = arith.divf %496, %497 : vector<8x32xf32>
    %499 = vector.extract_strided_slice %480 {offsets = [0, 64], sizes = [8, 32], strides = [1, 1]} : vector<8x96xf32> to vector<8x32xf32>
    %500 = vector.extract_strided_slice %482 {offsets = [0, 64], sizes = [8, 32], strides = [1, 1]} : vector<8x96xf32> to vector<8x32xf32>
    %501 = vector.broadcast %308 : vector<1x32xf32> to vector<8x32xf32>
    %502 = arith.addf %500, %501 : vector<8x32xf32>
    %503 = arith.mulf %490, %502 : vector<8x32xf32>
    %504 = arith.addf %499, %503 : vector<8x32xf32>
    %505 = math.tanh %504 : vector<8x32xf32>
    %cst_130 = arith.constant 1.000000e+00 : f32
    %506 = vector.broadcast %cst_130 : f32 to vector<8x32xf32>
    %507 = arith.subf %506, %498 : vector<8x32xf32>
    %508 = arith.mulf %507, %505 : vector<8x32xf32>
    %509 = arith.mulf %498, %469 : vector<8x32xf32>
    %510 = arith.addf %508, %509 : vector<8x32xf32>
    %c8_i32_131 = arith.constant 8 : i32
    %511 = arith.muli %arg1, %c8_i32_131 : i32
    %c4_i32 = arith.constant 4 : i32
    %512 = arith.addi %511, %c4_i32 : i32
    %c1_i32_132 = arith.constant 1 : i32
    %513 = arith.addi %512, %c1_i32_132 : i32
    %514 = vector.broadcast %513 : i32 to vector<8x1xi32>
    %515 = arith.cmpi eq, %3, %514 : vector<8x1xi32>
    %c0_133 = arith.constant 0 : index
    %c0_134 = arith.constant 0 : index
    %516 = vector.load %arg10[%c0_133, %c0_134] : memref<8x32xf32, #tpu.memory_space<vmem>>, vector<8x32xf32>
    %517 = vector.shape_cast %515 : vector<8x1xi1> to vector<8x1xi1>
    %518 = vector.broadcast %517 : vector<8x1xi1> to vector<8x32xi1>
    %519 = arith.select %518, %510, %516 : vector<8x32xi1>, vector<8x32xf32>
    %c0_135 = arith.constant 0 : index
    %c0_136 = arith.constant 0 : index
    %520 = vector.load %arg10[%c0_135, %c0_136] : memref<8x32xf32, #tpu.memory_space<vmem>>, vector<8x32xf32>
    tpu.vector_store %arg10[%c0_135, %c0_136], %519 {strides = array<i32>} : memref<8x32xf32, #tpu.memory_space<vmem>>, vector<8x32xf32>,
    %521 = vector.extract_strided_slice %313 {offsets = [40, 0], sizes = [8, 96], strides = [1, 1]} : vector<64x96xf32> to vector<8x96xf32>
    %522 = arith.truncf %510 : vector<8x32xf32> to vector<8x32xbf16>
    %cst_137 = arith.constant dense<0.000000e+00> : vector<8x96xf32>
    %523 = tpu.matmul %522, %307, %cst_137 {dimension_numbers = #tpu.dot_dimension_numbers<[1], [0], [0], [1], [0, 0, 1, 1], [], []>} : vector<8x32xbf16>, vector<32x96xbf16>, vector<8x96xf32> -> vector<8x96xf32>
    %524 = vector.extract_strided_slice %521 {offsets = [0, 0], sizes = [8, 32], strides = [1, 1]} : vector<8x96xf32> to vector<8x32xf32>
    %525 = vector.extract_strided_slice %523 {offsets = [0, 0], sizes = [8, 32], strides = [1, 1]} : vector<8x96xf32> to vector<8x32xf32>
    %526 = arith.addf %524, %525 : vector<8x32xf32>
    %527 = arith.negf %526 : vector<8x32xf32>
    %528 = math.exp %527 : vector<8x32xf32>
    %cst_138 = arith.constant 1.000000e+00 : f32
    %529 = vector.broadcast %cst_138 : f32 to vector<8x32xf32>
    %530 = arith.addf %529, %528 : vector<8x32xf32>
    %531 = arith.divf %529, %530 : vector<8x32xf32>
    %532 = vector.extract_strided_slice %521 {offsets = [0, 32], sizes = [8, 32], strides = [1, 1]} : vector<8x96xf32> to vector<8x32xf32>
    %533 = vector.extract_strided_slice %523 {offsets = [0, 32], sizes = [8, 32], strides = [1, 1]} : vector<8x96xf32> to vector<8x32xf32>
    %534 = arith.addf %532, %533 : vector<8x32xf32>
    %535 = arith.negf %534 : vector<8x32xf32>
    %536 = math.exp %535 : vector<8x32xf32>
    %cst_139 = arith.constant 1.000000e+00 : f32
    %537 = vector.broadcast %cst_139 : f32 to vector<8x32xf32>
    %538 = arith.addf %537, %536 : vector<8x32xf32>
    %539 = arith.divf %537, %538 : vector<8x32xf32>
    %540 = vector.extract_strided_slice %521 {offsets = [0, 64], sizes = [8, 32], strides = [1, 1]} : vector<8x96xf32> to vector<8x32xf32>
    %541 = vector.extract_strided_slice %523 {offsets = [0, 64], sizes = [8, 32], strides = [1, 1]} : vector<8x96xf32> to vector<8x32xf32>
    %542 = vector.broadcast %308 : vector<1x32xf32> to vector<8x32xf32>
    %543 = arith.addf %541, %542 : vector<8x32xf32>
    %544 = arith.mulf %531, %543 : vector<8x32xf32>
    %545 = arith.addf %540, %544 : vector<8x32xf32>
    %546 = math.tanh %545 : vector<8x32xf32>
    %cst_140 = arith.constant 1.000000e+00 : f32
    %547 = vector.broadcast %cst_140 : f32 to vector<8x32xf32>
    %548 = arith.subf %547, %539 : vector<8x32xf32>
    %549 = arith.mulf %548, %546 : vector<8x32xf32>
    %550 = arith.mulf %539, %510 : vector<8x32xf32>
    %551 = arith.addf %549, %550 : vector<8x32xf32>
    %c8_i32_141 = arith.constant 8 : i32
    %552 = arith.muli %arg1, %c8_i32_141 : i32
    %c5_i32 = arith.constant 5 : i32
    %553 = arith.addi %552, %c5_i32 : i32
    %c1_i32_142 = arith.constant 1 : i32
    %554 = arith.addi %553, %c1_i32_142 : i32
    %555 = vector.broadcast %554 : i32 to vector<8x1xi32>
    %556 = arith.cmpi eq, %3, %555 : vector<8x1xi32>
    %c0_143 = arith.constant 0 : index
    %c0_144 = arith.constant 0 : index
    %557 = vector.load %arg10[%c0_143, %c0_144] : memref<8x32xf32, #tpu.memory_space<vmem>>, vector<8x32xf32>
    %558 = vector.shape_cast %556 : vector<8x1xi1> to vector<8x1xi1>
    %559 = vector.broadcast %558 : vector<8x1xi1> to vector<8x32xi1>
    %560 = arith.select %559, %551, %557 : vector<8x32xi1>, vector<8x32xf32>
    %c0_145 = arith.constant 0 : index
    %c0_146 = arith.constant 0 : index
    %561 = vector.load %arg10[%c0_145, %c0_146] : memref<8x32xf32, #tpu.memory_space<vmem>>, vector<8x32xf32>
    tpu.vector_store %arg10[%c0_145, %c0_146], %560 {strides = array<i32>} : memref<8x32xf32, #tpu.memory_space<vmem>>, vector<8x32xf32>,
    %562 = vector.extract_strided_slice %313 {offsets = [48, 0], sizes = [8, 96], strides = [1, 1]} : vector<64x96xf32> to vector<8x96xf32>
    %563 = arith.truncf %551 : vector<8x32xf32> to vector<8x32xbf16>
    %cst_147 = arith.constant dense<0.000000e+00> : vector<8x96xf32>
    %564 = tpu.matmul %563, %307, %cst_147 {dimension_numbers = #tpu.dot_dimension_numbers<[1], [0], [0], [1], [0, 0, 1, 1], [], []>} : vector<8x32xbf16>, vector<32x96xbf16>, vector<8x96xf32> -> vector<8x96xf32>
    %565 = vector.extract_strided_slice %562 {offsets = [0, 0], sizes = [8, 32], strides = [1, 1]} : vector<8x96xf32> to vector<8x32xf32>
    %566 = vector.extract_strided_slice %564 {offsets = [0, 0], sizes = [8, 32], strides = [1, 1]} : vector<8x96xf32> to vector<8x32xf32>
    %567 = arith.addf %565, %566 : vector<8x32xf32>
    %568 = arith.negf %567 : vector<8x32xf32>
    %569 = math.exp %568 : vector<8x32xf32>
    %cst_148 = arith.constant 1.000000e+00 : f32
    %570 = vector.broadcast %cst_148 : f32 to vector<8x32xf32>
    %571 = arith.addf %570, %569 : vector<8x32xf32>
    %572 = arith.divf %570, %571 : vector<8x32xf32>
    %573 = vector.extract_strided_slice %562 {offsets = [0, 32], sizes = [8, 32], strides = [1, 1]} : vector<8x96xf32> to vector<8x32xf32>
    %574 = vector.extract_strided_slice %564 {offsets = [0, 32], sizes = [8, 32], strides = [1, 1]} : vector<8x96xf32> to vector<8x32xf32>
    %575 = arith.addf %573, %574 : vector<8x32xf32>
    %576 = arith.negf %575 : vector<8x32xf32>
    %577 = math.exp %576 : vector<8x32xf32>
    %cst_149 = arith.constant 1.000000e+00 : f32
    %578 = vector.broadcast %cst_149 : f32 to vector<8x32xf32>
    %579 = arith.addf %578, %577 : vector<8x32xf32>
    %580 = arith.divf %578, %579 : vector<8x32xf32>
    %581 = vector.extract_strided_slice %562 {offsets = [0, 64], sizes = [8, 32], strides = [1, 1]} : vector<8x96xf32> to vector<8x32xf32>
    %582 = vector.extract_strided_slice %564 {offsets = [0, 64], sizes = [8, 32], strides = [1, 1]} : vector<8x96xf32> to vector<8x32xf32>
    %583 = vector.broadcast %308 : vector<1x32xf32> to vector<8x32xf32>
    %584 = arith.addf %582, %583 : vector<8x32xf32>
    %585 = arith.mulf %572, %584 : vector<8x32xf32>
    %586 = arith.addf %581, %585 : vector<8x32xf32>
    %587 = math.tanh %586 : vector<8x32xf32>
    %cst_150 = arith.constant 1.000000e+00 : f32
    %588 = vector.broadcast %cst_150 : f32 to vector<8x32xf32>
    %589 = arith.subf %588, %580 : vector<8x32xf32>
    %590 = arith.mulf %589, %587 : vector<8x32xf32>
    %591 = arith.mulf %580, %551 : vector<8x32xf32>
    %592 = arith.addf %590, %591 : vector<8x32xf32>
    %c8_i32_151 = arith.constant 8 : i32
    %593 = arith.muli %arg1, %c8_i32_151 : i32
    %c6_i32 = arith.constant 6 : i32
    %594 = arith.addi %593, %c6_i32 : i32
    %c1_i32_152 = arith.constant 1 : i32
    %595 = arith.addi %594, %c1_i32_152 : i32
    %596 = vector.broadcast %595 : i32 to vector<8x1xi32>
    %597 = arith.cmpi eq, %3, %596 : vector<8x1xi32>
    %c0_153 = arith.constant 0 : index
    %c0_154 = arith.constant 0 : index
    %598 = vector.load %arg10[%c0_153, %c0_154] : memref<8x32xf32, #tpu.memory_space<vmem>>, vector<8x32xf32>
    %599 = vector.shape_cast %597 : vector<8x1xi1> to vector<8x1xi1>
    %600 = vector.broadcast %599 : vector<8x1xi1> to vector<8x32xi1>
    %601 = arith.select %600, %592, %598 : vector<8x32xi1>, vector<8x32xf32>
    %c0_155 = arith.constant 0 : index
    %c0_156 = arith.constant 0 : index
    %602 = vector.load %arg10[%c0_155, %c0_156] : memref<8x32xf32, #tpu.memory_space<vmem>>, vector<8x32xf32>
    tpu.vector_store %arg10[%c0_155, %c0_156], %601 {strides = array<i32>} : memref<8x32xf32, #tpu.memory_space<vmem>>, vector<8x32xf32>,
    %603 = vector.extract_strided_slice %313 {offsets = [56, 0], sizes = [8, 96], strides = [1, 1]} : vector<64x96xf32> to vector<8x96xf32>
    %604 = arith.truncf %592 : vector<8x32xf32> to vector<8x32xbf16>
    %cst_157 = arith.constant dense<0.000000e+00> : vector<8x96xf32>
    %605 = tpu.matmul %604, %307, %cst_157 {dimension_numbers = #tpu.dot_dimension_numbers<[1], [0], [0], [1], [0, 0, 1, 1], [], []>} : vector<8x32xbf16>, vector<32x96xbf16>, vector<8x96xf32> -> vector<8x96xf32>
    %606 = vector.extract_strided_slice %603 {offsets = [0, 0], sizes = [8, 32], strides = [1, 1]} : vector<8x96xf32> to vector<8x32xf32>
    %607 = vector.extract_strided_slice %605 {offsets = [0, 0], sizes = [8, 32], strides = [1, 1]} : vector<8x96xf32> to vector<8x32xf32>
    %608 = arith.addf %606, %607 : vector<8x32xf32>
    %609 = arith.negf %608 : vector<8x32xf32>
    %610 = math.exp %609 : vector<8x32xf32>
    %cst_158 = arith.constant 1.000000e+00 : f32
    %611 = vector.broadcast %cst_158 : f32 to vector<8x32xf32>
    %612 = arith.addf %611, %610 : vector<8x32xf32>
    %613 = arith.divf %611, %612 : vector<8x32xf32>
    %614 = vector.extract_strided_slice %603 {offsets = [0, 32], sizes = [8, 32], strides = [1, 1]} : vector<8x96xf32> to vector<8x32xf32>
    %615 = vector.extract_strided_slice %605 {offsets = [0, 32], sizes = [8, 32], strides = [1, 1]} : vector<8x96xf32> to vector<8x32xf32>
    %616 = arith.addf %614, %615 : vector<8x32xf32>
    %617 = arith.negf %616 : vector<8x32xf32>
    %618 = math.exp %617 : vector<8x32xf32>
    %cst_159 = arith.constant 1.000000e+00 : f32
    %619 = vector.broadcast %cst_159 : f32 to vector<8x32xf32>
    %620 = arith.addf %619, %618 : vector<8x32xf32>
    %621 = arith.divf %619, %620 : vector<8x32xf32>
    %622 = vector.extract_strided_slice %603 {offsets = [0, 64], sizes = [8, 32], strides = [1, 1]} : vector<8x96xf32> to vector<8x32xf32>
    %623 = vector.extract_strided_slice %605 {offsets = [0, 64], sizes = [8, 32], strides = [1, 1]} : vector<8x96xf32> to vector<8x32xf32>
    %624 = vector.broadcast %308 : vector<1x32xf32> to vector<8x32xf32>
    %625 = arith.addf %623, %624 : vector<8x32xf32>
    %626 = arith.mulf %613, %625 : vector<8x32xf32>
    %627 = arith.addf %622, %626 : vector<8x32xf32>
    %628 = math.tanh %627 : vector<8x32xf32>
    %cst_160 = arith.constant 1.000000e+00 : f32
    %629 = vector.broadcast %cst_160 : f32 to vector<8x32xf32>
    %630 = arith.subf %629, %621 : vector<8x32xf32>
    %631 = arith.mulf %630, %628 : vector<8x32xf32>
    %632 = arith.mulf %621, %592 : vector<8x32xf32>
    %633 = arith.addf %631, %632 : vector<8x32xf32>
    %c8_i32_161 = arith.constant 8 : i32
    %634 = arith.muli %arg1, %c8_i32_161 : i32
    %c7_i32 = arith.constant 7 : i32
    %635 = arith.addi %634, %c7_i32 : i32
    %c1_i32_162 = arith.constant 1 : i32
    %636 = arith.addi %635, %c1_i32_162 : i32
    %637 = vector.broadcast %636 : i32 to vector<8x1xi32>
    %638 = arith.cmpi eq, %3, %637 : vector<8x1xi32>
    %c0_163 = arith.constant 0 : index
    %c0_164 = arith.constant 0 : index
    %639 = vector.load %arg10[%c0_163, %c0_164] : memref<8x32xf32, #tpu.memory_space<vmem>>, vector<8x32xf32>
    %640 = vector.shape_cast %638 : vector<8x1xi1> to vector<8x1xi1>
    %641 = vector.broadcast %640 : vector<8x1xi1> to vector<8x32xi1>
    %642 = arith.select %641, %633, %639 : vector<8x32xi1>, vector<8x32xf32>
    %c0_165 = arith.constant 0 : index
    %c0_166 = arith.constant 0 : index
    %643 = vector.load %arg10[%c0_165, %c0_166] : memref<8x32xf32, #tpu.memory_space<vmem>>, vector<8x32xf32>
    tpu.vector_store %arg10[%c0_165, %c0_166], %642 {strides = array<i32>} : memref<8x32xf32, #tpu.memory_space<vmem>>, vector<8x32xf32>,
    %c1_167 = arith.constant 1 : index
    %c0_168 = arith.constant 0 : index
    %c0_169 = arith.constant 0 : index
    %644 = vector.load %arg17[%c1_167, %c0_168, %c0_169] : memref<2x8x32xf32, #tpu.memory_space<vmem>>, vector<1x8x32xf32>
    %645 = vector.shape_cast %644 : vector<1x8x32xf32> to vector<8x32xf32>
    %646 = vector.shape_cast %633 : vector<8x32xf32> to vector<1x8x32xf32>
    tpu.vector_store %arg17[%c1_167, %c0_168, %c0_169], %646 {strides = array<i32>} : memref<2x8x32xf32, #tpu.memory_space<vmem>>, vector<1x8x32xf32>,
    %c1_i32_170 = arith.constant 1 : i32
    %647 = arith.cmpi eq, %arg1, %c1_i32_170 : i32
    %648 = arith.extui %647 : i1 to i32
    %c0_i32_171 = arith.constant 0 : i32
    %649 = arith.cmpi ne, %648, %c0_i32_171 : i32
    scf.if %649 {
      %c0_172 = arith.constant 0 : index
      %c0_173 = arith.constant 0 : index
      %650 = vector.load %arg10[%c0_172, %c0_173] : memref<8x32xf32, #tpu.memory_space<vmem>>, vector<8x32xf32>
      %651 = arith.mulf %650, %650 : vector<8x32xf32>
      %cst_174 = arith.constant dense<0.000000e+00> : vector<8xf32>
      %652 = vector.multi_reduction <add>, %651, %cst_174 [1] : vector<8x32xf32> to vector<8xf32>
      %653 = vector.shape_cast %652 : vector<8xf32> to vector<8x1xf32>
      %cst_175 = arith.constant 1.000000e-30 : f32
      %654 = vector.broadcast %cst_175 : f32 to vector<8x1xf32>
      %655 = arith.maximumf %653, %654 : vector<8x1xf32>
      %656 = math.rsqrt %655 : vector<8x1xf32>
      %657 = vector.broadcast %656 : vector<8x1xf32> to vector<8x32xf32>
      %658 = arith.mulf %650, %657 : vector<8x32xf32>
      %c0_176 = arith.constant 0 : index
      %c0_177 = arith.constant 0 : index
      %659 = vector.load %arg10[%c0_176, %c0_177] : memref<8x32xf32, #tpu.memory_space<vmem>>, vector<8x32xf32>
      tpu.vector_store %arg10[%c0_176, %c0_177], %658 {strides = array<i32>} : memref<8x32xf32, #tpu.memory_space<vmem>>, vector<8x32xf32>,
    } else {
    }
    return
  }
  func.func @transform_0(%arg0: i32, %arg1: i32) -> (i32, i32) {
    %c0_i32 = arith.constant 0 : i32
    %c0_i32_0 = arith.constant 0 : i32
    return %arg0, %c0_i32 : i32, i32
  }
  func.func @transform_1(%arg0: i32, %arg1: i32) -> (i32, i32, i32) {
    %c0_i32 = arith.constant 0 : i32
    %c0_i32_0 = arith.constant 0 : i32
    return %arg1, %arg0, %c0_i32 : i32, i32, i32
  }
  func.func @transform_8(%arg0: i32, %arg1: i32) -> (i32, i32) {
    %c0_i32 = arith.constant 0 : i32
    %c0_i32_0 = arith.constant 0 : i32
    return %arg0, %c0_i32 : i32, i32
  }
}

</mosaic_0001>

<bundles_post_ra>
// kernel: tpu_custom_call.1
= control target key start
LH: loop header
LB: loop body
LE: loop exit
PB: predicated region body
PF: predicated region fallthrough
CT: control target
= control target key end

     0   :  { %s3776_s0 = inlined_call_operand.hbm [shape: s32[16,1], index: 0, kind: input, shape index: {}]   ;;  %s3777_s1 = inlined_call_operand.hbm [shape: bf16[16,16,96], index: 1, kind: input, shape index: {}]   ;;  %s3778_s2 = inlined_call_operand.hbm [shape: bf16[32,96], index: 2, kind: input, shape index: {}]   ;;  %s3779_s3 = inlined_call_operand.hbm [shape: f32[1,32], index: 3, kind: input, shape index: {}]   ;;  %s3780_s4 = inlined_call_operand.hbm [shape: bf16[32,96], index: 4, kind: input, shape index: {}]   ;;  %s3781_s5 = inlined_call_operand.hbm [shape: f32[1,96], index: 5, kind: input, shape index: {}]   ;;  %s3782_s6 = inlined_call_operand.hbm [shape: bf16[32,96], index: 6, kind: input, shape index: {}]   ;;  %s3783_s7 = inlined_call_operand.hbm [shape: f32[1,32], index: 7, kind: input, shape index: {}]   ;;  %s3784_s8 = inlined_call_operand.hbm [shape: f32[16,32], index: 8, kind: output, shape index: {}]  }
   0x1   :  { %3795 = sst [smem:[#allocation48_spill]] %s3776_s0 }
   0x2   :  { %3796 = sst [smem:[#allocation49_spill]] %s3777_s1 }
   0x3   :  { %3797 = sst [smem:[#allocation50_spill]] %s3783_s7 }
   0x4   :  { %3798 = sst [smem:[#allocation51_spill]] %s3784_s8 }
   0x5   :  { %13 = vsyncpa [#allocation12], 0 }
   0x6   :  { %15 = vsyncpa [#allocation12 + $0x1], 0 }
   0x7   :  { %16 = vsyncpa [#allocation15], 0 }
   0x8   :  { %18 = vsyncpa [#allocation15 + $0x1], 0 }
   0x9   :  { %19 = vsyncpa [#allocation13], 0 }
   0xa   :  { %21 = vsyncpa [#allocation13 + $0x1], 0  ;;  %s2949_s27 = smov 0   ;;  %s2951_s28 = smov 0  }
   0xb   :  { %s2953_s29 = smov 0   ;;  %s2955_s30 = smov 0  }
   0xc   :  { %s2957_s9 = smov 0   ;;  %s2959_s10 = smov 0  }
   0xd   :  { %s2961_s11 = smov 0   ;;  %s2963_s12 = smov 0  }
   0xe   :  { %s2965_s13 = smov 0   ;;  %s2967_s14 = smov 0  }
   0xf   :  { %s2969_s15 = smov 0  }
  0x10 LB: > { %3799 = sst [smem:[#allocation40_spill]] %s2855_s30  ;;  %s2038_s16 = sadd.s32 4294967295, %s2883_s15   ;;  %s2883_s15 = sphi %s2969_s15, %s27_s15   ;;  %s2879_s14 = sphi %s2967_s14, %s3843_s14   ;;  %s2875_s13 = sphi %s2965_s13, %s3842_s13   ;;  %s2871_s12 = sphi %s2963_s12, %s3841_s12   ;;  %s2867_s11 = sphi %s2961_s11, %s3840_s11   ;;  %s2863_s10 = sphi %s2959_s10, %s3832_s10   ;;  %s2859_s9 = sphi %s2957_s9, %s3839_s9   ;;  %s2855_s30 = sphi %s2955_s30, %s3838_s30   ;;  %s2851_s29 = sphi %s2953_s29, %s3837_s29   ;;  %s2847_s28 = sphi %s2951_s28, %s3836_s28   ;;  %s2843_s27 = sphi %s2949_s27, %s3835_s27  }
  0x11   : > { %3800 = sst [smem:[#allocation41_spill]] %s2863_s10  ;;  %s2039_s17 = sadd.s32 4294967294, %s2883_s15  }
  0x12   : > { %3801 = sst [smem:[#allocation42_spill]] %s2871_s12  ;;  %s36_s18 = sadd.s32 1, %s2875_s13 }
  0x13   : > { %s39_s19 = sadd.s32 1, %s2879_s14  ;;  %p37_p0 = scmp.ge.s32.totalorder %s36_s18, 2 }
  0x14   : > { %s46_s20 = sadd.s32 1, %s2863_s10  ;;  %p53_p1 = scmp.ne.s32.totalorder %s2863_s10, %s2859_s9 }
  0x15   : > { %p54_p2 = scmp.eq.s32.totalorder %s2883_s15, 0  ;;  %s3845_s18 = smov (%p37_p0, %s36_s18), 0 }
  0x16   : > { %3802 = sst [smem:[#allocation43_spill]] %s3845_s18  ;;  %s3847_s19 = smov (!%p37_p0, %s39_s19), %s2879_s14 }
  0x17   : > { %p3020_p3 = por %p54_p2, %p53_p1  ;;  %p59_p4 = scmp.ne.s32.totalorder %s2859_s9, %s2855_s30 }
  0x18   : > { %p41_p5 = scmp.ge.s32.totalorder %s3847_s19, 2  ;;  %p3026_p6 = scmp.eq.s32.totalorder %s2038_s16, 0 }
  0x19   : > { %s69_s23 = ssub.s32 %s2875_s13, %s3845_s18  ;;  %s74_s24 = sadd.s32 1, %s2851_s29 }
  0x1a   : > { %s3849_s19 = smov (%p41_p5, %s3847_s19), 0  ;;  %p3040_p7 = por %p3026_p6, %p59_p4 }
  0x1b   : > { %3805 = sst [smem:[#allocation44_spill]] %s3849_s19  ;;  %p81_p8 = scmp.ne.s32.totalorder %s2851_s29, %s2847_s28 }
  0x1c   : > { %s3806_s25 = scalar_select %p3040_p7, 1, 0 }
  0x1d   : > { %s43_s26 = ssub.s32 %s2879_s14, %s3849_s19  ;;  %p87_p9 = scmp.ne.s32.totalorder %s2847_s28, %s2843_s27 }
  0x1e   : > { %p44_p10 = scmp.eq.s32.totalorder %s43_s26, 0  ;;  %s71_s18 = sor.u32 %s69_s23, %s43_s26 }
  0x1f   : > { %p72_p11 = scmp.eq.s32.totalorder %s71_s18, 0  ;;  %p3052_p12 = por %p81_p8, %p54_p2 }
  0x20   : > { %s3057_s12 = scalar_select %p44_p10, %s2863_s10, %s46_s20  }
  0x21   : > { %s3060_s7 = scalar_select %p72_p11, %s2851_s29, %s74_s24  }
  0x22   : > { %3808 = sst [smem:[#allocation45_spill]] %s3057_s12  ;;  %p3064_p13 = por %p87_p9, %p3026_p6 }
  0x23   : > { %3809 = sst [smem:[#allocation46_spill]] %s3060_s7  ;;  %p111_p0 = scmp.eq.s32.totalorder %s2038_s16, 3 }
  0x24   : > { %s3810_s19 = scalar_select %p3064_p13, 1, 0 }
  0x25   : > { %p117_p5 = scmp.eq.s32.totalorder %s2039_s17, 3  ;;  %p3071_p2 = por %p111_p0, %p53_p1 }
  0x26   : > { %p2333_p8 = scmp.lt.s32.totalorder %s2883_s15, 4  ;;  %s137_s20 = sand.u32 1, %s2863_s10  }
  0x27   : > { %s3811_s27 = scalar_select %p3071_p2, 1, 0 }
  0x28   : > { %p3079_p10 = por %p117_p5, %p59_p4  ;;  %s2042_s22 = sshll.u32 %s137_s20, 3 }
  0x29   : > { %s2043_s23 = sshll.u32 %s2879_s14, 7  ;;  %s3814_s0 = sld [smem:[#allocation48_spill]] }
  0x2a   : > { %s3812_s18 = scalar_select %p3079_p10, 1, 0 }
  0x2b   : > { %s141_s16 = scalar_lea.vmem [#allocation11], %s2042_s22  ;;  %p3094_p1 = pnand %p2333_p8, %p3020_p3 }
  0x2c   : > { %3813 = sst [smem:[#allocation47_spill]] %s3812_s18  ;;  %s148_s17 = sshll.u32 %s141_s16, 4  ;;  %s3090_s17 = int_to_ptr.vmem [resolvable:$true] %s148_s17 }
  0x2d   : > { %p3100_p4 = pnand %p2333_p8, %p3052_p12  ;;  %p2543_p0 = pneg %p3094_p1 }
  0x2f   : > { %s3088_s12 = scalar_lea.hbm %s3814_s0, %s2043_s23  ;;  %s138_s23 = scalar_lea.sflag [#allocation12], %s137_s20 }
  0x30   : > { %s2541_s22 = scalar_lea.hbm %s3088_s12, 128  ;;  %s2546_s8 = scalar_lea.hbm %s3814_s0, 256 }
  0x31   : > { %p2542_p11 = scmp.ne.s32.totalorder %s3088_s12, %s2541_s22  ;;  %p2547_p12 = scmp.lt.u32.totalorder %s3088_s12, %s3814_s0 }
  0x32   : > { %p2548_p8 = scmp.lt.u32.totalorder %s2546_s8, %s2541_s22  ;;  %p2550_p9 = scmp.lt.u32.totalorder %s2541_s22, %s3088_s12 }
  0x33   : > { %p2544_p3 = pnand %p2543_p0, %p2542_p11 }
  0x34   : > { %p2549_p6 = por %p2548_p8, %p2547_p12 }
  0x35   : > { %p2545_p5 = pneg %p2544_p3 }
  0x36   : > { %p2551_p10 = por %p2550_p9, %p2549_p6 }
  0x38   : > { %p2552_p2 = pnand %p2551_p10, %p2545_p5 }
  0x3a   : > { %2555 = shalt.err (!%p2552_p2)
}
  0x3b   : > { %s2556_s20 = scalar_lea.vmem %s3090_s17, 128  ;;  %s2885_s21 = smov [#allocation11]  }
  0x3c   : > { %p2557_p11 = scmp.ne.s32.totalorder %s3090_s17, %s2556_s20  ;;  %s2561_s26 = sshll.u32 %s2885_s21, 4  ;;  %s2562_s26 = int_to_ptr.vmem [resolvable:$false] %s2561_s26 }
  0x3d   : > { %s2563_s10 = scalar_lea.vmem %s2562_s26, 256  ;;  %p2564_p7 = scmp.lt.s32.totalorder %s3090_s17, %s2562_s26 }
  0x3e   : > { %p2559_p3 = pnand %p2557_p11, %p2543_p0  ;;  %p2565_p12 = scmp.lt.s32.totalorder %s2563_s10, %s2556_s20 }
  0x40   : > { %p2560_p13 = pneg %p2559_p3  ;;  %p2566_p8 = por %p2565_p12, %p2564_p7 }
  0x42   : > { %p2567_p6 = pnand %p2566_p8, %p2560_p13 }
  0x44   : > { %2570 = shalt.err (!%p2567_p6)
}
  0x45   : > { %2325 = dma.hbm_to_vmem [thread:$0]  (!%p3094_p1), %s3088_s12, 128, %s3090_s17, %s138_s23  }
  0x46   : > { %p3817_p2 = scmp.lt.s32.totalorder %s2883_s15, 5  ;;  %p3818_p10 = scmp.ge.s32.totalorder %s2883_s15, 1 }
  0x47   : > { %s155_s8 = sand.u32 1, %s2851_s29   ;;  %s2113_s16 = sshll.u32 %s2875_s13, 4 }
  0x48   : > { %p3135_p9 = pnand %p3818_p10, %p3817_p2  ;;  %s2044_s20 = sshll.u32 %s155_s8, 5 }
  0x49   : > { %s165_s7 = sadd.s32 %s2879_s14, %s2113_s16  ;;  %s159_s26 = scalar_lea.vmem [#allocation14], %s2044_s20 }
  0x4a   : > { %s2047_s21 = sshll.u32 %s165_s7, 6  ;;  %s168_s10 = sshll.u32 %s159_s26, 4  ;;  %s3147_s10 = int_to_ptr.vmem [resolvable:$true] %s168_s10 }
  0x4b   : > { %s3820_s1 = sld [smem:[#allocation49_spill]]  ;;  %s3149_s12 = scalar_lea.sflag [#allocation15], %s155_s8 }
  0x4c   : > { %p2573_p13 = pneg %p3100_p4 }
  0x51   : > { %s3145_s30 = scalar_lea.hbm %s3820_s1, %s2047_s21  ;;  %s2576_s18 = scalar_lea.hbm %s3820_s1, 2048 }
  0x52   : > { %s2571_s17 = scalar_lea.hbm %s3145_s30, 512  ;;  %p2577_p5 = scmp.lt.u32.totalorder %s3145_s30, %s3820_s1 }
  0x53   : > { %p2572_p7 = scmp.ne.s32.totalorder %s3145_s30, %s2571_s17  ;;  %p2578_p11 = scmp.lt.u32.totalorder %s2576_s18, %s2571_s17 }
  0x54   : > { %p2580_p12 = scmp.lt.u32.totalorder %s2571_s17, %s3145_s30 }
  0x55   : > { %p2574_p1 = pnand %p2573_p13, %p2572_p7  ;;  %p2579_p3 = por %p2578_p11, %p2577_p5 }
  0x57   : > { %p2575_p0 = pneg %p2574_p1  ;;  %p2581_p8 = por %p2580_p12, %p2579_p3 }
  0x59   : > { %p2582_p6 = pnand %p2581_p8, %p2575_p0 }
  0x5b   : > { %2585 = shalt.err (!%p2582_p6)
}
  0x5c   : > { %s2586_s8 = scalar_lea.vmem %s3147_s10, 512  ;;  %s2886_s7 = smov [#allocation14]  }
  0x5d   : > { %p2587_p2 = scmp.ne.s32.totalorder %s3147_s10, %s2586_s8  ;;  %s2591_s21 = sshll.u32 %s2886_s7, 4  ;;  %s2592_s21 = int_to_ptr.vmem [resolvable:$false] %s2591_s21 }
  0x5e   : > { %s2593_s26 = scalar_lea.vmem %s2592_s21, 1024  ;;  %p2594_p1 = scmp.lt.s32.totalorder %s3147_s10, %s2592_s21 }
  0x5f   : > { %p2589_p10 = pnand %p2587_p2, %p2573_p13  ;;  %p2595_p5 = scmp.lt.s32.totalorder %s2593_s26, %s2586_s8 }
  0x61   : > { %p2590_p7 = pneg %p2589_p10  ;;  %p2596_p11 = por %p2595_p5, %p2594_p1 }
  0x63   : > { %p2597_p3 = pnand %p2596_p11, %p2590_p7 }
  0x65   : > { %2600 = shalt.err (!%p2597_p3)
}
  0x66   : > { %s2887_s17 = smov 128   ;;  %s2888_s23 = smov 64  }
  0x67   : > { %s2889_s0 = smov 4   ;;  %180 = sbr.rel (%p3135_p9) target bundleno = 11846 (0x2e46), region = 28 }
  0x68   : > { %2328 = dma.hbm_to_vmem [thread:$0]  (!%p3100_p4), %s3145_s30, 512, %s3147_s10, %s3149_s12, %s2887_s17, %s2888_s23, %s2889_s0  }
  0x69   : > { %s3180_s18 = sand.u32 (!%p3135_p9), 1, %s2859_s9   ;;  %p3821_p13 = scmp.ne.s32.totalorder (!%p3135_p9), %s3806_s25, 0 }
  0x6a   : > { %s2049_s16 = sshll.u32 (!%p3135_p9), %s3180_s18, 3  ;;  %s183_s20 = scalar_lea.sflag (!%p3135_p9), [#allocation12], %s3180_s18 }
  0x6b   : > { %s3184_s8 = scalar_lea.vmem (!%p3135_p9), [#allocation11], %s2049_s16 }
  0x6e   : > { %2806 = dma.done.wait (%p3821_p13), %s183_s20, 128  }
  0x6f   : > { %2808 = vsyncadd (%p3821_p13), %s183_s20, 4294967168  ;;  %s191_s30 = sand.u32 1, %s2847_s28   ;;  %p3822_p4 = scmp.ne.s32.totalorder %s3810_s19, 0 }
  0x70   : > { %s2050_s24 = sshll.u32 %s191_s30, 5  ;;  %s192_s22 = scalar_lea.sflag [#allocation15], %s191_s30 }
  0x71   : > { %s3191_s10 = scalar_lea.vmem [#allocation14], %s2050_s24 }
  0x72   : > { %2810 = dma.done.wait (%p3822_p4), %s192_s22, 512  }
  0x73   : > { %2812 = vsyncadd (%p3822_p4), %s192_s22, 4294966784  ;;  %s3197_s12 = scalar_lea.vmem [#allocation16], %s2049_s16  ;;  %p2052_p9 = scmp.ne.s32.totalorder %s2867_s11, 0 }
  0x74   : > { %vm227_vm0 = vcmask (!%p2052_p9), 261120   ;;  %s2890_s25 = smov (!%p2052_p9), [#allocation2]   ;;  %s2891_s21 = smov (!%p2052_p9), [#allocation3]   ;;  %v2892_v0 = vmov (!%p2052_p9), 0.0  }
  0x75   : > { %226 = sbr.rel (%p2052_p9) target bundleno = 219 (0xdb), region = 40  ;;  %s238_s7 = sshll.u32 (!%p2052_p9), %s2890_s25, 4  ;;  %228 = vst.msk [vmem:[#allocation8] sm:$0xff] (!%p2052_p9), %vm227_vm0, %v2892_v0  ;;  %229 = vst.msk [vmem:[#allocation8 + $0x8] sm:$0xff] (!%p2052_p9), %vm227_vm0, %v2892_v0  ;;  %s239_s7 = int_to_ptr.vmem [resolvable:$true] %s238_s7 }
  0x76   : > { %s250_s26 = sshll.u32 (!%p2052_p9), %s2891_s21, 4  ;;  %230 = vst.msk [vmem:[%s3197_s12] sm:$0xff] (!%p2052_p9), %vm227_vm0, %v2892_v0  ;;  %s2601_s23 = scalar_lea.hbm (!%p2052_p9), %s3778_s2, 256  ;;  %s251_s26 = int_to_ptr.vmem [resolvable:$true] %s250_s26 }
  0x77   : > { %p2602_p0 = scmp.ne.s32.totalorder (!%p2052_p9), %s3778_s2, %s2601_s23  ;;  %p2605_p12 = scmp.lt.u32.totalorder (!%p2052_p9), %s2601_s23, %s3778_s2 }
  0x79   : > { %p2607_p8 = pnand (!%p2052_p9), %p2605_p12, %p2602_p0 }
  0x7c   : > { %2610 = shalt.err (!%p2607_p8)  }
  0x7d   : > { %s2611_s24 = scalar_lea.vmem %s239_s7, 256  ;;  %p2616_p2 = scmp.lt.s32.totalorder %s239_s7, %s239_s7 }
  0x7e   : > { %p2612_p6 = scmp.ne.s32.totalorder %s239_s7, %s2611_s24  ;;  %p2617_p10 = scmp.lt.s32.totalorder %s2611_s24, %s2611_s24 }
  0x80   : > { %p2618_p7 = por %p2617_p10, %p2616_p2 }
  0x82   : > { %p2619_p1 = pnand %p2618_p7, %p2612_p6 }
  0x84   : > { %2622 = shalt.err (!%p2619_p1)  }
  0x85   : > { %241 = dma.hbm_to_vmem [thread:$0]  %s3778_s2, 256, %s239_s7, [#allocation10] }
  0x86   : > { %s2623_s19 = scalar_lea.hbm %s3779_s3, 16 }
  0x87   : > { %p2624_p5 = scmp.ne.s32.totalorder %s3779_s3, %s2623_s19  ;;  %p2627_p11 = scmp.lt.u32.totalorder %s2623_s19, %s3779_s3 }
  0x89   : > { %p2629_p3 = pnand %p2627_p11, %p2624_p5 }
  0x8b   : > { %2632 = shalt.err (!%p2629_p3)  }
  0x8c   : > { %s2633_s30 = scalar_lea.vmem %s251_s26, 16  ;;  %p2638_p4 = scmp.lt.s32.totalorder %s251_s26, %s251_s26 }
  0x8d   : > { %p2634_p13 = scmp.ne.s32.totalorder %s251_s26, %s2633_s30  ;;  %p2639_p9 = scmp.lt.s32.totalorder %s2633_s30, %s2633_s30 }
  0x8f   : > { %p2640_p0 = por %p2639_p9, %p2638_p4 }
  0x91   : > { %p2641_p12 = pnand %p2640_p0, %p2634_p13 }
  0x93   : > { %2644 = shalt.err (!%p2641_p12)  }
  0x94   : > { %253 = dma.hbm_to_vmem [thread:$0]  %s3779_s3, 16, %s251_s26, [#allocation10 + $0x1] }
  0x95   : > { %s2893_s22 = smov [#allocation4]   ;;  %s2894_s21 = smov [#allocation5]  }
  0x96   : > { %s262_s25 = sshll.u32 %s2893_s22, 4  ;;  %s274_s17 = sshll.u32 %s2894_s21, 4  ;;  %s263_s25 = int_to_ptr.vmem [resolvable:$true] %s262_s25  ;;  %s275_s17 = int_to_ptr.vmem [resolvable:$true] %s274_s17 }
  0x97   : > { %s2645_s16 = scalar_lea.hbm %s3780_s4, 256 }
  0x98   : > { %p2646_p8 = scmp.ne.s32.totalorder %s3780_s4, %s2645_s16  ;;  %p2649_p6 = scmp.lt.u32.totalorder %s2645_s16, %s3780_s4 }
  0x9a   : > { %p2651_p2 = pnand %p2649_p6, %p2646_p8 }
  0x9c   : > { %2654 = shalt.err (!%p2651_p2)  }
  0x9d   : > { %s2655_s26 = scalar_lea.vmem %s263_s25, 256  ;;  %p2660_p7 = scmp.lt.s32.totalorder %s263_s25, %s263_s25 }
  0x9e   : > { %p2656_p10 = scmp.ne.s32.totalorder %s263_s25, %s2655_s26  ;;  %p2661_p1 = scmp.lt.s32.totalorder %s2655_s26, %s2655_s26 }
  0xa0   : > { %p2662_p5 = por %p2661_p1, %p2660_p7 }
  0xa2   : > { %p2663_p11 = pnand %p2662_p5, %p2656_p10 }
  0xa4   : > { %2666 = shalt.err (!%p2663_p11)  }
  0xa5   : > { %265 = dma.hbm_to_vmem [thread:$0]  %s3780_s4, 256, %s263_s25, [#allocation10 + $0x2] }
  0xa6   : > { %s2667_s19 = scalar_lea.hbm %s3781_s5, 16 }
  0xa7   : > { %p2668_p3 = scmp.ne.s32.totalorder %s3781_s5, %s2667_s19  ;;  %p2671_p13 = scmp.lt.u32.totalorder %s2667_s19, %s3781_s5 }
  0xa9   : > { %p2673_p4 = pnand %p2671_p13, %p2668_p3 }
  0xab   : > { %2676 = shalt.err (!%p2673_p4)  }
  0xac   : > { %s2677_s20 = scalar_lea.vmem %s275_s17, 16  ;;  %p2682_p0 = scmp.lt.s32.totalorder %s275_s17, %s275_s17 }
  0xad   : > { %p2678_p9 = scmp.ne.s32.totalorder %s275_s17, %s2677_s20  ;;  %p2683_p12 = scmp.lt.s32.totalorder %s2677_s20, %s2677_s20 }
  0xaf   : > { %p2684_p8 = por %p2683_p12, %p2682_p0 }
  0xb1   : > { %p2685_p6 = pnand %p2684_p8, %p2678_p9 }
  0xb3   : > { %2688 = shalt.err (!%p2685_p6)  }
  0xb4   : > { %277 = dma.hbm_to_vmem [thread:$0]  %s3781_s5, 16, %s275_s17, [#allocation10 + $0x3] }
  0xb5   : > { %s2895_s26 = smov [#allocation6]   ;;  %s2896_s24 = smov [#allocation7]  }
  0xb6   : > { %s286_s7 = sshll.u32 %s2895_s26, 4  ;;  %s298_s22 = sshll.u32 %s2896_s24, 4  ;;  %s287_s7 = int_to_ptr.vmem [resolvable:$true] %s286_s7  ;;  %s299_s22 = int_to_ptr.vmem [resolvable:$true] %s298_s22 }
  0xb7   : > { %s2689_s0 = scalar_lea.hbm %s3782_s6, 256 }
  0xb8   : > { %p2690_p2 = scmp.ne.s32.totalorder %s3782_s6, %s2689_s0  ;;  %p2693_p10 = scmp.lt.u32.totalorder %s2689_s0, %s3782_s6 }
  0xba   : > { %p2695_p7 = pnand %p2693_p10, %p2690_p2 }
  0xbc   : > { %2698 = shalt.err (!%p2695_p7)  }
  0xbd   : > { %s2699_s17 = scalar_lea.vmem %s287_s7, 256  ;;  %p2704_p5 = scmp.lt.s32.totalorder %s287_s7, %s287_s7 }
  0xbe   : > { %p2700_p1 = scmp.ne.s32.totalorder %s287_s7, %s2699_s17  ;;  %p2705_p11 = scmp.lt.s32.totalorder %s2699_s17, %s2699_s17 }
  0xc0   : > { %p2706_p3 = por %p2705_p11, %p2704_p5 }
  0xc2   : > { %p2707_p13 = pnand %p2706_p3, %p2700_p1 }
  0xc4   : > { %2710 = shalt.err (!%p2707_p13)  }
  0xc5   : > { %289 = dma.hbm_to_vmem [thread:$0]  %s3782_s6, 256, %s287_s7, [#allocation10 + $0x4] }
  0xc6   : > { %s3823_s21 = sld [smem:[#allocation50_spill]] }
  0xcc   : > { %s2711_s19 = scalar_lea.hbm %s3823_s21, 16 }
  0xcd   : > { %p2712_p4 = scmp.ne.s32.totalorder %s3823_s21, %s2711_s19  ;;  %p2715_p9 = scmp.lt.u32.totalorder %s2711_s19, %s3823_s21 }
  0xcf   : > { %p2717_p0 = pnand %p2715_p9, %p2712_p4 }
  0xd1   : > { %2720 = shalt.err (!%p2717_p0)  }
  0xd2   : > { %s2721_s20 = scalar_lea.vmem %s299_s22, 16  ;;  %p2726_p8 = scmp.lt.s32.totalorder %s299_s22, %s299_s22 }
  0xd3   : > { %p2722_p12 = scmp.ne.s32.totalorder %s299_s22, %s2721_s20  ;;  %p2727_p6 = scmp.lt.s32.totalorder %s2721_s20, %s2721_s20 }
  0xd5   : > { %p2728_p2 = por %p2727_p6, %p2726_p8 }
  0xd7   : > { %p2729_p10 = pnand %p2728_p2, %p2722_p12 }
  0xd9   : > { %2732 = shalt.err (!%p2729_p10)  }
  0xda   : > { %301 = dma.hbm_to_vmem [thread:$0]  %s3823_s21, 16, %s299_s22, [#allocation10 + $0x5] }
  0xdb PF: > { %v3274_v1 = vld [vmem:[%s3184_s8] sm:$0xff]  ;;  %p2334_p7 = scmp.eq.s32.totalorder %s2867_s11, 0 }
  0xdd   : > { %2814 = dma.done.wait (%p2334_p7), [#allocation10], 256 }
  0xde   : > { %2816 = vsyncadd (%p2334_p7), [#allocation10], 4294967040 }
  0xdf   : > { %2818 = dma.done.wait (%p2334_p7), [#allocation10 + $0x1], 16 }
  0xe0   : > { %2820 = vsyncadd (%p2334_p7), [#allocation10 + $0x1], 4294967280  ;;  %v2897_v2 = vmov 0.0   ;;  %vm2898_vm1 = vmmov 0   ;;  %v3291_v3 = vld [vmem:[#allocation2] sm:$0xff]  ;;  %v317_v4 = vld [vmem:[#allocation8] sm:$0xff] }
  0xe1   : > { %2168 = vmatprep.subr.bf16.mxu0 %v2897_v2  ;;  %2172 = vmatprep.mubr.msk.bf16.mxu0 %vm2898_vm1, %v2897_v2  ;;  %v2056_v5 = vld [vmem:[#allocation3] ss:$0 sm:$0xff]  ;;  %v3296_v6 = vld [vmem:[#allocation2 + $0x8] sm:$0xff]  ;;  %s2899_s8 = smov 64   ;;  %v319_v7 = vpack.c.bf16 %v317_v4, %v317_v4  ;;  %vm320_vm2 = vcmask 261120   ;;  %s2900_s22 = smov 32  }
  0xe2   : > { %2176 = vmatprep.subr.bf16.mxu1 %v2897_v2  ;;  %2180 = vmatprep.mubr.msk.bf16.mxu1 %vm2898_vm1, %v2897_v2  ;;  %v318_v14 = vld [vmem:[%s3191_s10] sm:$0xff]   ;;  %s2901_s25 = smov 96   ;;  %v2060_v62 = vld [vmem:[%s3191_s10 + $0x8] sm:$0xff]  }
  0xe3   : > { %2169 = vmatpush3.bf16.msra.mxu0 %v3291_v3  ;;  %2177 = vmatpush3.bf16.msra.mxu1 %v3291_v3  ;;  %v364_v15 = vunpack.c.l.bf16 %v318_v14  ;;  %v458_v39 = vunpack.c.h.bf16 %v318_v14  ;;  %v540_v63 = vunpack.c.l.bf16 %v2060_v62 }
  0xe4   : > { %2170 = vmatprep.subr.bf16.mxu0 %v2897_v2  ;;  %377 = vrot.lane.b32.xlu0 %v2056_v5, %s2899_s8 }
  0xe5   : > { %2178 = vmatprep.subr.bf16.mxu1 %v2897_v2 }
  0xe7   : > { %2171 = vmatpush3.bf16.msra.mxu0 %v3296_v6  ;;  %2179 = vmatpush3.bf16.msra.mxu1 %v3296_v6 }
  0xe8   : > { %2184 = vmatprep.subr.bf16.mxu0 %v2897_v2  ;;  %2192 = vmatprep.subr.bf16.mxu1 %v2897_v2 }
  0xea   : > { %2173 = vmatmul.mubr.msk.bf16.vlgmr.msra.gmra.mrb[0].mxu0 %vm320_vm2, %v319_v7 }
  0xeb   : > { %2185 = vmatpush3.bf16.msra.mxu0 %v3291_v3  ;;  %2188 = vmatprep.mubr.msk.bf16.mxu0 %vm2898_vm1, %v2897_v2 }
  0xec   : > { %2186 = vmatprep.subr.bf16.mxu0 %v2897_v2 }
  0xef   : > { %2187 = vmatpush3.bf16.msra.mxu0 %v3296_v6 }
  0xf0   : > { %2200 = vmatprep.subr.bf16.mxu0 %v2897_v2 }
 0x156   : > { %v3311_v8 = vpop.permute.xlu0 %377 }
 0x1bd   : > { %v358_v9 = vpop.f32.mrb[0].mxu0 }
 0x1be   : > { %v380_v10 = vadd.f32 %v3311_v8, %v358_v9  ;;  %v2174_v11 = vpop.f32.mrb[1].mxu0  ;;  %v365_v16 = vadd.f32 %v364_v15, %v358_v9 }
 0x1bf   : > { %v361_v12 = vpop.f32.mrb[2].mxu0 }
 0x1c0   : > { %382 = vrot.lane.b32.xlu0 %v380_v10, %s2899_s8  ;;  %v2175_v13 = vpop.f32.mrb[3].mxu0  ;;  %v2055_v17 = vmul.f32 -1.442695, %v365_v16 }
 0x1c2   : > { %2441 = vpow2.f32 %v2055_v17 }
 0x1c4   : > { %399 = vrot.lane.b32.xlu0 %v317_v4, %s2900_s22 }
 0x1cc   : > { %v2442_v18 = vpop.eup %2441 }
 0x1cd   : > { %v369_v19 = vadd.f32 1.0, %v2442_v18 }
 0x1cf   : > { %2443 = vrcp.f32 %v369_v19 }
 0x1d9   : > { %v2444_v20 = vpop.eup %2443 }
 0x1da   : > { %v392_v27 = vsub.f32 1.0, %v2444_v20 }
 0x232   : > { %v383_v21 = vpop.permute.xlu0 %382 }
 0x233   : > { %v385_v22 = vmul.f32 %v2444_v20, %v383_v21 }
 0x235   : > { %387 = vrot.lane.b32.xlu1 %v385_v22, %s2899_s8 }
 0x236   : > { %v400_v26 = vpop.permute.xlu0 %399 }
 0x237   : > { %v402_v29 = vmul.f32 %v2444_v20, %v400_v26 }
 0x2a7   : > { %v388_v23 = vpop.permute.xlu1 %387 }
 0x2a8   : > { %v390_v24 = vadd.f32 %v388_v23, %v364_v15 }
 0x2aa   : > { %2445 = vtanh.f32 %v390_v24 }
 0x2b4   : > { %v2446_v25 = vpop.eup %2445 }
 0x2b5   : > { %394 = vrot.lane.b32.xlu1 %v2446_v25, %s2901_s25 }
 0x327   : > { %v395_v28 = vpop.permute.xlu1 %394 }
 0x328   : > { %v397_v30 = vmul.f32 %v395_v28, %v392_v27  ;;  %v622_v27 = vunpack.c.h.bf16 %v2060_v62 }
 0x32a   : > { %v3319_v31 = vadd.f32 %v402_v29, %v397_v30 }
 0x32c   : > { %v411_v32 = vpack.c.bf16 %v3319_v31, %v3319_v31 }
 0x32e   : > { %413 = vrot.lane.b32.xlu1 %v411_v32, %s2901_s25 }
 0x3a0   : > { %v414_v33 = vpop.permute.xlu1 %413 }
 0x3a1   : > { %2181 = vmatmul.mubr.msk.bf16.vlgmr.msra.gmra.mrb[0].mxu1 %vm320_vm2, %v414_v33 }
 0x3a2   : > { %2193 = vmatpush3.bf16.msra.mxu1 %v3291_v3  ;;  %2196 = vmatprep.mubr.msk.bf16.mxu1 %vm2898_vm1, %v2897_v2 }
 0x3a3   : > { %2194 = vmatprep.subr.bf16.mxu1 %v2897_v2 }
 0x3a6   : > { %2195 = vmatpush3.bf16.msra.mxu1 %v3296_v6 }
 0x3a7   : > { %2208 = vmatprep.subr.bf16.mxu1 %v2897_v2 }
 0x474   : > { %v452_v34 = vpop.f32.mrb[0].mxu1 }
 0x475   : > { %v466_v35 = vadd.f32 %v452_v34, %v3311_v8  ;;  %v2182_v36 = vpop.f32.mrb[1].mxu1  ;;  %v459_v40 = vadd.f32 %v458_v39, %v452_v34 }
 0x476   : > { %v455_v37 = vpop.f32.mrb[2].mxu1 }
 0x477   : > { %468 = vrot.lane.b32.xlu0 %v466_v35, %s2899_s8  ;;  %v2183_v38 = vpop.f32.mrb[3].mxu1  ;;  %v2059_v41 = vmul.f32 -1.442695, %v459_v40 }
 0x479   : > { %2447 = vpow2.f32 %v2059_v41 }
 0x483   : > { %v2448_v42 = vpop.eup %2447 }
 0x484   : > { %v463_v43 = vadd.f32 1.0, %v2448_v42 }
 0x486   : > { %2449 = vrcp.f32 %v463_v43 }
 0x490   : > { %v2450_v44 = vpop.eup %2449 }
 0x491   : > { %v478_v50 = vsub.f32 1.0, %v2450_v44  ;;  %v484_v52 = vmul.f32 %v2450_v44, %v3319_v31 }
 0x4e9   : > { %v469_v45 = vpop.permute.xlu0 %468 }
 0x4ea   : > { %v471_v46 = vmul.f32 %v2450_v44, %v469_v45 }
 0x4ec   : > { %473 = vrot.lane.b32.xlu1 %v471_v46, %s2899_s8 }
 0x55e   : > { %v474_v47 = vpop.permute.xlu1 %473 }
 0x55f   : > { %v476_v48 = vadd.f32 %v474_v47, %v458_v39 }
 0x561   : > { %2451 = vtanh.f32 %v476_v48 }
 0x56b   : > { %v2452_v49 = vpop.eup %2451 }
 0x56c   : > { %480 = vrot.lane.b32.xlu0 %v2452_v49, %s2901_s25 }
 0x5de   : > { %v481_v51 = vpop.permute.xlu0 %480 }
 0x5df   : > { %v483_v53 = vmul.f32 %v481_v51, %v478_v50  ;;  %v2066_v51 = vld [vmem:[%s3191_s10 + $0x10] sm:$0xff]  }
 0x5e1   : > { %v3336_v54 = vadd.f32 %v484_v52, %v483_v53  ;;  %v704_v52 = vunpack.c.l.bf16 %v2066_v51 }
 0x5e3   : > { %v493_v55 = vpack.c.bf16 %v3336_v54, %v3336_v54 }
 0x5e5   : > { %495 = vrot.lane.b32.xlu1 %v493_v55, %s2901_s25 }
 0x657   : > { %v496_v56 = vpop.permute.xlu1 %495 }
 0x658   : > { %2189 = vmatmul.mubr.msk.bf16.vlgmr.msra.gmra.mrb[4].mxu0 %vm320_vm2, %v496_v56 }
 0x659   : > { %2201 = vmatpush3.bf16.msra.mxu0 %v3291_v3  ;;  %2204 = vmatprep.mubr.msk.bf16.mxu0 %vm2898_vm1, %v2897_v2 }
 0x65a   : > { %2202 = vmatprep.subr.bf16.mxu0 %v2897_v2 }
 0x65d   : > { %2203 = vmatpush3.bf16.msra.mxu0 %v3296_v6 }
 0x65e   : > { %2216 = vmatprep.subr.bf16.mxu0 %v2897_v2 }
 0x72b   : > { %v534_v57 = vpop.f32.mrb[4].mxu0 }
 0x72c   : > { %v548_v58 = vadd.f32 %v534_v57, %v3311_v8  ;;  %v2190_v59 = vpop.f32.mrb[5].mxu0  ;;  %v541_v0 = vadd.f32 %v540_v63, %v534_v57 }
 0x72d   : > { %v537_v60 = vpop.f32.mrb[6].mxu0 }
 0x72e   : > { %550 = vrot.lane.b32.xlu0 %v548_v58, %s2899_s8  ;;  %v2191_v61 = vpop.f32.mrb[7].mxu0  ;;  %v2062_v4 = vmul.f32 -1.442695, %v541_v0 }
 0x730   : > { %2453 = vpow2.f32 %v2062_v4 }
 0x73a   : > { %v2454_v5 = vpop.eup %2453 }
 0x73b   : > { %v545_v7 = vadd.f32 1.0, %v2454_v5 }
 0x73d   : > { %2455 = vrcp.f32 %v545_v7 }
 0x747   : > { %v2456_v9 = vpop.eup %2455 }
 0x748   : > { %v560_v15 = vsub.f32 1.0, %v2456_v9  ;;  %v566_v17 = vmul.f32 %v2456_v9, %v3336_v54 }
 0x7a0   : > { %v551_v10 = vpop.permute.xlu0 %550 }
 0x7a1   : > { %v553_v11 = vmul.f32 %v2456_v9, %v551_v10 }
 0x7a3   : > { %555 = vrot.lane.b32.xlu1 %v553_v11, %s2899_s8 }
 0x815   : > { %v556_v12 = vpop.permute.xlu1 %555 }
 0x816   : > { %v558_v13 = vadd.f32 %v556_v12, %v540_v63 }
 0x818   : > { %2457 = vtanh.f32 %v558_v13 }
 0x822   : > { %v2458_v14 = vpop.eup %2457 }
 0x823   : > { %562 = vrot.lane.b32.xlu0 %v2458_v14, %s2901_s25 }
 0x895   : > { %v563_v16 = vpop.permute.xlu0 %562 }
 0x896   : > { %v565_v18 = vmul.f32 %v563_v16, %v560_v15 }
 0x898   : > { %v3354_v19 = vadd.f32 %v566_v17, %v565_v18  ;;  %v786_v17 = vunpack.c.h.bf16 %v2066_v51 }
 0x89a   : > { %v575_v20 = vpack.c.bf16 %v3354_v19, %v3354_v19 }
 0x89c   : > { %577 = vrot.lane.b32.xlu1 %v575_v20, %s2901_s25 }
 0x90e   : > { %v578_v21 = vpop.permute.xlu1 %577 }
 0x90f   : > { %2197 = vmatmul.mubr.msk.bf16.vlgmr.msra.gmra.mrb[4].mxu1 %vm320_vm2, %v578_v21 }
 0x910   : > { %2209 = vmatpush3.bf16.msra.mxu1 %v3291_v3  ;;  %2212 = vmatprep.mubr.msk.bf16.mxu1 %vm2898_vm1, %v2897_v2 }
 0x911   : > { %2210 = vmatprep.subr.bf16.mxu1 %v2897_v2 }
 0x914   : > { %2211 = vmatpush3.bf16.msra.mxu1 %v3296_v6 }
 0x915   : > { %2224 = vmatprep.subr.bf16.mxu1 %v2897_v2 }
 0x9e2   : > { %v616_v22 = vpop.f32.mrb[4].mxu1 }
 0x9e3   : > { %v630_v23 = vadd.f32 %v616_v22, %v3311_v8  ;;  %v2198_v24 = vpop.f32.mrb[5].mxu1  ;;  %v623_v28 = vadd.f32 %v622_v27, %v616_v22 }
 0x9e4   : > { %v619_v25 = vpop.f32.mrb[6].mxu1 }
 0x9e5   : > { %632 = vrot.lane.b32.xlu0 %v630_v23, %s2899_s8  ;;  %v2199_v26 = vpop.f32.mrb[7].mxu1  ;;  %v2065_v29 = vmul.f32 -1.442695, %v623_v28 }
 0x9e7   : > { %2459 = vpow2.f32 %v2065_v29 }
 0x9f1   : > { %v2460_v30 = vpop.eup %2459 }
 0x9f2   : > { %v627_v32 = vadd.f32 1.0, %v2460_v30 }
 0x9f4   : > { %2461 = vrcp.f32 %v627_v32 }
 0x9fe   : > { %v2462_v33 = vpop.eup %2461 }
 0x9ff   : > { %v642_v39 = vsub.f32 1.0, %v2462_v33  ;;  %v648_v41 = vmul.f32 %v2462_v33, %v3354_v19 }
 0xa57   : > { %v633_v34 = vpop.permute.xlu0 %632 }
 0xa58   : > { %v635_v35 = vmul.f32 %v2462_v33, %v633_v34 }
 0xa5a   : > { %637 = vrot.lane.b32.xlu1 %v635_v35, %s2899_s8 }
 0xacc   : > { %v638_v36 = vpop.permute.xlu1 %637 }
 0xacd   : > { %v640_v37 = vadd.f32 %v638_v36, %v622_v27 }
 0xacf   : > { %2463 = vtanh.f32 %v640_v37 }
 0xad9   : > { %v2464_v38 = vpop.eup %2463 }
 0xada   : > { %644 = vrot.lane.b32.xlu0 %v2464_v38, %s2901_s25 }
 0xb4c   : > { %v645_v40 = vpop.permute.xlu0 %644 }
 0xb4d   : > { %v647_v42 = vmul.f32 %v645_v40, %v642_v39  ;;  %v2072_v40 = vld [vmem:[%s3191_s10 + $0x18] sm:$0xff]  }
 0xb4f   : > { %v3371_v43 = vadd.f32 %v648_v41, %v647_v42  ;;  %v868_v41 = vunpack.c.l.bf16 %v2072_v40 }
 0xb51   : > { %v657_v44 = vpack.c.bf16 %v3371_v43, %v3371_v43 }
 0xb53   : > { %659 = vrot.lane.b32.xlu1 %v657_v44, %s2901_s25 }
 0xbc5   : > { %v660_v45 = vpop.permute.xlu1 %659 }
 0xbc6   : > { %2205 = vmatmul.mubr.msk.bf16.vlgmr.msra.gmra.mrb[8].mxu0 %vm320_vm2, %v660_v45 }
 0xbc7   : > { %2217 = vmatpush3.bf16.msra.mxu0 %v3291_v3  ;;  %2220 = vmatprep.mubr.msk.bf16.mxu0 %vm2898_vm1, %v2897_v2 }
 0xbc8   : > { %2218 = vmatprep.subr.bf16.mxu0 %v2897_v2 }
 0xbcb   : > { %2219 = vmatpush3.bf16.msra.mxu0 %v3296_v6 }
 0xc99   : > { %v698_v46 = vpop.f32.mrb[8].mxu0 }
 0xc9a   : > { %v712_v47 = vadd.f32 %v698_v46, %v3311_v8  ;;  %v2206_v48 = vpop.f32.mrb[9].mxu0  ;;  %v705_v53 = vadd.f32 %v704_v52, %v698_v46 }
 0xc9b   : > { %v701_v49 = vpop.f32.mrb[10].mxu0 }
 0xc9c   : > { %714 = vrot.lane.b32.xlu0 %v712_v47, %s2899_s8  ;;  %v2207_v50 = vpop.f32.mrb[11].mxu0  ;;  %v2068_v55 = vmul.f32 -1.442695, %v705_v53 }
 0xc9e   : > { %2465 = vpow2.f32 %v2068_v55 }
 0xca8   : > { %v2466_v56 = vpop.eup %2465 }
 0xca9   : > { %v709_v57 = vadd.f32 1.0, %v2466_v56 }
 0xcab   : > { %2467 = vrcp.f32 %v709_v57 }
 0xcb5   : > { %v2468_v58 = vpop.eup %2467 }
 0xcb6   : > { %v724_v0 = vsub.f32 1.0, %v2468_v58  ;;  %v730_v5 = vmul.f32 %v2468_v58, %v3371_v43 }
 0xd0e   : > { %v715_v59 = vpop.permute.xlu0 %714 }
 0xd0f   : > { %v717_v60 = vmul.f32 %v2468_v58, %v715_v59 }
 0xd11   : > { %719 = vrot.lane.b32.xlu1 %v717_v60, %s2899_s8 }
 0xd83   : > { %v720_v61 = vpop.permute.xlu1 %719 }
 0xd84   : > { %v722_v62 = vadd.f32 %v720_v61, %v704_v52 }
 0xd86   : > { %2469 = vtanh.f32 %v722_v62 }
 0xd90   : > { %v2470_v63 = vpop.eup %2469 }
 0xd91   : > { %726 = vrot.lane.b32.xlu0 %v2470_v63, %s2901_s25 }
 0xe03   : > { %v727_v4 = vpop.permute.xlu0 %726 }
 0xe04   : > { %v729_v7 = vmul.f32 %v727_v4, %v724_v0 }
 0xe06   : > { %v3388_v9 = vadd.f32 %v730_v5, %v729_v7  ;;  %v950_v5 = vunpack.c.h.bf16 %v2072_v40 }
 0xe08   : > { %v739_v10 = vpack.c.bf16 %v3388_v9, %v3388_v9 }
 0xe0a   : > { %741 = vrot.lane.b32.xlu1 %v739_v10, %s2901_s25 }
 0xe7c   : > { %v742_v11 = vpop.permute.xlu1 %741 }
 0xe7d   : > { %2213 = vmatmul.mubr.msk.bf16.vlgmr.msra.gmra.mrb[8].mxu1 %vm320_vm2, %v742_v11 }
 0xe7e   : > { %2225 = vmatpush3.bf16.msra.mxu1 %v3291_v3  ;;  %2228 = vmatprep.mubr.msk.bf16.mxu1 %vm2898_vm1, %v2897_v2 }
 0xe7f   : > { %2226 = vmatprep.subr.bf16.mxu1 %v2897_v2 }
 0xe82   : > { %2227 = vmatpush3.bf16.msra.mxu1 %v3296_v6 }
 0xf50   : > { %v780_v12 = vpop.f32.mrb[8].mxu1 }
 0xf51   : > { %v794_v13 = vadd.f32 %v780_v12, %v3311_v8  ;;  %v2214_v14 = vpop.f32.mrb[9].mxu1  ;;  %v787_v18 = vadd.f32 %v786_v17, %v780_v12 }
 0xf52   : > { %v783_v15 = vpop.f32.mrb[10].mxu1 }
 0xf53   : > { %796 = vrot.lane.b32.xlu0 %v794_v13, %s2899_s8  ;;  %v2215_v16 = vpop.f32.mrb[11].mxu1  ;;  %v2071_v20 = vmul.f32 -1.442695, %v787_v18 }
 0xf55   : > { %2471 = vpow2.f32 %v2071_v20 }
 0xf5f   : > { %v2472_v3 = vpop.eup %2471 }
 0xf60   : > { %v791_v21 = vadd.f32 1.0, %v2472_v3 }
 0xf62   : > { %2473 = vrcp.f32 %v791_v21 }
 0xf6c   : > { %v2474_v22 = vpop.eup %2473 }
 0xf6d   : > { %v806_v27 = vsub.f32 1.0, %v2474_v22  ;;  %v812_v29 = vmul.f32 %v2474_v22, %v3388_v9 }
 0xfc5   : > { %v797_v23 = vpop.permute.xlu0 %796 }
 0xfc6   : > { %v799_v24 = vmul.f32 %v2474_v22, %v797_v23 }
 0xfc8   : > { %801 = vrot.lane.b32.xlu1 %v799_v24, %s2899_s8 }
0x103a   : > { %v802_v6 = vpop.permute.xlu1 %801 }
0x103b   : > { %v804_v25 = vadd.f32 %v802_v6, %v786_v17 }
0x103d   : > { %2475 = vtanh.f32 %v804_v25 }
0x1047   : > { %v2476_v26 = vpop.eup %2475 }
0x1048   : > { %808 = vrot.lane.b32.xlu0 %v2476_v26, %s2901_s25 }
0x10ba   : > { %v809_v28 = vpop.permute.xlu0 %808 }
0x10bb   : > { %v811_v30 = vmul.f32 %v809_v28, %v806_v27 }
0x10bd   : > { %v3404_v32 = vadd.f32 %v812_v29, %v811_v30 }
0x10bf   : > { %v821_v33 = vpack.c.bf16 %v3404_v32, %v3404_v32 }
0x10c1   : > { %823 = vrot.lane.b32.xlu1 %v821_v33, %s2901_s25 }
0x1133   : > { %v824_v34 = vpop.permute.xlu1 %823 }
0x1134   : > { %2221 = vmatmul.mubr.msk.bf16.vlgmr.msra.gmra.mrb[12].mxu0 %vm320_vm2, %v824_v34 }
0x1207   : > { %v862_v35 = vpop.f32.mrb[12].mxu0 }
0x1208   : > { %v876_v36 = vadd.f32 %v862_v35, %v3311_v8  ;;  %v2222_v37 = vpop.f32.mrb[13].mxu0  ;;  %v869_v42 = vadd.f32 %v868_v41, %v862_v35 }
0x1209   : > { %v865_v38 = vpop.f32.mrb[14].mxu0 }
0x120a   : > { %878 = vrot.lane.b32.xlu0 %v876_v36, %s2899_s8  ;;  %v2223_v39 = vpop.f32.mrb[15].mxu0  ;;  %v2074_v44 = vmul.f32 -1.442695, %v869_v42 }
0x120c   : > { %2477 = vpow2.f32 %v2074_v44 }
0x1216   : > { %v2478_v45 = vpop.eup %2477 }
0x1217   : > { %v873_v46 = vadd.f32 1.0, %v2478_v45 }
0x1219   : > { %2479 = vrcp.f32 %v873_v46 }
0x1223   : > { %v2480_v47 = vpop.eup %2479 }
0x1224   : > { %v888_v53 = vsub.f32 1.0, %v2480_v47  ;;  %v894_v56 = vmul.f32 %v2480_v47, %v3404_v32 }
0x127c   : > { %v879_v48 = vpop.permute.xlu0 %878 }
0x127d   : > { %v881_v49 = vmul.f32 %v2480_v47, %v879_v48 }
0x127f   : > { %883 = vrot.lane.b32.xlu1 %v881_v49, %s2899_s8 }
0x12f1   : > { %v884_v50 = vpop.permute.xlu1 %883 }
0x12f2   : > { %v886_v51 = vadd.f32 %v884_v50, %v868_v41 }
0x12f4   : > { %2481 = vtanh.f32 %v886_v51 }
0x12fe   : > { %v2482_v52 = vpop.eup %2481 }
0x12ff   : > { %890 = vrot.lane.b32.xlu0 %v2482_v52, %s2901_s25 }
0x1371   : > { %v891_v55 = vpop.permute.xlu0 %890 }
0x1372   : > { %v893_v57 = vmul.f32 %v891_v55, %v888_v53 }
0x1374   : > { %v895_v58 = vadd.f32 %v894_v56, %v893_v57 }
0x1376   : > { %v903_v59 = vpack.c.bf16 %v895_v58, %v895_v58 }
0x1378   : > { %905 = vrot.lane.b32.xlu1 %v903_v59, %s2901_s25 }
0x13ea   : > { %v906_v60 = vpop.permute.xlu1 %905 }
0x13eb   : > { %2229 = vmatmul.mubr.msk.bf16.vlgmr.msra.gmra.mrb[12].mxu1 %vm320_vm2, %v906_v60 }
0x14be   : > { %v944_v61 = vpop.f32.mrb[12].mxu1 }
0x14bf   : > { %v958_v62 = vadd.f32 %v944_v61, %v3311_v8  ;;  %v2230_v63 = vpop.f32.mrb[13].mxu1  ;;  %v951_v7 = vadd.f32 %v950_v5, %v944_v61 }
0x14c0   : > { %v947_v0 = vpop.f32.mrb[14].mxu1 }
0x14c1   : > { %960 = vrot.lane.b32.xlu0 %v958_v62, %s2899_s8  ;;  %v2231_v4 = vpop.f32.mrb[15].mxu1  ;;  %v2077_v10 = vmul.f32 -1.442695, %v951_v7 }
0x14c3   : > { %2483 = vpow2.f32 %v2077_v10 }
0x14cd   : > { %v2484_v11 = vpop.eup %2483 }
0x14ce   : > { %v955_v12 = vadd.f32 1.0, %v2484_v11 }
0x14d0   : > { %2485 = vrcp.f32 %v955_v12 }
0x14da   : > { %v2486_v13 = vpop.eup %2485 }
0x14db   : > { %v976_v21 = vmul.f32 %v2486_v13, %v895_v58 }
0x1533   : > { %v961_v14 = vpop.permute.xlu0 %960 }
0x1534   : > { %v963_v15 = vmul.f32 %v2486_v13, %v961_v14 }
0x1536   : > { %965 = vrot.lane.b32.xlu1 %v963_v15, %s2899_s8 }
0x153a   : > { %405 = vrot.lane.b32.xlu1 %v3319_v31, %s2901_s25 }
0x153e   : > { %569 = vrot.lane.b32.xlu1 %v3354_v19, %s2901_s25  ;;  %v970_v19 = vsub.f32 1.0, %v2486_v13 }
0x1542   : > { %733 = vrot.lane.b32.xlu1 %v3388_v9, %s2901_s25 }
0x1546   : > { %897 = vrot.lane.b32.xlu1 %v895_v58, %s2901_s25 }
0x15a8   : > { %v966_v8 = vpop.permute.xlu1 %965 }
0x15a9   : > { %v968_v16 = vadd.f32 %v966_v8, %v950_v5 }
0x15ab   : > { %2487 = vtanh.f32 %v968_v16 }
0x15ac   : > { %v406_v17 = vpop.permute.xlu1 %405 }
0x15ad   : > { %408 = vst.msk [vmem:[#allocation9] sm:$0xff] %vm320_vm2, %v406_v17 }
0x15b0   : > { %v570_v18 = vpop.permute.xlu1 %569 }
0x15b1   : > { %572 = vst.msk [vmem:[#allocation9 + $0x10] sm:$0xff] %vm320_vm2, %v570_v18 }
0x15b4   : > { %v734_v20 = vpop.permute.xlu1 %733 }
0x15b5   : > { %v2488_v3 = vpop.eup %2487  ;;  %736 = vst.msk [vmem:[#allocation9 + $0x20] sm:$0xff] %vm320_vm2, %v734_v20 }
0x15b6   : > { %972 = vrot.lane.b32.xlu0 %v2488_v3, %s2901_s25 }
0x15b8   : > { %v898_v31 = vpop.permute.xlu1 %897 }
0x15b9   : > { %900 = vst.msk [vmem:[#allocation9 + $0x30] sm:$0xff] %vm320_vm2, %v898_v31 }
0x15ba   : > { %487 = vrot.lane.b32.xlu0 %v3336_v54, %s2901_s25 }
0x15be   : > { %651 = vrot.lane.b32.xlu0 %v3371_v43, %s2901_s25 }
0x15c2   : > { %815 = vrot.lane.b32.xlu0 %v3404_v32, %s2901_s25 }
0x1628   : > { %v973_v9 = vpop.permute.xlu0 %972 }
0x1629   : > { %v975_v22 = vmul.f32 %v973_v9, %v970_v19 }
0x162b   : > { %v977_v23 = vadd.f32 %v976_v21, %v975_v22 }
0x162c   : > { %v488_v24 = vpop.permute.xlu0 %487 }
0x162d   : > { %490 = vst.msk [vmem:[#allocation9 + $0x8] sm:$0xff] %vm320_vm2, %v488_v24  ;;  %979 = vrot.lane.b32.xlu0 %v977_v23, %s2901_s25 }
0x1630   : > { %v652_v6 = vpop.permute.xlu0 %651 }
0x1631   : > { %654 = vst.msk [vmem:[#allocation9 + $0x18] sm:$0xff] %vm320_vm2, %v652_v6 }
0x1634   : > { %v816_v54 = vpop.permute.xlu0 %815 }
0x1635   : > { %818 = vst.msk [vmem:[#allocation9 + $0x28] sm:$0xff] %vm320_vm2, %v816_v54 }
0x169f   : > { %v980_v43 = vpop.permute.xlu0 %979 }
0x16a0   : > { %982 = vst.msk [vmem:[#allocation9 + $0x38] sm:$0xff] %vm320_vm2, %v980_v43  ;;  %983 = vst.msk [vmem:[#allocation8] sm:$0xff] %vm320_vm2, %v980_v43 }
0x16a1   : > { %2822 = dma.done.wait (%p2334_p7), [#allocation10 + $0x2], 256 }
0x16a2   : > { %2824 = vsyncadd (%p2334_p7), [#allocation10 + $0x2], 4294967040 }
0x16a3   : > { %2826 = dma.done.wait (%p2334_p7), [#allocation10 + $0x3], 16 }
0x16a4   : > { %2828 = vsyncadd (%p2334_p7), [#allocation10 + $0x3], 4294967280 }
0x16a5   : > { %2830 = dma.done.wait (%p2334_p7), [#allocation10 + $0x4], 256 }
0x16a6   : > { %2832 = vsyncadd (%p2334_p7), [#allocation10 + $0x4], 4294967040 }
0x16a7   : > { %2834 = dma.done.wait (%p2334_p7), [#allocation10 + $0x5], 16 }
0x16a8   : > { %2836 = vsyncadd (%p2334_p7), [#allocation10 + $0x5], 4294967280  ;;  %2244 = vmatprep.subr.bf16.mxu1 %v2897_v2  ;;  %2248 = vmatprep.mubr.msk.bf16.mxu1 %vm2898_vm1, %v2897_v2  ;;  %v1002_v25 = vld [vmem:[#allocation4] sm:$0xff]  ;;  %v3464_v26 = vld [vmem:[#allocation6] sm:$0xff]  ;;  %s3604_s10 = sshll.u32 %s2867_s11, 3  ;;  %p2102_p1 = scmp.ne.s32.totalorder %s2867_s11, 1 }
0x16a9   : > { %v1003_v27 = vld [vmem:[#allocation4 + $0x8] sm:$0xff]  ;;  %2232 = vmatprep.subr.bf16.mxu0 %v1002_v25  ;;  %2245 = vmatpush3.bf16.msra.mxu1 %v3464_v26  ;;  %v3467_v28 = vld [vmem:[#allocation6 + $0x8] sm:$0xff]  ;;  %v2086_v36 = vld [vmem:[#allocation7] ss:$0 sm:$0xff]  ;;  %s1189_s30 = sadd.s32 1, %s3604_s10  ;;  %s1282_s26 = sadd.s32 2, %s3604_s10 }
0x16aa   : > { %v1008_v29 = vld [vmem:[#allocation9] sm:$0xff]  ;;  %v1009_v30 = vld [vmem:[#allocation9 + $0x8] sm:$0xff]  ;;  %2233 = vmatpush3.bf16.msra.mxu0 %v1002_v25  ;;  %2246 = vmatprep.subr.bf16.mxu1 %v2897_v2  ;;  %v1104_v33 = vld [vmem:[#allocation8 + $0x8] sm:$0xff]  ;;  %s1375_s24 = sadd.s32 3, %s3604_s10  ;;  %s1468_s19 = sadd.s32 4, %s3604_s10 }
0x16ab   : > { %v1016_v32 = vpack.c.bf16 %v1009_v30, %v1008_v29  ;;  %v1010_v34 = vld [vmem:[#allocation9 + $0x10] sm:$0xff]  ;;  %v1011_v35 = vld [vmem:[#allocation9 + $0x18] sm:$0xff]  ;;  %2234 = vmatprep.subr.bf16.mxu0 %v1003_v27  ;;  %v1105_v37 = vpack.c.bf16 %v1104_v33, %v1104_v33  ;;  %1161 = vrot.lane.b32.xlu0 %v2086_v36, %s2899_s8  ;;  %v1012_v24 = vld [vmem:[#allocation9 + $0x20] sm:$0xff]  ;;  %s1561_s1 = sadd.s32 5, %s3604_s10  ;;  %s1654_s16 = sadd.s32 6, %s3604_s10 }
0x16ac   : > { %v1017_v38 = vpack.c.bf16 %v1011_v35, %v1010_v34  ;;  %v3496_v50 = vld [vmem:[#allocation5] ss:$0 sm:$0xff]  ;;  %v1013_v6 = vld [vmem:[#allocation9 + $0x28] sm:$0xff]  ;;  %v1014_v54 = vld [vmem:[#allocation9 + $0x30] sm:$0xff]  ;;  %s1747_s0 = sadd.s32 7, %s3604_s10  ;;  %s1840_s23 = sadd.s32 8, %s3604_s10 }
0x16ad   : > { %2236 = vmatprep.mubr.msk.bf16.mxu0 %vm320_vm2, %v1016_v32  ;;  %2247 = vmatpush3.bf16.msra.mxu1 %v3467_v28  ;;  %v1018_v43 = vpack.c.bf16 %v1013_v6, %v1012_v24  ;;  %v1015_v25 = vld [vmem:[#allocation9 + $0x38] sm:$0xff] }
0x16ae   : > { %2235 = vmatpush3.bf16.msra.mxu0 %v1003_v27  ;;  %2252 = vmatprep.subr.bf16.mxu1 %v2897_v2  ;;  %v1019_v27 = vpack.c.bf16 %v1015_v25, %v1014_v54 }
0x16af   : > { %2260 = vmatprep.subr.bf16.mxu0 %v2897_v2 }
0x16b0   : > { %2249 = vmatmul.mubr.msk.bf16.vlgmr.msra.gmra.mrb[16].mxu1 %vm320_vm2, %v1105_v37 }
0x16b1   : > { %2237 = vmatmul.mubr.msk.bf16.vlgmr.msra.gmra.mrb[16].mxu0 %vm320_vm2, %v1017_v38  ;;  %2253 = vmatpush3.bf16.msra.mxu1 %v3464_v26 }
0x16b2   : > { %2254 = vmatprep.subr.bf16.mxu1 %v2897_v2  ;;  %2256 = vmatprep.mubr.msk.bf16.mxu1 %vm2898_vm1, %v2897_v2 }
0x16b3   : > { %2261 = vmatpush3.bf16.msra.mxu0 %v3464_v26  ;;  %2240 = vmatprep.mubr.msk.bf16.mxu0 %vm320_vm2, %v1018_v43 }
0x16b4   : > { %2262 = vmatprep.subr.bf16.mxu0 %v2897_v2 }
0x16b5   : > { %2255 = vmatpush3.bf16.msra.mxu1 %v3467_v28 }
0x16b6   : > { %2268 = vmatprep.subr.bf16.mxu1 %v2897_v2 }
0x16b7   : > { %2263 = vmatpush3.bf16.msra.mxu0 %v3467_v28 }
0x16b8   : > { %2276 = vmatprep.subr.bf16.mxu0 %v2897_v2 }
0x16b9   : > { %2241 = vmatmul.mubr.msk.bf16.gmra.mrb[20].mxu0 %vm320_vm2, %v1019_v27 }
0x16ba   : > { %2264 = vmatprep.mubr.msk.bf16.mxu0 %vm2898_vm1, %v2897_v2 }
0x171d   : > { %v3487_v39 = vpop.permute.xlu0 %1161 }
0x1783   : > { %v1143_v40 = vpop.f32.mrb[16].mxu1 }
0x1784   : > { %v3489_v41 = vpop.f32.mrb[16].mxu0  ;;  %v2250_v42 = vpop.f32.mrb[17].mxu1  ;;  %v1164_v44 = vadd.f32 %v3487_v39, %v1143_v40 }
0x1785   : > { %v1072_v45 = vpop.f32.mrb[17].mxu0  ;;  %v1146_v46 = vpop.f32.mrb[18].mxu1 }
0x1786   : > { %1166 = vrot.lane.b32.xlu0 %v1164_v44, %s2899_s8  ;;  %v2251_v47 = vpop.f32.mrb[19].mxu1  ;;  %v3493_v48 = vpop.f32.mrb[18].mxu0  ;;  %v1073_v51 = vadd.f32 %v3496_v50, %v1072_v45 }
0x1787   : > { %v1075_v49 = vpop.f32.mrb[19].mxu0 }
0x1788   : > { %v1149_v52 = vadd.f32 %v1143_v40, %v1073_v51  ;;  %v1076_v17 = vadd.f32 %v3496_v50, %v1075_v49 }
0x178a   : > { %1183 = vrot.lane.b32.xlu0 %v1104_v33, %s2900_s22  ;;  %v2085_v53 = vmul.f32 -1.442695, %v1149_v52  ;;  %v1081_v52 = vadd.f32 %v3489_v41, %v3496_v50 }
0x178c   : > { %2491 = vpow2.f32 %v2085_v53  ;;  %v3528_v37 = vpop.f32.mrb[20].mxu0 }
0x178d   : > { %v3530_v38 = vpop.f32.mrb[21].mxu0 }
0x178e   : > { %v3532_v40 = vpop.f32.mrb[22].mxu0 }
0x178f   : > { %v3534_v42 = vpop.f32.mrb[23].mxu0 }
0x1796   : > { %v2492_v55 = vpop.eup %2491 }
0x1797   : > { %v1153_v56 = vadd.f32 1.0, %v2492_v55 }
0x1799   : > { %2493 = vrcp.f32 %v1153_v56 }
0x17a3   : > { %v2494_v57 = vpop.eup %2493 }
0x17a4   : > { %v1176_v0 = vsub.f32 1.0, %v2494_v57 }
0x17f8   : > { %v1167_v58 = vpop.permute.xlu0 %1166 }
0x17f9   : > { %v1169_v59 = vmul.f32 %v2494_v57, %v1167_v58 }
0x17fb   : > { %1171 = vrot.lane.b32.xlu1 %v1169_v59, %s2899_s8 }
0x17fc   : > { %v1184_v63 = vpop.permute.xlu0 %1183 }
0x17fd   : > { %v1186_v5 = vmul.f32 %v2494_v57, %v1184_v63 }
0x186d   : > { %v1172_v60 = vpop.permute.xlu1 %1171 }
0x186e   : > { %v1174_v61 = vadd.f32 %v1172_v60, %v1073_v51 }
0x1870   : > { %2495 = vtanh.f32 %v1174_v61 }
0x187a   : > { %v2496_v62 = vpop.eup %2495 }
0x187b   : > { %1178 = vrot.lane.b32.xlu1 %v2496_v62, %s2901_s25 }
0x18ed   : > { %v1179_v4 = vpop.permute.xlu1 %1178 }
0x18ee   : > { %v1181_v7 = vmul.f32 %v1179_v4, %v1176_v0 }
0x18f0   : > { %v3501_v10 = vadd.f32 %v1186_v5, %v1181_v7 }
0x18f2   : > { %v1208_v11 = vpack.c.bf16 %v3501_v10, %v3501_v10 }
0x18f4   : > { %1210 = vrot.lane.b32.xlu1 %v1208_v11, %s2901_s25 }
0x1966   : > { %v1211_v12 = vpop.permute.xlu1 %1210 }
0x1967   : > { %2257 = vmatmul.mubr.msk.bf16.vlgmr.msra.gmra.mrb[20].mxu1 %vm320_vm2, %v1211_v12 }
0x1968   : > { %2269 = vmatpush3.bf16.msra.mxu1 %v3464_v26  ;;  %2272 = vmatprep.mubr.msk.bf16.mxu1 %vm2898_vm1, %v2897_v2 }
0x1969   : > { %2270 = vmatprep.subr.bf16.mxu1 %v2897_v2 }
0x196c   : > { %2271 = vmatpush3.bf16.msra.mxu1 %v3467_v28 }
0x196d   : > { %2284 = vmatprep.subr.bf16.mxu1 %v2897_v2 }
0x1a3a   : > { %v1249_v13 = vpop.f32.mrb[20].mxu1 }
0x1a3b   : > { %v2258_v14 = vpop.f32.mrb[21].mxu1  ;;  %v1262_v15 = vadd.f32 %v1249_v13, %v3487_v39  ;;  %v1255_v18 = vadd.f32 %v1249_v13, %v1076_v17 }
0x1a3c   : > { %v1252_v8 = vpop.f32.mrb[22].mxu1 }
0x1a3d   : > { %1264 = vrot.lane.b32.xlu0 %v1262_v15, %s2899_s8  ;;  %v2259_v16 = vpop.f32.mrb[23].mxu1  ;;  %v2089_v20 = vmul.f32 -1.442695, %v1255_v18 }
0x1a3f   : > { %2497 = vpow2.f32 %v2089_v20 }
0x1a49   : > { %v2498_v3 = vpop.eup %2497 }
0x1a4a   : > { %v1259_v31 = vadd.f32 1.0, %v2498_v3 }
0x1a4c   : > { %2499 = vrcp.f32 %v1259_v31 }
0x1a56   : > { %v2500_v19 = vpop.eup %2499 }
0x1a57   : > { %v1274_v30 = vsub.f32 1.0, %v2500_v19  ;;  %v1280_v33 = vmul.f32 %v2500_v19, %v3501_v10 }
0x1aaf   : > { %v1265_v9 = vpop.permute.xlu0 %1264 }
0x1ab0   : > { %v1267_v21 = vmul.f32 %v2500_v19, %v1265_v9 }
0x1ab2   : > { %1269 = vrot.lane.b32.xlu1 %v1267_v21, %s2899_s8 }
0x1b24   : > { %v1270_v22 = vpop.permute.xlu1 %1269 }
0x1b25   : > { %v1272_v23 = vadd.f32 %v1270_v22, %v1076_v17  ;;  %v1084_v17 = vadd.f32 %v3493_v48, %v3496_v50 }
0x1b27   : > { %2501 = vtanh.f32 %v1272_v23 }
0x1b31   : > { %v2502_v29 = vpop.eup %2501 }
0x1b32   : > { %1276 = vrot.lane.b32.xlu0 %v2502_v29, %s2901_s25 }
0x1ba4   : > { %v1277_v32 = vpop.permute.xlu0 %1276 }
0x1ba5   : > { %v1279_v34 = vmul.f32 %v1277_v32, %v1274_v30 }
0x1ba7   : > { %v3523_v35 = vadd.f32 %v1280_v33, %v1279_v34 }
0x1ba9   : > { %v1301_v36 = vpack.c.bf16 %v3523_v35, %v3523_v35 }
0x1bab   : > { %1303 = vrot.lane.b32.xlu1 %v1301_v36, %s2901_s25 }
0x1c1d   : > { %v1304_v44 = vpop.permute.xlu1 %1303 }
0x1c1e   : > { %2265 = vmatmul.mubr.msk.bf16.vlgmr.msra.gmra.mrb[24].mxu0 %vm320_vm2, %v1304_v44  ;;  %v1089_v44 = vadd.f32 %v3496_v50, %v3530_v38 }
0x1c1f   : > { %2277 = vmatpush3.bf16.msra.mxu0 %v3464_v26  ;;  %2280 = vmatprep.mubr.msk.bf16.mxu0 %vm2898_vm1, %v2897_v2 }
0x1c20   : > { %2278 = vmatprep.subr.bf16.mxu0 %v2897_v2 }
0x1c23   : > { %2279 = vmatpush3.bf16.msra.mxu0 %v3467_v28 }
0x1c24   : > { %2292 = vmatprep.subr.bf16.mxu0 %v2897_v2 }
0x1cf1   : > { %v1342_v45 = vpop.f32.mrb[24].mxu0 }
0x1cf2   : > { %v2266_v46 = vpop.f32.mrb[25].mxu0  ;;  %v1355_v47 = vadd.f32 %v1342_v45, %v3487_v39  ;;  %v1348_v53 = vadd.f32 %v1342_v45, %v1081_v52 }
0x1cf3   : > { %v1345_v49 = vpop.f32.mrb[26].mxu0 }
0x1cf4   : > { %1357 = vrot.lane.b32.xlu0 %v1355_v47, %s2899_s8  ;;  %v2267_v51 = vpop.f32.mrb[27].mxu0  ;;  %v2091_v55 = vmul.f32 -1.442695, %v1348_v53 }
0x1cf6   : > { %2503 = vpow2.f32 %v2091_v55 }
0x1d00   : > { %v2504_v56 = vpop.eup %2503 }
0x1d01   : > { %v1352_v57 = vadd.f32 1.0, %v2504_v56 }
0x1d03   : > { %2505 = vrcp.f32 %v1352_v57 }
0x1d0d   : > { %v2506_v58 = vpop.eup %2505 }
0x1d0e   : > { %v1367_v0 = vsub.f32 1.0, %v2506_v58  ;;  %v1373_v41 = vmul.f32 %v2506_v58, %v3523_v35 }
0x1d66   : > { %v1358_v59 = vpop.permute.xlu0 %1357 }
0x1d67   : > { %v1360_v60 = vmul.f32 %v2506_v58, %v1358_v59 }
0x1d69   : > { %1362 = vrot.lane.b32.xlu1 %v1360_v60, %s2899_s8 }
0x1ddb   : > { %v1363_v61 = vpop.permute.xlu1 %1362 }
0x1ddc   : > { %v1365_v62 = vadd.f32 %v1363_v61, %v1081_v52 }
0x1dde   : > { %2507 = vtanh.f32 %v1365_v62 }
0x1de8   : > { %v2508_v63 = vpop.eup %2507 }
0x1de9   : > { %1369 = vrot.lane.b32.xlu0 %v2508_v63, %s2901_s25 }
0x1e5b   : > { %v1370_v4 = vpop.permute.xlu0 %1369 }
0x1e5c   : > { %v1372_v5 = vmul.f32 %v1370_v4, %v1367_v0 }
0x1e5e   : > { %v3550_v7 = vadd.f32 %v1373_v41, %v1372_v5 }
0x1e60   : > { %v1394_v11 = vpack.c.bf16 %v3550_v7, %v3550_v7 }
0x1e62   : > { %1396 = vrot.lane.b32.xlu1 %v1394_v11, %s2901_s25 }
0x1ed4   : > { %v1397_v12 = vpop.permute.xlu1 %1396 }
0x1ed5   : > { %2273 = vmatmul.mubr.msk.bf16.vlgmr.msra.gmra.mrb[24].mxu1 %vm320_vm2, %v1397_v12  ;;  %v1092_v12 = vadd.f32 %v3496_v50, %v3534_v42 }
0x1ed6   : > { %2285 = vmatpush3.bf16.msra.mxu1 %v3464_v26  ;;  %2288 = vmatprep.mubr.msk.bf16.mxu1 %vm2898_vm1, %v2897_v2 }
0x1ed7   : > { %2286 = vmatprep.subr.bf16.mxu1 %v2897_v2 }
0x1eda   : > { %2287 = vmatpush3.bf16.msra.mxu1 %v3467_v28 }
0x1edb   : > { %2300 = vmatprep.subr.bf16.mxu1 %v2897_v2 }
0x1fa8   : > { %v1435_v13 = vpop.f32.mrb[24].mxu1 }
0x1fa9   : > { %v2274_v14 = vpop.f32.mrb[25].mxu1  ;;  %v1448_v15 = vadd.f32 %v1435_v13, %v3487_v39  ;;  %v1441_v18 = vadd.f32 %v1435_v13, %v1084_v17 }
0x1faa   : > { %v1438_v8 = vpop.f32.mrb[26].mxu1 }
0x1fab   : > { %1450 = vrot.lane.b32.xlu0 %v1448_v15, %s2899_s8  ;;  %v2275_v16 = vpop.f32.mrb[27].mxu1  ;;  %v2093_v20 = vmul.f32 -1.442695, %v1441_v18 }
0x1fad   : > { %2509 = vpow2.f32 %v2093_v20 }
0x1fb7   : > { %v2510_v3 = vpop.eup %2509 }
0x1fb8   : > { %v1445_v31 = vadd.f32 1.0, %v2510_v3 }
0x1fba   : > { %2511 = vrcp.f32 %v1445_v31  ;;  %v1192_v31 = vld [vmem:[%s3197_s12] sm:$0xff] }
0x1fc4   : > { %v2512_v19 = vpop.eup %2511 }
0x1fc5   : > { %v1460_v6 = vsub.f32 1.0, %v2512_v19  ;;  %v1466_v48 = vmul.f32 %v2512_v19, %v3550_v7 }
0x201d   : > { %v1451_v9 = vpop.permute.xlu0 %1450 }
0x201e   : > { %v1453_v21 = vmul.f32 %v2512_v19, %v1451_v9 }
0x2020   : > { %1455 = vrot.lane.b32.xlu1 %v1453_v21, %s2899_s8 }
0x2092   : > { %v1456_v22 = vpop.permute.xlu1 %1455 }
0x2093   : > { %v1458_v23 = vadd.f32 %v1456_v22, %v1084_v17 }
0x2095   : > { %2513 = vtanh.f32 %v1458_v23 }
0x209f   : > { %v2514_v24 = vpop.eup %2513 }
0x20a0   : > { %1462 = vrot.lane.b32.xlu0 %v2514_v24, %s2901_s25  ;;  %v1283_v24 = vstv %s1282_s26 }
0x20a1   : > { %vm1284_vm5 = vcmp.eq.s32.totalorder %v3274_v1, %v1283_v24 }
0x2112   : > { %v1463_v54 = vpop.permute.xlu0 %1462 }
0x2113   : > { %v1465_v43 = vmul.f32 %v1463_v54, %v1460_v6 }
0x2115   : > { %v3569_v25 = vadd.f32 %v1466_v48, %v1465_v43 }
0x2117   : > { %v1487_v27 = vpack.c.bf16 %v3569_v25, %v3569_v25 }
0x2119   : > { %1489 = vrot.lane.b32.xlu1 %v1487_v27, %s2901_s25 }
0x218b   : > { %v1490_v29 = vpop.permute.xlu1 %1489 }
0x218c   : > { %2281 = vmatmul.mubr.msk.bf16.vlgmr.msra.gmra.mrb[28].mxu0 %vm320_vm2, %v1490_v29 }
0x218d   : > { %2293 = vmatpush3.bf16.msra.mxu0 %v3464_v26  ;;  %2296 = vmatprep.mubr.msk.bf16.mxu0 %vm2898_vm1, %v2897_v2 }
0x218e   : > { %2294 = vmatprep.subr.bf16.mxu0 %v2897_v2 }
0x2191   : > { %2295 = vmatpush3.bf16.msra.mxu0 %v3467_v28 }
0x225f   : > { %v1528_v30 = vpop.f32.mrb[28].mxu0 }
0x2260   : > { %v2282_v32 = vpop.f32.mrb[29].mxu0  ;;  %v1541_v33 = vadd.f32 %v1528_v30, %v3487_v39  ;;  %v1534_v45 = vadd.f32 %v1528_v30, %v1089_v44 }
0x2261   : > { %v1531_v34 = vpop.f32.mrb[30].mxu0 }
0x2262   : > { %1543 = vrot.lane.b32.xlu0 %v1541_v33, %s2899_s8  ;;  %v2283_v36 = vpop.f32.mrb[31].mxu0  ;;  %v2095_v46 = vmul.f32 -1.442695, %v1534_v45 }
0x2264   : > { %2515 = vpow2.f32 %v2095_v46 }
0x226e   : > { %v2516_v47 = vpop.eup %2515 }
0x226f   : > { %v1538_v49 = vadd.f32 1.0, %v2516_v47 }
0x2271   : > { %2517 = vrcp.f32 %v1538_v49 }
0x227b   : > { %v2518_v51 = vpop.eup %2517 }
0x227c   : > { %v1553_v58 = vsub.f32 1.0, %v2518_v51  ;;  %v1559_v38 = vmul.f32 %v2518_v51, %v3569_v25 }
0x22d4   : > { %v1544_v52 = vpop.permute.xlu0 %1543 }
0x22d5   : > { %v1546_v53 = vmul.f32 %v2518_v51, %v1544_v52 }
0x22d7   : > { %1548 = vrot.lane.b32.xlu1 %v1546_v53, %s2899_s8 }
0x2349   : > { %v1549_v55 = vpop.permute.xlu1 %1548 }
0x234a   : > { %v1551_v56 = vadd.f32 %v1549_v55, %v1089_v44 }
0x234c   : > { %2519 = vtanh.f32 %v1551_v56 }
0x2356   : > { %v2520_v57 = vpop.eup %2519 }
0x2357   : > { %1555 = vrot.lane.b32.xlu0 %v2520_v57, %s2901_s25 }
0x23c9   : > { %v1556_v59 = vpop.permute.xlu0 %1555 }
0x23ca   : > { %v1558_v60 = vmul.f32 %v1556_v59, %v1553_v58 }
0x23cc   : > { %v3587_v61 = vadd.f32 %v1559_v38, %v1558_v60  ;;  %v1469_v38 = vstv %s1468_s19 }
0x23cd   : > { %vm1470_vm9 = vcmp.eq.s32.totalorder %v3274_v1, %v1469_v38 }
0x23ce   : > { %v1580_v62 = vpack.c.bf16 %v3587_v61, %v3587_v61 }
0x23d0   : > { %1582 = vrot.lane.b32.xlu1 %v1580_v62, %s2901_s25 }
0x2442   : > { %v1583_v63 = vpop.permute.xlu1 %1582 }
0x2443   : > { %2289 = vmatmul.mubr.msk.bf16.vlgmr.msra.gmra.mrb[28].mxu1 %vm320_vm2, %v1583_v63 }
0x2444   : > { %2301 = vmatpush3.bf16.msra.mxu1 %v3464_v26  ;;  %2304 = vmatprep.mubr.msk.bf16.mxu1 %vm2898_vm1, %v2897_v2 }
0x2445   : > { %2302 = vmatprep.subr.bf16.mxu1 %v2897_v2  ;;  %v2902_v2 = vmov 0  }
0x2446   : > { %2489 = vset.pattern.permute.xlu1 %v2902_v2  ;;  %2490 = vset.pattern.permute.xlu0 %v2902_v2  ;;  %v1286_v27 = vsel %vm1284_vm5, 1, %v2902_v2 }
0x2448   : > { %2303 = vmatpush3.bf16.msra.mxu1 %v3467_v28  ;;  %v1190_v28 = vstv %s1189_s30 }
0x2449   : > { %vm1191_vm3 = vcmp.eq.s32.totalorder %v3274_v1, %v1190_v28 }
0x244a   : > { %v1193_v17 = vsel %vm1191_vm3, 1, %v2902_v2 }
0x2516   : > { %v1621_v0 = vpop.f32.mrb[28].mxu1 }
0x2517   : > { %v2290_v4 = vpop.f32.mrb[29].mxu1  ;;  %v1634_v41 = vadd.f32 %v1621_v0, %v3487_v39  ;;  %v1627_v26 = vadd.f32 %v1621_v0, %v1092_v12 }
0x2518   : > { %v1624_v5 = vpop.f32.mrb[30].mxu1 }
0x2519   : > { %1636 = vrot.lane.b32.xlu0 %v1634_v41, %s2899_s8  ;;  %v2291_v11 = vpop.f32.mrb[31].mxu1  ;;  %v2097_v13 = vmul.f32 -1.442695, %v1627_v26 }
0x251b   : > { %2521 = vpow2.f32 %v2097_v13  ;;  %v1562_v13 = vstv %s1561_s1 }
0x251c   : > { %vm1563_vm11 = vcmp.eq.s32.totalorder %v3274_v1, %v1562_v13 }
0x251d   : > { %v1565_v28 = vsel %vm1563_vm11, 1, %v2902_v2 }
0x2525   : > { %v2522_v14 = vpop.eup %2521 }
0x2526   : > { %v1631_v15 = vadd.f32 1.0, %v2522_v14 }
0x2528   : > { %2523 = vrcp.f32 %v1631_v15 }
0x2532   : > { %v2524_v8 = vpop.eup %2523 }
0x2533   : > { %v1646_v19 = vsub.f32 1.0, %v2524_v8  ;;  %v1652_v22 = vmul.f32 %v2524_v8, %v3587_v61 }
0x258b   : > { %v1637_v42 = vpop.permute.xlu0 %1636 }
0x258c   : > { %v1639_v16 = vmul.f32 %v2524_v8, %v1637_v42 }
0x258e   : > { %1641 = vrot.lane.b32.xlu1 %v1639_v16, %s2899_s8 }
0x2592   : > { %1195 = vperm.xlu1 %2489, %v1193_v17  }
0x2600   : > { %v1642_v18 = vpop.permute.xlu1 %1641 }
0x2601   : > { %v1644_v20 = vadd.f32 %v1642_v18, %v1092_v12 }
0x2603   : > { %2525 = vtanh.f32 %v1644_v20 }
0x260d   : > { %v2526_v3 = vpop.eup %2525 }
0x260e   : > { %1648 = vrot.lane.b32.xlu0 %v2526_v3, %s2901_s25 }
0x2611   : > { %v1196_v9 = vpop.permute.xlu1 %1195 }
0x2612   : > { %1199 = vrot.lane.b32.xlu0 %v1192_v31, %s2900_s22  ;;  %vm1197_vm4 = vcmp.eq.s32.totalorder %v1196_v9, 1 }
0x2680   : > { %v1649_v21 = vpop.permute.xlu0 %1648 }
0x2681   : > { %v1651_v23 = vmul.f32 %v1649_v21, %v1646_v19 }
0x2683   : > { %v3616_v6 = vadd.f32 %v1652_v22, %v1651_v23 }
0x2684   : > { %v1200_v54 = vpop.permute.xlu0 %1199 }
0x2685   : > { %v1202_v48 = vsel %vm1197_vm4, %v3501_v10, %v1200_v54  ;;  %v1673_v43 = vpack.c.bf16 %v3616_v6, %v3616_v6  ;;  %v1376_v10 = vstv %s1375_s24 }
0x2686   : > { %1204 = vrot.lane.b32.xlu0 %v1202_v48, %s2901_s25  ;;  %vm1377_vm6 = vcmp.eq.s32.totalorder %v3274_v1, %v1376_v10 }
0x2687   : > { %1675 = vrot.lane.b32.xlu1 %v1673_v43, %s2901_s25  ;;  %v1379_v33 = vsel %vm1377_vm6, 1, %v2902_v2 }
0x268b   : > { %1288 = vperm.xlu1 %2489, %v1286_v27  }
0x26f8   : > { %v1205_v29 = vpop.permute.xlu0 %1204 }
0x26f9   : > { %1207 = vst.msk [vmem:[%s3197_s12] sm:$0xff] %vm320_vm2, %v1205_v29  ;;  %v1676_v30 = vpop.permute.xlu1 %1675 }
0x26fa   : > { %2297 = vmatmul.mubr.msk.bf16.vlgmr.msra.gmra.mrb[32].mxu0 %vm320_vm2, %v1676_v30 }
0x2700   : > { %v1285_v32 = vld [vmem:[%s3197_s12] sm:$0xff] }
0x2701   : > { %1292 = vrot.lane.b32.xlu0 %v1285_v32, %s2900_s22 }
0x2705   : > { %1381 = vperm.xlu0 %2490, %v1379_v33  }
0x270a   : > { %v1289_v34 = vpop.permute.xlu1 %1288 }
0x270b   : > { %vm1290_vm7 = vcmp.eq.s32.totalorder %v1289_v34, 1 }
0x2773   : > { %v1293_v36 = vpop.permute.xlu0 %1292 }
0x2774   : > { %v1295_v44 = vsel %vm1290_vm7, %v3523_v35, %v1293_v36  ;;  %v1097_v35 = vadd.f32 %v3528_v37, %v3496_v50  ;;  %v1472_v37 = vsel %vm1470_vm9, 1, %v2902_v2 }
0x2775   : > { %1297 = vrot.lane.b32.xlu1 %v1295_v44, %s2901_s25  ;;  %v1748_v44 = vstv %s1747_s0 }
0x2776   : > { %vm1749_vm15 = vcmp.eq.s32.totalorder %v3274_v1, %v1748_v44 }
0x2784   : > { %v1382_v59 = vpop.permute.xlu0 %1381 }
0x2785   : > { %vm1383_vm8 = vcmp.eq.s32.totalorder %v1382_v59, 1 }
0x27cd   : > { %v1714_v45 = vpop.f32.mrb[32].mxu0 }
0x27ce   : > { %v2298_v46 = vpop.f32.mrb[33].mxu0  ;;  %v1727_v53 = vadd.f32 %v1714_v45, %v3487_v39  ;;  %v1720_v55 = vadd.f32 %v1714_v45, %v1097_v35 }
0x27cf   : > { %v1717_v47 = vpop.f32.mrb[34].mxu0  ;;  %v1841_v46 = vstv %s1840_s23 }
0x27d0   : > { %v2299_v49 = vpop.f32.mrb[35].mxu0  ;;  %v2099_v56 = vmul.f32 -1.442695, %v1720_v55  ;;  %vm1842_vm0 = vcmp.eq.s32.totalorder %v3274_v1, %v1841_v46 }
0x27d2   : > { %2527 = vpow2.f32 %v2099_v56 }
0x27dc   : > { %v2528_v57 = vpop.eup %2527 }
0x27dd   : > { %v1724_v58 = vadd.f32 1.0, %v2528_v57 }
0x27df   : > { %2529 = vrcp.f32 %v1724_v58 }
0x27e7   : > { %v1298_v51 = vpop.permute.xlu1 %1297 }
0x27e8   : > { %1300 = vst.msk [vmem:[%s3197_s12] sm:$0xff] %vm320_vm2, %v1298_v51  ;;  %v1844_v51 = vsel %vm1842_vm0, 1, %v2902_v2 }
0x27e9   : > { %v2530_v63 = vpop.eup %2529 }
0x27ea   : > { %v1739_v8 = vsub.f32 1.0, %v2530_v63  ;;  %v1745_v16 = vmul.f32 %v2530_v63, %v3616_v6 }
0x27ef   : > { %v1378_v52 = vld [vmem:[%s3197_s12] sm:$0xff] }
0x27f0   : > { %1385 = vrot.lane.b32.xlu1 %v1378_v52, %s2900_s22 }
0x27f4   : > { %1729 = vrot.lane.b32.xlu1 %v1727_v53, %s2899_s8 }
0x2862   : > { %v1386_v60 = vpop.permute.xlu1 %1385 }
0x2863   : > { %v1388_v62 = vsel %vm1383_vm8, %v3550_v7, %v1386_v60 }
0x2864   : > { %1390 = vrot.lane.b32.xlu0 %v1388_v62, %s2901_s25 }
0x2866   : > { %v1730_v0 = vpop.permute.xlu1 %1729 }
0x2867   : > { %v1732_v4 = vmul.f32 %v2530_v63, %v1730_v0 }
0x2868   : > { %1474 = vperm.xlu0 %2490, %v1472_v37  }
0x2869   : > { %1734 = vrot.lane.b32.xlu1 %v1732_v4, %s2899_s8 }
0x28d6   : > { %v1391_v41 = vpop.permute.xlu0 %1390 }
0x28d7   : > { %1393 = vst.msk [vmem:[%s3197_s12] sm:$0xff] %vm320_vm2, %v1391_v41 }
0x28db   : > { %v1735_v5 = vpop.permute.xlu1 %1734 }
0x28dc   : > { %v1737_v11 = vadd.f32 %v1735_v5, %v1097_v35 }
0x28de   : > { %2531 = vtanh.f32 %v1737_v11  ;;  %v1471_v12 = vld [vmem:[%s3197_s12] sm:$0xff] }
0x28df   : > { %1478 = vrot.lane.b32.xlu1 %v1471_v12, %s2900_s22 }
0x28e7   : > { %v1475_v26 = vpop.permute.xlu0 %1474 }
0x28e8   : > { %v2532_v7 = vpop.eup %2531  ;;  %vm1476_vm10 = vcmp.eq.s32.totalorder %v1475_v26, 1 }
0x28e9   : > { %1741 = vrot.lane.b32.xlu0 %v2532_v7, %s2901_s25 }
0x2951   : > { %v1479_v14 = vpop.permute.xlu1 %1478 }
0x2952   : > { %v1481_v15 = vsel %vm1476_vm10, %v3569_v25, %v1479_v14  ;;  %v1655_v25 = vstv %s1654_s16 }
0x2953   : > { %1483 = vrot.lane.b32.xlu1 %v1481_v15, %s2901_s25  ;;  %vm1656_vm12 = vcmp.eq.s32.totalorder %v3274_v1, %v1655_v25 }
0x2954   : > { %v1658_v19 = vsel %vm1656_vm12, 1, %v2902_v2 }
0x2957   : > { %1567 = vperm.xlu1 %2489, %v1565_v28  }
0x295b   : > { %v1742_v42 = vpop.permute.xlu0 %1741 }
0x295c   : > { %v1744_v17 = vmul.f32 %v1742_v42, %v1739_v8 }
0x295e   : > { %v3660_v18 = vadd.f32 %v1745_v16, %v1744_v17 }
0x2960   : > { %v1766_v20 = vpack.c.bf16 %v3660_v18, %v3660_v18 }
0x2962   : > { %1768 = vrot.lane.b32.xlu0 %v1766_v20, %s2901_s25 }
0x29c5   : > { %v1484_v3 = vpop.permute.xlu1 %1483 }
0x29c6   : > { %1486 = vst.msk [vmem:[%s3197_s12] sm:$0xff] %vm320_vm2, %v1484_v3 }
0x29cd   : > { %v1564_v31 = vld [vmem:[%s3197_s12] sm:$0xff] }
0x29ce   : > { %1571 = vrot.lane.b32.xlu0 %v1564_v31, %s2900_s22 }
0x29d2   : > { %1660 = vperm.xlu0 %2490, %v1658_v19  }
0x29d4   : > { %v1769_v9 = vpop.permute.xlu0 %1768 }
0x29d5   : > { %2305 = vmatmul.mubr.msk.bf16.vlgmr.msra.gmra.mrb[32].mxu1 %vm320_vm2, %v1769_v9 }
0x29d6   : > { %v1568_v21 = vpop.permute.xlu1 %1567 }
0x29d7   : > { %vm1569_vm13 = vcmp.eq.s32.totalorder %v1568_v21, 1 }
0x2a40   : > { %v1572_v22 = vpop.permute.xlu0 %1571 }
0x2a41   : > { %v1574_v23 = vsel %vm1569_vm13, %v3587_v61, %v1572_v22  ;;  %v1100_v61 = vadd.f32 %v3532_v40, %v3496_v50  ;;  %v1751_v50 = vsel %vm1749_vm15, 1, %v2902_v2 }
0x2a42   : > { %1576 = vrot.lane.b32.xlu1 %v1574_v23, %s2901_s25 }
0x2a51   : > { %v1661_v36 = vpop.permute.xlu0 %1660 }
0x2a52   : > { %vm1662_vm14 = vcmp.eq.s32.totalorder %v1661_v36, 1 }
0x2aa8   : > { %v1807_v24 = vpop.f32.mrb[32].mxu1 }
0x2aa9   : > { %v2306_v54 = vpop.f32.mrb[33].mxu1  ;;  %v1820_v30 = vadd.f32 %v1807_v24, %v3487_v39  ;;  %v1813_v32 = vadd.f32 %v1807_v24, %v1100_v61 }
0x2aaa   : > { %v1810_v48 = vpop.f32.mrb[34].mxu1 }
0x2aab   : > { %v2307_v43 = vpop.f32.mrb[35].mxu1  ;;  %v2101_v10 = vmul.f32 -1.442695, %v1813_v32 }
0x2aad   : > { %2533 = vpow2.f32 %v2101_v10 }
0x2ab4   : > { %v1577_v27 = vpop.permute.xlu1 %1576 }
0x2ab5   : > { %1579 = vst.msk [vmem:[%s3197_s12] sm:$0xff] %vm320_vm2, %v1577_v27 }
0x2ab7   : > { %v2534_v33 = vpop.eup %2533 }
0x2ab8   : > { %v1817_v34 = vadd.f32 1.0, %v2534_v33 }
0x2aba   : > { %2535 = vrcp.f32 %v1817_v34 }
0x2abc   : > { %v1657_v29 = vld [vmem:[%s3197_s12] sm:$0xff] }
0x2abd   : > { %1664 = vrot.lane.b32.xlu1 %v1657_v29, %s2900_s22 }
0x2ac1   : > { %1822 = vrot.lane.b32.xlu1 %v1820_v30, %s2899_s8 }
0x2ac4   : > { %v2536_v47 = vpop.eup %2535 }
0x2ac5   : > { %v1832_v59 = vsub.f32 1.0, %v2536_v47  ;;  %v1838_v62 = vmul.f32 %v2536_v47, %v3660_v18 }
0x2b2f   : > { %v1665_v45 = vpop.permute.xlu1 %1664 }
0x2b30   : > { %v1667_v39 = vsel %vm1662_vm14, %v3616_v6, %v1665_v45 }
0x2b31   : > { %1669 = vrot.lane.b32.xlu0 %v1667_v39, %s2901_s25 }
0x2b33   : > { %v1823_v40 = vpop.permute.xlu1 %1822 }
0x2b34   : > { %v1825_v49 = vmul.f32 %v2536_v47, %v1823_v40 }
0x2b35   : > { %1753 = vperm.xlu0 %2490, %v1751_v50  }
0x2b39   : > { %1827 = vrot.lane.b32.xlu0 %v1825_v49, %s2899_s8 }
0x2b3d   : > { %1846 = vperm.xlu0 %2490, %v1844_v51  }
0x2ba3   : > { %v1670_v52 = vpop.permute.xlu0 %1669 }
0x2ba4   : > { %1672 = vst.msk [vmem:[%s3197_s12] sm:$0xff] %vm320_vm2, %v1670_v52 }
0x2bab   : > { %v1750_v6 = vld [vmem:[%s3197_s12] sm:$0xff] }
0x2bac   : > { %1757 = vrot.lane.b32.xlu1 %v1750_v6, %s2900_s22 }
0x2bb4   : > { %v1754_v53 = vpop.permute.xlu0 %1753 }
0x2bb5   : > { %vm1755_vm1 = vcmp.eq.s32.totalorder %v1754_v53, 1 }
0x2bb8   : > { %v1828_v35 = vpop.permute.xlu0 %1827 }
0x2bb9   : > { %v1830_v55 = vadd.f32 %v1828_v35, %v1100_v61 }
0x2bbb   : > { %2537 = vtanh.f32 %v1830_v55 }
0x2bbc   : > { %v1847_v63 = vpop.permute.xlu0 %1846 }
0x2bbd   : > { %vm1848_vm3 = vcmp.eq.s32.totalorder %v1847_v63, 1 }
0x2bc5   : > { %v2538_v2 = vpop.eup %2537 }
0x2c1e   : > { %v1758_v56 = vpop.permute.xlu1 %1757 }
0x2c1f   : > { %v1760_v1 = vsel %vm1755_vm1, %v3660_v18, %v1758_v56 }
0x2c20   : > { %1762 = vrot.lane.b32.xlu1 %v1760_v1, %s2901_s25 }
0x2c24   : > { %1834 = vrot.lane.b32.xlu1 %v2538_v2, %s2901_s25 }
0x2c92   : > { %v1763_v57 = vpop.permute.xlu1 %1762 }
0x2c93   : > { %1765 = vst.msk [vmem:[%s3197_s12] sm:$0xff] %vm320_vm2, %v1763_v57 }
0x2c96   : > { %v1835_v58 = vpop.permute.xlu1 %1834 }
0x2c97   : > { %v1837_v38 = vmul.f32 %v1835_v58, %v1832_v59 }
0x2c99   : > { %v1839_v37 = vadd.f32 %v1838_v62, %v1837_v38 }
0x2c9a   : > { %v1843_v60 = vld [vmem:[%s3197_s12] sm:$0xff] }
0x2c9b   : > { %1850 = vrot.lane.b32.xlu0 %v1843_v60, %s2900_s22 }
0x2c9f   : > { %1860 = vrot.lane.b32.xlu0 %v1839_v37, %s2901_s25 }
0x2d0d   : > { %v1851_v0 = vpop.permute.xlu0 %1850 }
0x2d0e   : > { %v1853_v4 = vsel %vm1848_vm3, %v1839_v37, %v1851_v0 }
0x2d0f   : > { %1855 = vrot.lane.b32.xlu1 %v1853_v4, %s2901_s25 }
0x2d11   : > { %v1861_v41 = vpop.permute.xlu0 %1860 }
0x2d12   : > { %1863 = vst.msk [vmem:[#allocation8 + $0x8] sm:$0xff] %vm320_vm2, %v1861_v41 }
0x2d7c   : > { %1867 = sbr.rel (%p2102_p1) target bundleno = 11819 (0x2e2b), region = 76 }
0x2d81   : > { %v1856_v5 = vpop.permute.xlu1 %1855 }
0x2d82   : > { %1858 = vst.msk [vmem:[%s3197_s12] sm:$0xff] %vm320_vm2, %v1856_v5 }
0x2d89   : > { %v1868_v11 = vld [vmem:[%s3197_s12] sm:$0xff] }
0x2d8a   : > { %v1869_v12 = vmul.f32 %v1868_v11, %v1868_v11 }
0x2d8c   : > { %v1870_v7 = vsel %vm320_vm2, %v1869_v12, 0.0 }
0x2d8d   : > { %1871 = vadd.xlane.f32.xlu0 %v1870_v7 }
0x2e1a   : > { %v1872_v26 = vpop.xlane.xlu0 %1871 }
0x2e1b   : > { %v1873_v13 = vmax.f32 %v1872_v26, 1e-30 }
0x2e1d   : > { %2539 = vrsqrt.f32 %v1873_v13 }
0x2e27   : > { %v2540_v14 = vpop.eup %2539 }
0x2e28   : > { %v1875_v15 = vmul.f32 %v2540_v14, %v1868_v11 }
0x2e2a   : > { %1876 = vst.msk [vmem:[%s3197_s12] sm:$0xff] %vm320_vm2, %v1875_v15 }
0x2e2b PF: > { %s3824_s20 = sld [smem:[#allocation42_spill]]  ;;  %s3825_s8 = sld [smem:[#allocation51_spill]] }
0x2e2c   : > { %s1891_s25 = sshll.u32 %s3197_s12, 4  ;;  %s1878_s10 = scalar_lea.sflag [#allocation13], %s3180_s18  ;;  %s1892_s25 = int_to_ptr.vmem [resolvable:$true] %s1891_s25 }
0x2e2d   : > { %s2733_s30 = scalar_lea.vmem %s1892_s25, 128  ;;  %p3826_p11 = scmp.ne.s32.totalorder %s3811_s27, 0 }
0x2e2e   : > { %p2734_p5 = scmp.ne.s32.totalorder %s1892_s25, %s2733_s30  ;;  %s2903_s26 = smov [#allocation16]  }
0x2e2f   : > { %s2737_s24 = sshll.u32 %s2903_s26, 4  ;;  %s2738_s24 = int_to_ptr.vmem [resolvable:$false] %s2737_s24 }
0x2e30   : > { %p2735_p3 = pnand %p2734_p5, %p3826_p11  ;;  %s2739_s19 = scalar_lea.vmem %s2738_s24, 256 }
0x2e31   : > { %s2104_s11 = sshll.u32 %s3824_s20, 7  ;;  %p2740_p4 = scmp.lt.s32.totalorder %s1892_s25, %s2738_s24 }
0x2e32   : > { %s3718_s22 = scalar_lea.hbm %s3825_s8, %s2104_s11  ;;  %p2736_p13 = pneg %p2735_p3 }
0x2e33   : > { %p2741_p9 = scmp.lt.s32.totalorder %s2739_s19, %s2733_s30 }
0x2e35   : > { %p2742_p0 = por %p2741_p9, %p2740_p4 }
0x2e37   : > { %p2743_p12 = pnand %p2742_p0, %p2736_p13 }
0x2e39   : > { %2746 = shalt.err (!%p2743_p12)
}
0x2e3a   : > { %s2747_s18 = scalar_lea.hbm %s3718_s22, 128  ;;  %s2751_s16 = scalar_lea.hbm %s3825_s8, 256 }
0x2e3b   : > { %p2748_p8 = scmp.ne.s32.totalorder %s3718_s22, %s2747_s18  ;;  %p2752_p10 = scmp.lt.u32.totalorder %s3718_s22, %s3825_s8 }
0x2e3c   : > { %p2753_p7 = scmp.lt.u32.totalorder %s2751_s16, %s2747_s18  ;;  %p2755_p5 = scmp.lt.u32.totalorder %s2747_s18, %s3718_s22 }
0x2e3d   : > { %p2749_p6 = pnand %p2748_p8, %p3826_p11 }
0x2e3e   : > { %p2754_p1 = por %p2753_p7, %p2752_p10 }
0x2e3f   : > { %p2750_p2 = pneg %p2749_p6 }
0x2e40   : > { %p2756_p3 = por %p2755_p5, %p2754_p1 }
0x2e42   : > { %p2757_p13 = pnand %p2756_p3, %p2750_p2 }
0x2e44   : > { %2760 = shalt.err (!%p2757_p13)
}
0x2e45   : > { %2320 = dma.vmem_to_hbm [thread:$0]  (%p3826_p11), %s1892_s25, 128, %s3718_s22, %s1878_s10  }
0x2e46 PF: > { %s3827_s20 = sld [smem:[#allocation40_spill]]  ;;  %s3828_s11 = sld [smem:[#allocation47_spill]] }
0x2e47   : > { %p2336_p4 = scmp.ge.s32.totalorder %s2883_s15, 2 }
0x2e4c   : > { %s1903_s7 = sand.u32 1, %s3827_s20   ;;  %p3829_p9 = scmp.ne.s32.totalorder %s3828_s11, 0 }
0x2e4d   : > { %s1904_s17 = scalar_lea.sflag [#allocation13], %s1903_s7 }
0x2e4e   : > { %p2330_p0 = pnand %p2336_p4, %p3829_p9 }
0x2e50   : > { %2838 = dma.done.wait (!%p2330_p0), %s1904_s17, 128  }
0x2e51   : > { %2840 = vsyncadd (!%p2330_p0), %s1904_s17, 4294967168  ;;  %s27_s15 = sadd.s32 1, %s2883_s15   ;;  %s3830_s30 = sld [smem:[#allocation46_spill]] }
0x2e52   : > { %p24_p12 = scmp.ge.s32.totalorder %s27_s15, 6   ;;  %s3831_s26 = sld [smem:[#allocation41_spill]] }
0x2e53   : > { %s3832_s10 = sld [smem:[#allocation45_spill]]  ;;  %s3833_s22 = sld [smem:[#allocation43_spill]] }
0x2e54   : > { %s3834_s25 = sld [smem:[#allocation44_spill]]  ;;  %s3835_s27 = smov %s2847_s28 }
0x2e55   : > { %s3836_s28 = smov %s2851_s29  ;;  %s3840_s11 = smov %s2875_s13 }
0x2e56   : > { %s3841_s12 = smov %s2879_s14  ;;  %26 = sbr.rel (!%p24_p12) target bundleno = 16 (0x10), region = 149 }
0x2e57   : > { %s3837_s29 = smov %s3830_s30  ;;  %s3838_s30 = smov %s2859_s9 }
0x2e58   : > { %s3839_s9 = smov %s3831_s26 }
0x2e59   : > { %s3842_s13 = smov %s3833_s22 }
0x2e5a   : > { %s3843_s14 = smov %s3834_s25 }
0x2e5d   :  { %1909 = vsyncpa [#allocation12], 1 }
0x2e5e   :  { %1911 = vsyncpa [#allocation12 + $0x1], 1 }
0x2e5f   :  { %1912 = vsyncpa [#allocation15], 1 }
0x2e60   :  { %1914 = vsyncpa [#allocation15 + $0x1], 1 }
0x2e61   :  { %1915 = vsyncpa [#allocation13], 1 }
0x2e62   :  { %1917 = vsyncpa [#allocation13 + $0x1], 1 }
0x2e63   :  { %1918 = vsyncmov [#allocation10] }
0x2e66   :  { %s1919_s24 = vpop.sfrf %1918 }
0x2e67   :  { %p2107_p11 = scmp.ne.s32.totalorder %s1919_s24, 0 }
0x2e69   :  { %1923 = shalt.err (%p2107_p11)  }
0x2e6a   :  { %1925 = vsyncmov [#allocation10 + $0x1] }
0x2e6d   :  { %s1926_s19 = vpop.sfrf %1925 }
0x2e6e   :  { %p2108_p8 = scmp.ne.s32.totalorder %s1926_s19, 0 }
0x2e70   :  { %1930 = shalt.err (%p2108_p8)  }
0x2e71   :  { %1932 = vsyncmov [#allocation10 + $0x2] }
0x2e74   :  { %s1933_s18 = vpop.sfrf %1932 }
0x2e75   :  { %p2109_p6 = scmp.ne.s32.totalorder %s1933_s18, 0 }
0x2e77   :  { %1937 = shalt.err (%p2109_p6)  }
0x2e78   :  { %1939 = vsyncmov [#allocation10 + $0x3] }
0x2e7b   :  { %s1940_s15 = vpop.sfrf %1939 }
0x2e7c   :  { %p2110_p2 = scmp.ne.s32.totalorder %s1940_s15, 0 }
0x2e7e   :  { %1944 = shalt.err (%p2110_p2)  }
0x2e7f   :  { %1946 = vsyncmov [#allocation10 + $0x4] }
0x2e82   :  { %s1947_s2 = vpop.sfrf %1946 }
0x2e83   :  { %p2111_p10 = scmp.ne.s32.totalorder %s1947_s2, 0 }
0x2e85   :  { %1951 = shalt.err (%p2111_p10)  }
0x2e86   :  { %1953 = vsyncmov [#allocation10 + $0x5] }
0x2e89   :  { %s1954_s3 = vpop.sfrf %1953 }
0x2e8a   :  { %p2112_p7 = scmp.ne.s32.totalorder %s1954_s3, 0 }
0x2e8c   :  { %1958 = shalt.err (%p2112_p7)  }

</bundles_post_ra>
